<compile_context>
chip_gen: v6e
topology: v6e:2x2x1
jax: 0.10.0
libtpu: 0.0.40
codegen_flags: <defaults>
</compile_context>

<pallas_src>
import functools
import math

import numpy as np

import jax
import jax.numpy as jnp
from jax import lax
from jax.experimental import pallas as pl
from jax.experimental.pallas import tpu as pltpu

# ----------------------------- configuration --------------------------------
N, H, W = 2, 16, 16            # batch, spatial (H, W powers of two)
C1 = 16                        # in channels  (c1)
C2 = 16                        # out channels (c2)
C_ = int(C2 * 0.5)             # cv1 hidden channels (e=0.5) -> 8
CB = C2 // 4                   # channels per PSConv branch  -> 4
BN_EPS = 1e-5
PAD = 128                      # lane padding of the shift scratch (>= 3*W+3)


# ------------------- PSConv tap geometry (trace-time constants) --------------
def _branch_taps(b, dy, dx):
    """(dr, dc) taps of t, relative to the output pixel, for branch b evaluated
    at cat-conv offset (dy, dx); derived from the asymmetric ZeroPad2d pads."""
    if b == 0:   # yw0: ZeroPad2d(l=3, r=0, t=1, b=0) + (1,3) valid conv
        return [(dy - 1, dx + kx - 3) for kx in range(3)]
    if b == 1:   # yw1: ZeroPad2d(l=0, r=3, t=0, b=1) + (1,3) valid conv
        return [(dy, dx + kx) for kx in range(3)]
    if b == 2:   # yh0: ZeroPad2d(l=0, r=1, t=3, b=0) + (3,1) valid conv
        return [(dy + ky - 3, dx) for ky in range(3)]
    return [(dy + ky, dx - 1) for ky in range(3)]   # yh1: (l=1,r=0,t=0,b=3)


CV1_TAPS = [(ky - 1, kx - 1) for ky in range(3) for kx in range(3)]

PS_TAPS = []
for _b in range(4):
    for _dy in range(2):
        for _dx in range(2):
            for _t in _branch_taps(_b, _dy, _dx):
                if _t not in PS_TAPS:
                    PS_TAPS.append(_t)
NT = len(PS_TAPS)              # 25 distinct taps of t

NF = 4 * 4 * CB                # 64 branch-field rows (4 branches x 4 offsets x CB)
K1 = 9 * C1                    # cv1 im2col K            -> 144
KBR = NT * C_                  # branch matmul K          -> 200
KCAT = NF                      # cat matmul K             -> 64
WROWS = C_ + NF + C2           # rows of the weight/bias slabs -> 88
WCOLS = max(K1, KBR, KCAT)     # cols of the weight slab       -> 200
STACK_ROWS = max(K1, KBR)      # shared im2col scratch rows    -> 200


# ------------------------------ fused kernel --------------------------------
def _bottleneck_p_kernel(x_ref, w_ref, b_ref, o_ref, pad_ref, stack_ref, *, H, W):
    L = x_ref.shape[1]                         # lanes per grid step (k * H * W)
    M = H * W
    n_img = L // M

    # ---- cached lane iotas / tap masks (each built at most once) -----------
    iotas, masks = {}, {}

    def lane_idx(rows):
        if rows not in iotas:
            iotas[rows] = lax.broadcasted_iota(jnp.int32, (rows, L), 1)
        return iotas[rows]

    def tap_mask(rows, dr, dc):
        need_c = dc != 0
        need_r = (dr != 0) and (n_img > 1)     # rows only bleed across images
        if not (need_c or need_r):
            return None
        key = (rows, dr if need_r else 0, dc if need_c else 0)
        if key not in masks:
            idx = lane_idx(rows)
            m = None
            if need_c:
                col = idx & (W - 1)
                m = (col < W - dc) if dc > 0 else (col >= -dc)
            if need_r:
                pos = idx & (M - 1)            # flat index within the image
                mr = (pos < (H - dr) * W) if dr > 0 else (pos >= (-dr) * W)
                m = mr if m is None else jnp.logical_and(m, mr)
            masks[key] = m
        return masks[key]

    def tap(rows, dr, dc):
        # out[:, j] = act[:, j + dr*W + dc], zero outside the HxW image; the
        # vertical overflow lands in the zeroed lane pads, the rest is masked.
        s = dr * W + dc
        v = pad_ref[0:rows, PAD + s:PAD + s + L]
        m = tap_mask(rows, dr, dc)
        return v if m is None else jnp.where(m, v, 0.0)

    def silu(v):
        return v / (1.0 + jnp.exp(-v))

    # ---- stage x into the lane-padded scratch -------------------------------
    c_in = x_ref.shape[0]
    pad_ref[:, 0:PAD] = jnp.zeros((c_in, PAD), jnp.float32)
    pad_ref[:, PAD + L:PAD + L + PAD] = jnp.zeros((c_in, PAD), jnp.float32)
    pad_ref[:, PAD:PAD + L] = x_ref[...]

    # ---- cv1: im2col stack + ONE (C_, 144) x (144, L) matmul ----------------
    for ti, (dr, dc) in enumerate(CV1_TAPS):
        stack_ref[ti * c_in:(ti + 1) * c_in, :] = tap(c_in, dr, dc)
    t = jnp.dot(w_ref[0:C_, 0:K1], stack_ref[0:K1, :],
                preferred_element_type=jnp.float32)
    t = silu(t + b_ref[0:C_, :])                           # (C_, L)

    # ---- PSConv branches: ONE (64, 200) x (200, L) matmul -------------------
    # All 16 branch fields (4 branches x 4 cat offsets) come out of a single
    # block-sparse matmul over the deduplicated taps of t.
    pad_ref[0:C_, PAD:PAD + L] = t
    for ti, (dr, dc) in enumerate(PS_TAPS):
        stack_ref[ti * C_:(ti + 1) * C_, :] = tap(C_, dr, dc)
    f = jnp.dot(w_ref[C_:C_ + NF, 0:KBR], stack_ref[0:KBR, :],
                preferred_element_type=jnp.float32)
    f = silu(f + b_ref[C_:C_ + NF, :])                     # (64, L)

    # ---- cat conv: ONE (C2, 64) x (64, L) matmul + residual -----------------
    y = jnp.dot(w_ref[C_ + NF:WROWS, 0:KCAT], f,
                preferred_element_type=jnp.float32)
    y = silu(y + b_ref[C_ + NF:WROWS, :])                  # (C2, L)
    o_ref[...] = y + x_ref[...]


# ---------------------------- parameter packing ------------------------------
def _fold_bn(gamma, beta, mean, var):
    scale = gamma / jnp.sqrt(var + BN_EPS)
    return scale, beta - mean * scale


def pack_params(raw):
    """Fold BN (inference) into the conv weights and pack everything into one
    (WROWS, WCOLS) weight slab and one (WROWS, 1) bias slab."""
    def fold(bn):
        s, b = _fold_bn(*bn)
        return np.asarray(s, np.float32), np.asarray(b, np.float32)

    w_cv1 = np.asarray(raw['w_cv1'], np.float32)   # (C_, C1, 3, 3)
    w_cw = np.asarray(raw['w_cw'], np.float32)     # (CB, C_, 1, 3)
    w_ch = np.asarray(raw['w_ch'], np.float32)     # (CB, C_, 3, 1)
    w_cat = np.asarray(raw['w_cat'], np.float32)   # (C2, C2, 2, 2)
    s1, b1 = fold(raw['bn1'])
    scw, bcw = fold(raw['bn_cw'])
    sch, bch = fold(raw['bn_ch'])
    scat, bct = fold(raw['bn_cat'])

    wslab = np.zeros((WROWS, WCOLS), np.float32)
    bslab = np.zeros((WROWS, 1), np.float32)

    # cv1: rows [0, C_), K = 9*C1, BN scale folded into the weight rows.
    w1 = np.transpose(w_cv1, (0, 2, 3, 1)).reshape(C_, K1)     # [o, ky, kx, i]
    wslab[0:C_, 0:K1] = s1[:, None] * w1
    bslab[0:C_, 0] = b1

    # PSConv branch fields: rows [C_, C_+NF).  Row = (b, (dy,dx), cb); the
    # block-sparse columns address the deduplicated taps of t.
    for b in range(4):
        w_br = w_cw if b < 2 else w_ch
        s_br, bias_br = (scw, bcw) if b < 2 else (sch, bch)
        for dy in range(2):
            for dx in range(2):
                taps = _branch_taps(b, dy, dx)
                for cb in range(CB):
                    row = C_ + b * (4 * CB) + (dy * 2 + dx) * CB + cb
                    bslab[row, 0] = bias_br[cb]
                    for kidx, tp in enumerate(taps):
                        ti = PS_TAPS.index(tp)
                        wv = w_br[cb, :, 0, kidx] if b < 2 else w_br[cb, :, kidx, 0]
                        wslab[row, ti * C_:(ti + 1) * C_] += s_br[cb] * wv

    # cat 2x2 conv: rows [C_+NF, WROWS), dense (C2, 64) matching the field order.
    for oc in range(C2):
        bslab[C_ + NF + oc, 0] = bct[oc]
        for b in range(4):
            for dy in range(2):
                for dx in range(2):
                    for cb in range(CB):
                        col = b * (4 * CB) + (dy * 2 + dx) * CB + cb
                        wslab[C_ + NF + oc, col] = scat[oc] * w_cat[oc, b * CB + cb, dy, dx]

    return jnp.asarray(wslab), jnp.asarray(bslab)


# ------------------------------ public wrapper -------------------------------
def _default_images_per_step(n):
    kind = ""
    try:
        kind = jax.devices()[0].device_kind.lower()
    except Exception:
        pass
    if "v7" in kind:
        return 1       # 2 TensorCores: one image per step, shard across cores
    return n           # single-TC chips (v5e/v6e): fuse the whole batch


def bottleneck_p_forward(x_nchw, wslab, bslab, *, images_per_step=None):
    n, c1, h, w = x_nchw.shape
    assert c1 == C1, "Bottleneck_P packed for c1 == 16"
    assert (w & (w - 1)) == 0 and (h & (h - 1)) == 0, "H, W must be powers of two"
    assert 3 * w + 3 <= PAD
    m = h * w

    k = images_per_step if images_per_step is not None else _default_images_per_step(n)
    assert n % k == 0
    L = k * m
    assert L % 128 == 0, "lanes per grid step must be a multiple of 128"

    # NCHW -> channel-major lane-dense slab (C1, N*H*W); layout plumbing only.
    x2 = x_nchw.reshape(n, c1, m).transpose(1, 0, 2).reshape(c1, n * m)

    kernel = functools.partial(_bottleneck_p_kernel, H=h, W=w)
    out = pl.pallas_call(
        kernel,
        out_shape=jax.ShapeDtypeStruct((C2, n * m), jnp.float32),
        grid=(n // k,),
        in_specs=[
            pl.BlockSpec((C1, L), lambda i: (0, i)),          # x (k images)
            pl.BlockSpec((WROWS, WCOLS), lambda i: (0, 0)),   # packed weights
            pl.BlockSpec((WROWS, 1), lambda i: (0, 0)),       # packed biases
        ],
        out_specs=pl.BlockSpec((C2, L), lambda i: (0, i)),
        scratch_shapes=[
            pltpu.VMEM((C1, L + 2 * PAD), jnp.float32),       # lane-padded act
            pltpu.VMEM((STACK_ROWS, L), jnp.float32),         # shared im2col stack
        ],
        input_output_aliases={0: 0},
        compiler_params=pltpu.CompilerParams(
            dimension_semantics=("parallel",)),
    )(x2, wslab, bslab)
    return out.reshape(C2, n, h, w).transpose(1, 0, 2, 3)


# -------------------------- deterministic parameters -------------------------
def init_raw_params(key):
    ks = jax.random.split(key, 8)

    def bn_init(k, c):
        k1, k2, k3, k4 = jax.random.split(k, 4)
        return (jax.random.uniform(k1, (c,), jnp.float32, 0.5, 1.5),   # gamma
                0.1 * jax.random.normal(k2, (c,), jnp.float32),        # beta
                0.1 * jax.random.normal(k3, (c,), jnp.float32),        # mean
                jax.random.uniform(k4, (c,), jnp.float32, 0.5, 1.5))   # var

    def conv_init(k, shape):
        fan_in = shape[1] * shape[2] * shape[3]
        return jax.random.normal(k, shape, jnp.float32) / math.sqrt(fan_in)

    return {
        'w_cv1': conv_init(ks[0], (C_, C1, 3, 3)), 'bn1': bn_init(ks[1], C_),
        'w_cw': conv_init(ks[2], (CB, C_, 1, 3)), 'bn_cw': bn_init(ks[3], CB),
        'w_ch': conv_init(ks[4], (CB, C_, 3, 1)), 'bn_ch': bn_init(ks[5], CB),
        'w_cat': conv_init(ks[6], (C2, C2, 2, 2)), 'bn_cat': bn_init(ks[7], C2),
    }


# ------------------------------ pure-JAX reference ---------------------------
def ref_forward(x, raw):
    hp = lax.Precision.HIGHEST

    def conv_bn_silu(v, w, bn, padding):
        y = lax.conv_general_dilated(
            v, w, (1, 1), padding,
            dimension_numbers=('NCHW', 'OIHW', 'NCHW'), precision=hp)
        scale, bias = _fold_bn(*bn)
        y = y * scale[None, :, None, None] + bias[None, :, None, None]
        return y * jax.nn.sigmoid(y)

    t = conv_bn_silu(x, raw['w_cv1'], raw['bn1'], [(1, 1), (1, 1)])
    # PSConv: asymmetric ZeroPad2d folded into conv padding as (H, W) pairs.
    yw0 = conv_bn_silu(t, raw['w_cw'], raw['bn_cw'], [(1, 0), (3, 0)])
    yw1 = conv_bn_silu(t, raw['w_cw'], raw['bn_cw'], [(0, 1), (0, 3)])
    yh0 = conv_bn_silu(t, raw['w_ch'], raw['bn_ch'], [(3, 0), (0, 1)])
    yh1 = conv_bn_silu(t, raw['w_ch'], raw['bn_ch'], [(0, 3), (1, 0)])
    u = jnp.concatenate([yw0, yw1, yh0, yh1], axis=1)
    y = conv_bn_silu(u, raw['w_cat'], raw['bn_cat'], [(0, 0), (0, 0)])
    return x + y


# ----------------------------------- main ------------------------------------
if __name__ == "__main__":
    key = jax.random.PRNGKey(0)
    kx, kp = jax.random.split(key)
    x = jax.random.normal(kx, (N, C1, H, W), jnp.float32)
    raw = init_raw_params(kp)
    wslab, bslab = pack_params(raw)

    out = jax.jit(bottleneck_p_forward)(x, wslab, bslab)
    out = jax.block_until_ready(out)
    assert out.shape == (N, C2, H, W), out.shape

    ref = ref_forward(x, raw)
    err = float(jnp.max(jnp.abs(out - ref)))
    if err < 2e-3:
        print("KERNEL_OK")
    else:
        raise SystemExit(f"mismatch: max abs err = {err}")
</pallas_src>

<mosaic_0001>
module attributes {stable_mosaic.version = 11 : i64} {
  func.func @_bottleneck_p_kernel(%arg0: i32, %arg1: memref<16x512xf32, #tpu.memory_space<vmem>>, %arg2: memref<88x200xf32, #tpu.memory_space<vmem>>, %arg3: memref<88x1xf32, #tpu.memory_space<vmem>>, %arg4: memref<16x512xf32, #tpu.memory_space<vmem>>, %arg5: memref<16x768xf32, #tpu.memory_space<vmem>>, %arg6: memref<200x512xf32, #tpu.memory_space<vmem>>) attributes {dimension_semantics = [#tpu.dimension_semantics<parallel>], iteration_bounds = array<i64: 1>, scalar_prefetch = 0 : i64, scratch_operands = 2 : i64, tpu.core_type = #tpu.core_type<tc>, window_params = [{transform_indices = @transform_0, window_bounds = array<i64: 16, 512>}, {pipeline_mode = #tpu.pipeline_mode<synchronous>, transform_indices = @transform_1, window_bounds = array<i64: 88, 200>}, {pipeline_mode = #tpu.pipeline_mode<synchronous>, transform_indices = @transform_2, window_bounds = array<i64: 88, 1>}, {transform_indices = @transform_3, window_bounds = array<i64: 16, 512>}]} {
    %cst = arith.constant 0.000000e+00 : f32
    %0 = vector.broadcast %cst : f32 to vector<16x128xf32>
    %c0 = arith.constant 0 : index
    %c0_0 = arith.constant 0 : index
    %1 = vector.load %arg5[%c0, %c0_0] : memref<16x768xf32, #tpu.memory_space<vmem>>, vector<16x128xf32>
    tpu.vector_store %arg5[%c0, %c0_0], %0 {strides = array<i32>} : memref<16x768xf32, #tpu.memory_space<vmem>>, vector<16x128xf32>,
    %cst_1 = arith.constant 0.000000e+00 : f32
    %2 = vector.broadcast %cst_1 : f32 to vector<16x128xf32>
    %c0_2 = arith.constant 0 : index
    %c640 = arith.constant 640 : index
    %3 = vector.load %arg5[%c0_2, %c640] : memref<16x768xf32, #tpu.memory_space<vmem>>, vector<16x128xf32>
    tpu.vector_store %arg5[%c0_2, %c640], %2 {strides = array<i32>} : memref<16x768xf32, #tpu.memory_space<vmem>>, vector<16x128xf32>,
    %c0_3 = arith.constant 0 : index
    %c0_4 = arith.constant 0 : index
    %4 = vector.load %arg1[%c0_3, %c0_4] : memref<16x512xf32, #tpu.memory_space<vmem>>, vector<16x512xf32>
    %c0_5 = arith.constant 0 : index
    %c128 = arith.constant 128 : index
    %5 = vector.load %arg5[%c0_5, %c128] : memref<16x768xf32, #tpu.memory_space<vmem>>, vector<16x512xf32>
    tpu.vector_store %arg5[%c0_5, %c128], %4 {strides = array<i32>} : memref<16x768xf32, #tpu.memory_space<vmem>>, vector<16x512xf32>,
    %c0_6 = arith.constant 0 : index
    %c111 = arith.constant 111 : index
    %6 = vector.load %arg5[%c0_6, %c111] : memref<16x768xf32, #tpu.memory_space<vmem>>, vector<16x512xf32>
    %7 = tpu.iota {dimensions = array<i32: 1>} : vector<16x512xi32>
    %c15_i32 = arith.constant 15 : i32
    %8 = vector.broadcast %c15_i32 : i32 to vector<16x512xi32>
    %9 = arith.andi %7, %8 : vector<16x512xi32>
    %c1_i32 = arith.constant 1 : i32
    %10 = vector.broadcast %c1_i32 : i32 to vector<16x512xi32>
    %11 = arith.cmpi sge, %9, %10 : vector<16x512xi32>
    %c255_i32 = arith.constant 255 : i32
    %12 = vector.broadcast %c255_i32 : i32 to vector<16x512xi32>
    %13 = arith.andi %7, %12 : vector<16x512xi32>
    %c16_i32 = arith.constant 16 : i32
    %14 = vector.broadcast %c16_i32 : i32 to vector<16x512xi32>
    %15 = arith.cmpi sge, %13, %14 : vector<16x512xi32>
    %16 = arith.andi %11, %15 : vector<16x512xi1>
    %cst_7 = arith.constant 0.000000e+00 : f32
    %17 = vector.broadcast %cst_7 : f32 to vector<16x512xf32>
    %18 = arith.select %16, %6, %17 : vector<16x512xi1>, vector<16x512xf32>
    %c0_8 = arith.constant 0 : index
    %c0_9 = arith.constant 0 : index
    %19 = vector.load %arg6[%c0_8, %c0_9] : memref<200x512xf32, #tpu.memory_space<vmem>>, vector<16x512xf32>
    tpu.vector_store %arg6[%c0_8, %c0_9], %18 {strides = array<i32>} : memref<200x512xf32, #tpu.memory_space<vmem>>, vector<16x512xf32>,
    %c0_10 = arith.constant 0 : index
    %c112 = arith.constant 112 : index
    %20 = vector.load %arg5[%c0_10, %c112] : memref<16x768xf32, #tpu.memory_space<vmem>>, vector<16x512xf32>
    %c255_i32_11 = arith.constant 255 : i32
    %21 = vector.broadcast %c255_i32_11 : i32 to vector<16x512xi32>
    %22 = arith.andi %7, %21 : vector<16x512xi32>
    %c16_i32_12 = arith.constant 16 : i32
    %23 = vector.broadcast %c16_i32_12 : i32 to vector<16x512xi32>
    %24 = arith.cmpi sge, %22, %23 : vector<16x512xi32>
    %cst_13 = arith.constant 0.000000e+00 : f32
    %25 = vector.broadcast %cst_13 : f32 to vector<16x512xf32>
    %26 = arith.select %24, %20, %25 : vector<16x512xi1>, vector<16x512xf32>
    %c16 = arith.constant 16 : index
    %c0_14 = arith.constant 0 : index
    %27 = vector.load %arg6[%c16, %c0_14] : memref<200x512xf32, #tpu.memory_space<vmem>>, vector<16x512xf32>
    tpu.vector_store %arg6[%c16, %c0_14], %26 {strides = array<i32>} : memref<200x512xf32, #tpu.memory_space<vmem>>, vector<16x512xf32>,
    %c0_15 = arith.constant 0 : index
    %c113 = arith.constant 113 : index
    %28 = vector.load %arg5[%c0_15, %c113] : memref<16x768xf32, #tpu.memory_space<vmem>>, vector<16x512xf32>
    %c15_i32_16 = arith.constant 15 : i32
    %29 = vector.broadcast %c15_i32_16 : i32 to vector<16x512xi32>
    %30 = arith.andi %7, %29 : vector<16x512xi32>
    %c15_i32_17 = arith.constant 15 : i32
    %31 = vector.broadcast %c15_i32_17 : i32 to vector<16x512xi32>
    %32 = arith.cmpi slt, %30, %31 : vector<16x512xi32>
    %c255_i32_18 = arith.constant 255 : i32
    %33 = vector.broadcast %c255_i32_18 : i32 to vector<16x512xi32>
    %34 = arith.andi %7, %33 : vector<16x512xi32>
    %c16_i32_19 = arith.constant 16 : i32
    %35 = vector.broadcast %c16_i32_19 : i32 to vector<16x512xi32>
    %36 = arith.cmpi sge, %34, %35 : vector<16x512xi32>
    %37 = arith.andi %32, %36 : vector<16x512xi1>
    %cst_20 = arith.constant 0.000000e+00 : f32
    %38 = vector.broadcast %cst_20 : f32 to vector<16x512xf32>
    %39 = arith.select %37, %28, %38 : vector<16x512xi1>, vector<16x512xf32>
    %c32 = arith.constant 32 : index
    %c0_21 = arith.constant 0 : index
    %40 = vector.load %arg6[%c32, %c0_21] : memref<200x512xf32, #tpu.memory_space<vmem>>, vector<16x512xf32>
    tpu.vector_store %arg6[%c32, %c0_21], %39 {strides = array<i32>} : memref<200x512xf32, #tpu.memory_space<vmem>>, vector<16x512xf32>,
    %c0_22 = arith.constant 0 : index
    %c127 = arith.constant 127 : index
    %41 = vector.load %arg5[%c0_22, %c127] : memref<16x768xf32, #tpu.memory_space<vmem>>, vector<16x512xf32>
    %c15_i32_23 = arith.constant 15 : i32
    %42 = vector.broadcast %c15_i32_23 : i32 to vector<16x512xi32>
    %43 = arith.andi %7, %42 : vector<16x512xi32>
    %c1_i32_24 = arith.constant 1 : i32
    %44 = vector.broadcast %c1_i32_24 : i32 to vector<16x512xi32>
    %45 = arith.cmpi sge, %43, %44 : vector<16x512xi32>
    %cst_25 = arith.constant 0.000000e+00 : f32
    %46 = vector.broadcast %cst_25 : f32 to vector<16x512xf32>
    %47 = arith.select %45, %41, %46 : vector<16x512xi1>, vector<16x512xf32>
    %c48 = arith.constant 48 : index
    %c0_26 = arith.constant 0 : index
    %48 = vector.load %arg6[%c48, %c0_26] : memref<200x512xf32, #tpu.memory_space<vmem>>, vector<16x512xf32>
    tpu.vector_store %arg6[%c48, %c0_26], %47 {strides = array<i32>} : memref<200x512xf32, #tpu.memory_space<vmem>>, vector<16x512xf32>,
    %c0_27 = arith.constant 0 : index
    %c128_28 = arith.constant 128 : index
    %49 = vector.load %arg5[%c0_27, %c128_28] : memref<16x768xf32, #tpu.memory_space<vmem>>, vector<16x512xf32>
    %c64 = arith.constant 64 : index
    %c0_29 = arith.constant 0 : index
    %50 = vector.load %arg6[%c64, %c0_29] : memref<200x512xf32, #tpu.memory_space<vmem>>, vector<16x512xf32>
    tpu.vector_store %arg6[%c64, %c0_29], %49 {strides = array<i32>} : memref<200x512xf32, #tpu.memory_space<vmem>>, vector<16x512xf32>,
    %c0_30 = arith.constant 0 : index
    %c129 = arith.constant 129 : index
    %51 = vector.load %arg5[%c0_30, %c129] : memref<16x768xf32, #tpu.memory_space<vmem>>, vector<16x512xf32>
    %c15_i32_31 = arith.constant 15 : i32
    %52 = vector.broadcast %c15_i32_31 : i32 to vector<16x512xi32>
    %53 = arith.andi %7, %52 : vector<16x512xi32>
    %c15_i32_32 = arith.constant 15 : i32
    %54 = vector.broadcast %c15_i32_32 : i32 to vector<16x512xi32>
    %55 = arith.cmpi slt, %53, %54 : vector<16x512xi32>
    %cst_33 = arith.constant 0.000000e+00 : f32
    %56 = vector.broadcast %cst_33 : f32 to vector<16x512xf32>
    %57 = arith.select %55, %51, %56 : vector<16x512xi1>, vector<16x512xf32>
    %c80 = arith.constant 80 : index
    %c0_34 = arith.constant 0 : index
    %58 = vector.load %arg6[%c80, %c0_34] : memref<200x512xf32, #tpu.memory_space<vmem>>, vector<16x512xf32>
    tpu.vector_store %arg6[%c80, %c0_34], %57 {strides = array<i32>} : memref<200x512xf32, #tpu.memory_space<vmem>>, vector<16x512xf32>,
    %c0_35 = arith.constant 0 : index
    %c143 = arith.constant 143 : index
    %59 = vector.load %arg5[%c0_35, %c143] : memref<16x768xf32, #tpu.memory_space<vmem>>, vector<16x512xf32>
    %c15_i32_36 = arith.constant 15 : i32
    %60 = vector.broadcast %c15_i32_36 : i32 to vector<16x512xi32>
    %61 = arith.andi %7, %60 : vector<16x512xi32>
    %c1_i32_37 = arith.constant 1 : i32
    %62 = vector.broadcast %c1_i32_37 : i32 to vector<16x512xi32>
    %63 = arith.cmpi sge, %61, %62 : vector<16x512xi32>
    %c255_i32_38 = arith.constant 255 : i32
    %64 = vector.broadcast %c255_i32_38 : i32 to vector<16x512xi32>
    %65 = arith.andi %7, %64 : vector<16x512xi32>
    %c240_i32 = arith.constant 240 : i32
    %66 = vector.broadcast %c240_i32 : i32 to vector<16x512xi32>
    %67 = arith.cmpi slt, %65, %66 : vector<16x512xi32>
    %68 = arith.andi %63, %67 : vector<16x512xi1>
    %cst_39 = arith.constant 0.000000e+00 : f32
    %69 = vector.broadcast %cst_39 : f32 to vector<16x512xf32>
    %70 = arith.select %68, %59, %69 : vector<16x512xi1>, vector<16x512xf32>
    %c96 = arith.constant 96 : index
    %c0_40 = arith.constant 0 : index
    %71 = vector.load %arg6[%c96, %c0_40] : memref<200x512xf32, #tpu.memory_space<vmem>>, vector<16x512xf32>
    tpu.vector_store %arg6[%c96, %c0_40], %70 {strides = array<i32>} : memref<200x512xf32, #tpu.memory_space<vmem>>, vector<16x512xf32>,
    %c0_41 = arith.constant 0 : index
    %c144 = arith.constant 144 : index
    %72 = vector.load %arg5[%c0_41, %c144] : memref<16x768xf32, #tpu.memory_space<vmem>>, vector<16x512xf32>
    %c255_i32_42 = arith.constant 255 : i32
    %73 = vector.broadcast %c255_i32_42 : i32 to vector<16x512xi32>
    %74 = arith.andi %7, %73 : vector<16x512xi32>
    %c240_i32_43 = arith.constant 240 : i32
    %75 = vector.broadcast %c240_i32_43 : i32 to vector<16x512xi32>
    %76 = arith.cmpi slt, %74, %75 : vector<16x512xi32>
    %cst_44 = arith.constant 0.000000e+00 : f32
    %77 = vector.broadcast %cst_44 : f32 to vector<16x512xf32>
    %78 = arith.select %76, %72, %77 : vector<16x512xi1>, vector<16x512xf32>
    %c112_45 = arith.constant 112 : index
    %c0_46 = arith.constant 0 : index
    %79 = vector.load %arg6[%c112_45, %c0_46] : memref<200x512xf32, #tpu.memory_space<vmem>>, vector<16x512xf32>
    tpu.vector_store %arg6[%c112_45, %c0_46], %78 {strides = array<i32>} : memref<200x512xf32, #tpu.memory_space<vmem>>, vector<16x512xf32>,
    %c0_47 = arith.constant 0 : index
    %c145 = arith.constant 145 : index
    %80 = vector.load %arg5[%c0_47, %c145] : memref<16x768xf32, #tpu.memory_space<vmem>>, vector<16x512xf32>
    %c15_i32_48 = arith.constant 15 : i32
    %81 = vector.broadcast %c15_i32_48 : i32 to vector<16x512xi32>
    %82 = arith.andi %7, %81 : vector<16x512xi32>
    %c15_i32_49 = arith.constant 15 : i32
    %83 = vector.broadcast %c15_i32_49 : i32 to vector<16x512xi32>
    %84 = arith.cmpi slt, %82, %83 : vector<16x512xi32>
    %c255_i32_50 = arith.constant 255 : i32
    %85 = vector.broadcast %c255_i32_50 : i32 to vector<16x512xi32>
    %86 = arith.andi %7, %85 : vector<16x512xi32>
    %c240_i32_51 = arith.constant 240 : i32
    %87 = vector.broadcast %c240_i32_51 : i32 to vector<16x512xi32>
    %88 = arith.cmpi slt, %86, %87 : vector<16x512xi32>
    %89 = arith.andi %84, %88 : vector<16x512xi1>
    %cst_52 = arith.constant 0.000000e+00 : f32
    %90 = vector.broadcast %cst_52 : f32 to vector<16x512xf32>
    %91 = arith.select %89, %80, %90 : vector<16x512xi1>, vector<16x512xf32>
    %c128_53 = arith.constant 128 : index
    %c0_54 = arith.constant 0 : index
    %92 = vector.load %arg6[%c128_53, %c0_54] : memref<200x512xf32, #tpu.memory_space<vmem>>, vector<16x512xf32>
    tpu.vector_store %arg6[%c128_53, %c0_54], %91 {strides = array<i32>} : memref<200x512xf32, #tpu.memory_space<vmem>>, vector<16x512xf32>,
    %c0_55 = arith.constant 0 : index
    %c0_56 = arith.constant 0 : index
    %93 = vector.load %arg2[%c0_55, %c0_56] : memref<88x200xf32, #tpu.memory_space<vmem>>, vector<8x144xf32>
    %c0_57 = arith.constant 0 : index
    %c0_58 = arith.constant 0 : index
    %94 = vector.load %arg6[%c0_57, %c0_58] : memref<200x512xf32, #tpu.memory_space<vmem>>, vector<144x512xf32>
    %cst_59 = arith.constant dense<0.000000e+00> : vector<8x512xf32>
    %95 = tpu.matmul %93, %94, %cst_59 {dimension_numbers = #tpu.dot_dimension_numbers<[1], [0], [0], [1], [0, 0, 1, 1], [], []>} : vector<8x144xf32>, vector<144x512xf32>, vector<8x512xf32> -> vector<8x512xf32>
    %c0_60 = arith.constant 0 : index
    %c0_61 = arith.constant 0 : index
    %96 = vector.load %arg3[%c0_60, %c0_61] : memref<88x1xf32, #tpu.memory_space<vmem>>, vector<8x1xf32>
    %97 = vector.broadcast %96 : vector<8x1xf32> to vector<8x512xf32>
    %98 = arith.addf %95, %97 : vector<8x512xf32>
    %cst_62 = arith.constant 0.000000e+00 : f32
    %99 = vector.broadcast %cst_62 : f32 to vector<8x512xf32>
    %100 = arith.subf %99, %98 : vector<8x512xf32>
    %101 = math.exp %100 : vector<8x512xf32>
    %cst_63 = arith.constant 1.000000e+00 : f32
    %102 = vector.broadcast %cst_63 : f32 to vector<8x512xf32>
    %103 = arith.addf %102, %101 : vector<8x512xf32>
    %104 = arith.divf %98, %103 : vector<8x512xf32>
    %c0_64 = arith.constant 0 : index
    %c128_65 = arith.constant 128 : index
    %105 = vector.load %arg5[%c0_64, %c128_65] : memref<16x768xf32, #tpu.memory_space<vmem>>, vector<8x512xf32>
    tpu.vector_store %arg5[%c0_64, %c128_65], %104 {strides = array<i32>} : memref<16x768xf32, #tpu.memory_space<vmem>>, vector<8x512xf32>,
    %c0_66 = arith.constant 0 : index
    %c109 = arith.constant 109 : index
    %106 = vector.load %arg5[%c0_66, %c109] : memref<16x768xf32, #tpu.memory_space<vmem>>, vector<8x512xf32>
    %107 = tpu.iota {dimensions = array<i32: 1>} : vector<8x512xi32>
    %c15_i32_67 = arith.constant 15 : i32
    %108 = vector.broadcast %c15_i32_67 : i32 to vector<8x512xi32>
    %109 = arith.andi %107, %108 : vector<8x512xi32>
    %c3_i32 = arith.constant 3 : i32
    %110 = vector.broadcast %c3_i32 : i32 to vector<8x512xi32>
    %111 = arith.cmpi sge, %109, %110 : vector<8x512xi32>
    %c255_i32_68 = arith.constant 255 : i32
    %112 = vector.broadcast %c255_i32_68 : i32 to vector<8x512xi32>
    %113 = arith.andi %107, %112 : vector<8x512xi32>
    %c16_i32_69 = arith.constant 16 : i32
    %114 = vector.broadcast %c16_i32_69 : i32 to vector<8x512xi32>
    %115 = arith.cmpi sge, %113, %114 : vector<8x512xi32>
    %116 = arith.andi %111, %115 : vector<8x512xi1>
    %cst_70 = arith.constant 0.000000e+00 : f32
    %117 = vector.broadcast %cst_70 : f32 to vector<8x512xf32>
    %118 = arith.select %116, %106, %117 : vector<8x512xi1>, vector<8x512xf32>
    %c0_71 = arith.constant 0 : index
    %c0_72 = arith.constant 0 : index
    %119 = vector.load %arg6[%c0_71, %c0_72] : memref<200x512xf32, #tpu.memory_space<vmem>>, vector<8x512xf32>
    tpu.vector_store %arg6[%c0_71, %c0_72], %118 {strides = array<i32>} : memref<200x512xf32, #tpu.memory_space<vmem>>, vector<8x512xf32>,
    %c0_73 = arith.constant 0 : index
    %c110 = arith.constant 110 : index
    %120 = vector.load %arg5[%c0_73, %c110] : memref<16x768xf32, #tpu.memory_space<vmem>>, vector<8x512xf32>
    %c15_i32_74 = arith.constant 15 : i32
    %121 = vector.broadcast %c15_i32_74 : i32 to vector<8x512xi32>
    %122 = arith.andi %107, %121 : vector<8x512xi32>
    %c2_i32 = arith.constant 2 : i32
    %123 = vector.broadcast %c2_i32 : i32 to vector<8x512xi32>
    %124 = arith.cmpi sge, %122, %123 : vector<8x512xi32>
    %c255_i32_75 = arith.constant 255 : i32
    %125 = vector.broadcast %c255_i32_75 : i32 to vector<8x512xi32>
    %126 = arith.andi %107, %125 : vector<8x512xi32>
    %c16_i32_76 = arith.constant 16 : i32
    %127 = vector.broadcast %c16_i32_76 : i32 to vector<8x512xi32>
    %128 = arith.cmpi sge, %126, %127 : vector<8x512xi32>
    %129 = arith.andi %124, %128 : vector<8x512xi1>
    %cst_77 = arith.constant 0.000000e+00 : f32
    %130 = vector.broadcast %cst_77 : f32 to vector<8x512xf32>
    %131 = arith.select %129, %120, %130 : vector<8x512xi1>, vector<8x512xf32>
    %c8 = arith.constant 8 : index
    %c0_78 = arith.constant 0 : index
    %132 = vector.load %arg6[%c8, %c0_78] : memref<200x512xf32, #tpu.memory_space<vmem>>, vector<8x512xf32>
    tpu.vector_store %arg6[%c8, %c0_78], %131 {strides = array<i32>} : memref<200x512xf32, #tpu.memory_space<vmem>>, vector<8x512xf32>,
    %c0_79 = arith.constant 0 : index
    %c111_80 = arith.constant 111 : index
    %133 = vector.load %arg5[%c0_79, %c111_80] : memref<16x768xf32, #tpu.memory_space<vmem>>, vector<8x512xf32>
    %c15_i32_81 = arith.constant 15 : i32
    %134 = vector.broadcast %c15_i32_81 : i32 to vector<8x512xi32>
    %135 = arith.andi %107, %134 : vector<8x512xi32>
    %c1_i32_82 = arith.constant 1 : i32
    %136 = vector.broadcast %c1_i32_82 : i32 to vector<8x512xi32>
    %137 = arith.cmpi sge, %135, %136 : vector<8x512xi32>
    %c255_i32_83 = arith.constant 255 : i32
    %138 = vector.broadcast %c255_i32_83 : i32 to vector<8x512xi32>
    %139 = arith.andi %107, %138 : vector<8x512xi32>
    %c16_i32_84 = arith.constant 16 : i32
    %140 = vector.broadcast %c16_i32_84 : i32 to vector<8x512xi32>
    %141 = arith.cmpi sge, %139, %140 : vector<8x512xi32>
    %142 = arith.andi %137, %141 : vector<8x512xi1>
    %cst_85 = arith.constant 0.000000e+00 : f32
    %143 = vector.broadcast %cst_85 : f32 to vector<8x512xf32>
    %144 = arith.select %142, %133, %143 : vector<8x512xi1>, vector<8x512xf32>
    %c16_86 = arith.constant 16 : index
    %c0_87 = arith.constant 0 : index
    %145 = vector.load %arg6[%c16_86, %c0_87] : memref<200x512xf32, #tpu.memory_space<vmem>>, vector<8x512xf32>
    tpu.vector_store %arg6[%c16_86, %c0_87], %144 {strides = array<i32>} : memref<200x512xf32, #tpu.memory_space<vmem>>, vector<8x512xf32>,
    %c0_88 = arith.constant 0 : index
    %c112_89 = arith.constant 112 : index
    %146 = vector.load %arg5[%c0_88, %c112_89] : memref<16x768xf32, #tpu.memory_space<vmem>>, vector<8x512xf32>
    %c255_i32_90 = arith.constant 255 : i32
    %147 = vector.broadcast %c255_i32_90 : i32 to vector<8x512xi32>
    %148 = arith.andi %107, %147 : vector<8x512xi32>
    %c16_i32_91 = arith.constant 16 : i32
    %149 = vector.broadcast %c16_i32_91 : i32 to vector<8x512xi32>
    %150 = arith.cmpi sge, %148, %149 : vector<8x512xi32>
    %cst_92 = arith.constant 0.000000e+00 : f32
    %151 = vector.broadcast %cst_92 : f32 to vector<8x512xf32>
    %152 = arith.select %150, %146, %151 : vector<8x512xi1>, vector<8x512xf32>
    %c24 = arith.constant 24 : index
    %c0_93 = arith.constant 0 : index
    %153 = vector.load %arg6[%c24, %c0_93] : memref<200x512xf32, #tpu.memory_space<vmem>>, vector<8x512xf32>
    tpu.vector_store %arg6[%c24, %c0_93], %152 {strides = array<i32>} : memref<200x512xf32, #tpu.memory_space<vmem>>, vector<8x512xf32>,
    %c0_94 = arith.constant 0 : index
    %c125 = arith.constant 125 : index
    %154 = vector.load %arg5[%c0_94, %c125] : memref<16x768xf32, #tpu.memory_space<vmem>>, vector<8x512xf32>
    %c15_i32_95 = arith.constant 15 : i32
    %155 = vector.broadcast %c15_i32_95 : i32 to vector<8x512xi32>
    %156 = arith.andi %107, %155 : vector<8x512xi32>
    %c3_i32_96 = arith.constant 3 : i32
    %157 = vector.broadcast %c3_i32_96 : i32 to vector<8x512xi32>
    %158 = arith.cmpi sge, %156, %157 : vector<8x512xi32>
    %cst_97 = arith.constant 0.000000e+00 : f32
    %159 = vector.broadcast %cst_97 : f32 to vector<8x512xf32>
    %160 = arith.select %158, %154, %159 : vector<8x512xi1>, vector<8x512xf32>
    %c32_98 = arith.constant 32 : index
    %c0_99 = arith.constant 0 : index
    %161 = vector.load %arg6[%c32_98, %c0_99] : memref<200x512xf32, #tpu.memory_space<vmem>>, vector<8x512xf32>
    tpu.vector_store %arg6[%c32_98, %c0_99], %160 {strides = array<i32>} : memref<200x512xf32, #tpu.memory_space<vmem>>, vector<8x512xf32>,
    %c0_100 = arith.constant 0 : index
    %c126 = arith.constant 126 : index
    %162 = vector.load %arg5[%c0_100, %c126] : memref<16x768xf32, #tpu.memory_space<vmem>>, vector<8x512xf32>
    %c15_i32_101 = arith.constant 15 : i32
    %163 = vector.broadcast %c15_i32_101 : i32 to vector<8x512xi32>
    %164 = arith.andi %107, %163 : vector<8x512xi32>
    %c2_i32_102 = arith.constant 2 : i32
    %165 = vector.broadcast %c2_i32_102 : i32 to vector<8x512xi32>
    %166 = arith.cmpi sge, %164, %165 : vector<8x512xi32>
    %cst_103 = arith.constant 0.000000e+00 : f32
    %167 = vector.broadcast %cst_103 : f32 to vector<8x512xf32>
    %168 = arith.select %166, %162, %167 : vector<8x512xi1>, vector<8x512xf32>
    %c40 = arith.constant 40 : index
    %c0_104 = arith.constant 0 : index
    %169 = vector.load %arg6[%c40, %c0_104] : memref<200x512xf32, #tpu.memory_space<vmem>>, vector<8x512xf32>
    tpu.vector_store %arg6[%c40, %c0_104], %168 {strides = array<i32>} : memref<200x512xf32, #tpu.memory_space<vmem>>, vector<8x512xf32>,
    %c0_105 = arith.constant 0 : index
    %c127_106 = arith.constant 127 : index
    %170 = vector.load %arg5[%c0_105, %c127_106] : memref<16x768xf32, #tpu.memory_space<vmem>>, vector<8x512xf32>
    %c15_i32_107 = arith.constant 15 : i32
    %171 = vector.broadcast %c15_i32_107 : i32 to vector<8x512xi32>
    %172 = arith.andi %107, %171 : vector<8x512xi32>
    %c1_i32_108 = arith.constant 1 : i32
    %173 = vector.broadcast %c1_i32_108 : i32 to vector<8x512xi32>
    %174 = arith.cmpi sge, %172, %173 : vector<8x512xi32>
    %cst_109 = arith.constant 0.000000e+00 : f32
    %175 = vector.broadcast %cst_109 : f32 to vector<8x512xf32>
    %176 = arith.select %174, %170, %175 : vector<8x512xi1>, vector<8x512xf32>
    %c48_110 = arith.constant 48 : index
    %c0_111 = arith.constant 0 : index
    %177 = vector.load %arg6[%c48_110, %c0_111] : memref<200x512xf32, #tpu.memory_space<vmem>>, vector<8x512xf32>
    tpu.vector_store %arg6[%c48_110, %c0_111], %176 {strides = array<i32>} : memref<200x512xf32, #tpu.memory_space<vmem>>, vector<8x512xf32>,
    %c0_112 = arith.constant 0 : index
    %c128_113 = arith.constant 128 : index
    %178 = vector.load %arg5[%c0_112, %c128_113] : memref<16x768xf32, #tpu.memory_space<vmem>>, vector<8x512xf32>
    %c56 = arith.constant 56 : index
    %c0_114 = arith.constant 0 : index
    %179 = vector.load %arg6[%c56, %c0_114] : memref<200x512xf32, #tpu.memory_space<vmem>>, vector<8x512xf32>
    tpu.vector_store %arg6[%c56, %c0_114], %178 {strides = array<i32>} : memref<200x512xf32, #tpu.memory_space<vmem>>, vector<8x512xf32>,
    %c0_115 = arith.constant 0 : index
    %c129_116 = arith.constant 129 : index
    %180 = vector.load %arg5[%c0_115, %c129_116] : memref<16x768xf32, #tpu.memory_space<vmem>>, vector<8x512xf32>
    %c15_i32_117 = arith.constant 15 : i32
    %181 = vector.broadcast %c15_i32_117 : i32 to vector<8x512xi32>
    %182 = arith.andi %107, %181 : vector<8x512xi32>
    %c15_i32_118 = arith.constant 15 : i32
    %183 = vector.broadcast %c15_i32_118 : i32 to vector<8x512xi32>
    %184 = arith.cmpi slt, %182, %183 : vector<8x512xi32>
    %cst_119 = arith.constant 0.000000e+00 : f32
    %185 = vector.broadcast %cst_119 : f32 to vector<8x512xf32>
    %186 = arith.select %184, %180, %185 : vector<8x512xi1>, vector<8x512xf32>
    %c64_120 = arith.constant 64 : index
    %c0_121 = arith.constant 0 : index
    %187 = vector.load %arg6[%c64_120, %c0_121] : memref<200x512xf32, #tpu.memory_space<vmem>>, vector<8x512xf32>
    tpu.vector_store %arg6[%c64_120, %c0_121], %186 {strides = array<i32>} : memref<200x512xf32, #tpu.memory_space<vmem>>, vector<8x512xf32>,
    %c0_122 = arith.constant 0 : index
    %c130 = arith.constant 130 : index
    %188 = vector.load %arg5[%c0_122, %c130] : memref<16x768xf32, #tpu.memory_space<vmem>>, vector<8x512xf32>
    %c15_i32_123 = arith.constant 15 : i32
    %189 = vector.broadcast %c15_i32_123 : i32 to vector<8x512xi32>
    %190 = arith.andi %107, %189 : vector<8x512xi32>
    %c14_i32 = arith.constant 14 : i32
    %191 = vector.broadcast %c14_i32 : i32 to vector<8x512xi32>
    %192 = arith.cmpi slt, %190, %191 : vector<8x512xi32>
    %cst_124 = arith.constant 0.000000e+00 : f32
    %193 = vector.broadcast %cst_124 : f32 to vector<8x512xf32>
    %194 = arith.select %192, %188, %193 : vector<8x512xi1>, vector<8x512xf32>
    %c72 = arith.constant 72 : index
    %c0_125 = arith.constant 0 : index
    %195 = vector.load %arg6[%c72, %c0_125] : memref<200x512xf32, #tpu.memory_space<vmem>>, vector<8x512xf32>
    tpu.vector_store %arg6[%c72, %c0_125], %194 {strides = array<i32>} : memref<200x512xf32, #tpu.memory_space<vmem>>, vector<8x512xf32>,
    %c0_126 = arith.constant 0 : index
    %c131 = arith.constant 131 : index
    %196 = vector.load %arg5[%c0_126, %c131] : memref<16x768xf32, #tpu.memory_space<vmem>>, vector<8x512xf32>
    %c15_i32_127 = arith.constant 15 : i32
    %197 = vector.broadcast %c15_i32_127 : i32 to vector<8x512xi32>
    %198 = arith.andi %107, %197 : vector<8x512xi32>
    %c13_i32 = arith.constant 13 : i32
    %199 = vector.broadcast %c13_i32 : i32 to vector<8x512xi32>
    %200 = arith.cmpi slt, %198, %199 : vector<8x512xi32>
    %cst_128 = arith.constant 0.000000e+00 : f32
    %201 = vector.broadcast %cst_128 : f32 to vector<8x512xf32>
    %202 = arith.select %200, %196, %201 : vector<8x512xi1>, vector<8x512xf32>
    %c80_129 = arith.constant 80 : index
    %c0_130 = arith.constant 0 : index
    %203 = vector.load %arg6[%c80_129, %c0_130] : memref<200x512xf32, #tpu.memory_space<vmem>>, vector<8x512xf32>
    tpu.vector_store %arg6[%c80_129, %c0_130], %202 {strides = array<i32>} : memref<200x512xf32, #tpu.memory_space<vmem>>, vector<8x512xf32>,
    %c0_131 = arith.constant 0 : index
    %c144_132 = arith.constant 144 : index
    %204 = vector.load %arg5[%c0_131, %c144_132] : memref<16x768xf32, #tpu.memory_space<vmem>>, vector<8x512xf32>
    %c255_i32_133 = arith.constant 255 : i32
    %205 = vector.broadcast %c255_i32_133 : i32 to vector<8x512xi32>
    %206 = arith.andi %107, %205 : vector<8x512xi32>
    %c240_i32_134 = arith.constant 240 : i32
    %207 = vector.broadcast %c240_i32_134 : i32 to vector<8x512xi32>
    %208 = arith.cmpi slt, %206, %207 : vector<8x512xi32>
    %cst_135 = arith.constant 0.000000e+00 : f32
    %209 = vector.broadcast %cst_135 : f32 to vector<8x512xf32>
    %210 = arith.select %208, %204, %209 : vector<8x512xi1>, vector<8x512xf32>
    %c88 = arith.constant 88 : index
    %c0_136 = arith.constant 0 : index
    %211 = vector.load %arg6[%c88, %c0_136] : memref<200x512xf32, #tpu.memory_space<vmem>>, vector<8x512xf32>
    tpu.vector_store %arg6[%c88, %c0_136], %210 {strides = array<i32>} : memref<200x512xf32, #tpu.memory_space<vmem>>, vector<8x512xf32>,
    %c0_137 = arith.constant 0 : index
    %c145_138 = arith.constant 145 : index
    %212 = vector.load %arg5[%c0_137, %c145_138] : memref<16x768xf32, #tpu.memory_space<vmem>>, vector<8x512xf32>
    %c15_i32_139 = arith.constant 15 : i32
    %213 = vector.broadcast %c15_i32_139 : i32 to vector<8x512xi32>
    %214 = arith.andi %107, %213 : vector<8x512xi32>
    %c15_i32_140 = arith.constant 15 : i32
    %215 = vector.broadcast %c15_i32_140 : i32 to vector<8x512xi32>
    %216 = arith.cmpi slt, %214, %215 : vector<8x512xi32>
    %c255_i32_141 = arith.constant 255 : i32
    %217 = vector.broadcast %c255_i32_141 : i32 to vector<8x512xi32>
    %218 = arith.andi %107, %217 : vector<8x512xi32>
    %c240_i32_142 = arith.constant 240 : i32
    %219 = vector.broadcast %c240_i32_142 : i32 to vector<8x512xi32>
    %220 = arith.cmpi slt, %218, %219 : vector<8x512xi32>
    %221 = arith.andi %216, %220 : vector<8x512xi1>
    %cst_143 = arith.constant 0.000000e+00 : f32
    %222 = vector.broadcast %cst_143 : f32 to vector<8x512xf32>
    %223 = arith.select %221, %212, %222 : vector<8x512xi1>, vector<8x512xf32>
    %c96_144 = arith.constant 96 : index
    %c0_145 = arith.constant 0 : index
    %224 = vector.load %arg6[%c96_144, %c0_145] : memref<200x512xf32, #tpu.memory_space<vmem>>, vector<8x512xf32>
    tpu.vector_store %arg6[%c96_144, %c0_145], %223 {strides = array<i32>} : memref<200x512xf32, #tpu.memory_space<vmem>>, vector<8x512xf32>,
    %c0_146 = arith.constant 0 : index
    %c146 = arith.constant 146 : index
    %225 = vector.load %arg5[%c0_146, %c146] : memref<16x768xf32, #tpu.memory_space<vmem>>, vector<8x512xf32>
    %c15_i32_147 = arith.constant 15 : i32
    %226 = vector.broadcast %c15_i32_147 : i32 to vector<8x512xi32>
    %227 = arith.andi %107, %226 : vector<8x512xi32>
    %c14_i32_148 = arith.constant 14 : i32
    %228 = vector.broadcast %c14_i32_148 : i32 to vector<8x512xi32>
    %229 = arith.cmpi slt, %227, %228 : vector<8x512xi32>
    %c255_i32_149 = arith.constant 255 : i32
    %230 = vector.broadcast %c255_i32_149 : i32 to vector<8x512xi32>
    %231 = arith.andi %107, %230 : vector<8x512xi32>
    %c240_i32_150 = arith.constant 240 : i32
    %232 = vector.broadcast %c240_i32_150 : i32 to vector<8x512xi32>
    %233 = arith.cmpi slt, %231, %232 : vector<8x512xi32>
    %234 = arith.andi %229, %233 : vector<8x512xi1>
    %cst_151 = arith.constant 0.000000e+00 : f32
    %235 = vector.broadcast %cst_151 : f32 to vector<8x512xf32>
    %236 = arith.select %234, %225, %235 : vector<8x512xi1>, vector<8x512xf32>
    %c104 = arith.constant 104 : index
    %c0_152 = arith.constant 0 : index
    %237 = vector.load %arg6[%c104, %c0_152] : memref<200x512xf32, #tpu.memory_space<vmem>>, vector<8x512xf32>
    tpu.vector_store %arg6[%c104, %c0_152], %236 {strides = array<i32>} : memref<200x512xf32, #tpu.memory_space<vmem>>, vector<8x512xf32>,
    %c0_153 = arith.constant 0 : index
    %c147 = arith.constant 147 : index
    %238 = vector.load %arg5[%c0_153, %c147] : memref<16x768xf32, #tpu.memory_space<vmem>>, vector<8x512xf32>
    %c15_i32_154 = arith.constant 15 : i32
    %239 = vector.broadcast %c15_i32_154 : i32 to vector<8x512xi32>
    %240 = arith.andi %107, %239 : vector<8x512xi32>
    %c13_i32_155 = arith.constant 13 : i32
    %241 = vector.broadcast %c13_i32_155 : i32 to vector<8x512xi32>
    %242 = arith.cmpi slt, %240, %241 : vector<8x512xi32>
    %c255_i32_156 = arith.constant 255 : i32
    %243 = vector.broadcast %c255_i32_156 : i32 to vector<8x512xi32>
    %244 = arith.andi %107, %243 : vector<8x512xi32>
    %c240_i32_157 = arith.constant 240 : i32
    %245 = vector.broadcast %c240_i32_157 : i32 to vector<8x512xi32>
    %246 = arith.cmpi slt, %244, %245 : vector<8x512xi32>
    %247 = arith.andi %242, %246 : vector<8x512xi1>
    %cst_158 = arith.constant 0.000000e+00 : f32
    %248 = vector.broadcast %cst_158 : f32 to vector<8x512xf32>
    %249 = arith.select %247, %238, %248 : vector<8x512xi1>, vector<8x512xf32>
    %c112_159 = arith.constant 112 : index
    %c0_160 = arith.constant 0 : index
    %250 = vector.load %arg6[%c112_159, %c0_160] : memref<200x512xf32, #tpu.memory_space<vmem>>, vector<8x512xf32>
    tpu.vector_store %arg6[%c112_159, %c0_160], %249 {strides = array<i32>} : memref<200x512xf32, #tpu.memory_space<vmem>>, vector<8x512xf32>,
    %c0_161 = arith.constant 0 : index
    %c80_162 = arith.constant 80 : index
    %251 = vector.load %arg5[%c0_161, %c80_162] : memref<16x768xf32, #tpu.memory_space<vmem>>, vector<8x512xf32>
    %c255_i32_163 = arith.constant 255 : i32
    %252 = vector.broadcast %c255_i32_163 : i32 to vector<8x512xi32>
    %253 = arith.andi %107, %252 : vector<8x512xi32>
    %c48_i32 = arith.constant 48 : i32
    %254 = vector.broadcast %c48_i32 : i32 to vector<8x512xi32>
    %255 = arith.cmpi sge, %253, %254 : vector<8x512xi32>
    %cst_164 = arith.constant 0.000000e+00 : f32
    %256 = vector.broadcast %cst_164 : f32 to vector<8x512xf32>
    %257 = arith.select %255, %251, %256 : vector<8x512xi1>, vector<8x512xf32>
    %c120 = arith.constant 120 : index
    %c0_165 = arith.constant 0 : index
    %258 = vector.load %arg6[%c120, %c0_165] : memref<200x512xf32, #tpu.memory_space<vmem>>, vector<8x512xf32>
    tpu.vector_store %arg6[%c120, %c0_165], %257 {strides = array<i32>} : memref<200x512xf32, #tpu.memory_space<vmem>>, vector<8x512xf32>,
    %c0_166 = arith.constant 0 : index
    %c96_167 = arith.constant 96 : index
    %259 = vector.load %arg5[%c0_166, %c96_167] : memref<16x768xf32, #tpu.memory_space<vmem>>, vector<8x512xf32>
    %c255_i32_168 = arith.constant 255 : i32
    %260 = vector.broadcast %c255_i32_168 : i32 to vector<8x512xi32>
    %261 = arith.andi %107, %260 : vector<8x512xi32>
    %c32_i32 = arith.constant 32 : i32
    %262 = vector.broadcast %c32_i32 : i32 to vector<8x512xi32>
    %263 = arith.cmpi sge, %261, %262 : vector<8x512xi32>
    %cst_169 = arith.constant 0.000000e+00 : f32
    %264 = vector.broadcast %cst_169 : f32 to vector<8x512xf32>
    %265 = arith.select %263, %259, %264 : vector<8x512xi1>, vector<8x512xf32>
    %c128_170 = arith.constant 128 : index
    %c0_171 = arith.constant 0 : index
    %266 = vector.load %arg6[%c128_170, %c0_171] : memref<200x512xf32, #tpu.memory_space<vmem>>, vector<8x512xf32>
    tpu.vector_store %arg6[%c128_170, %c0_171], %265 {strides = array<i32>} : memref<200x512xf32, #tpu.memory_space<vmem>>, vector<8x512xf32>,
    %c0_172 = arith.constant 0 : index
    %c81 = arith.constant 81 : index
    %267 = vector.load %arg5[%c0_172, %c81] : memref<16x768xf32, #tpu.memory_space<vmem>>, vector<8x512xf32>
    %c15_i32_173 = arith.constant 15 : i32
    %268 = vector.broadcast %c15_i32_173 : i32 to vector<8x512xi32>
    %269 = arith.andi %107, %268 : vector<8x512xi32>
    %c15_i32_174 = arith.constant 15 : i32
    %270 = vector.broadcast %c15_i32_174 : i32 to vector<8x512xi32>
    %271 = arith.cmpi slt, %269, %270 : vector<8x512xi32>
    %c255_i32_175 = arith.constant 255 : i32
    %272 = vector.broadcast %c255_i32_175 : i32 to vector<8x512xi32>
    %273 = arith.andi %107, %272 : vector<8x512xi32>
    %c48_i32_176 = arith.constant 48 : i32
    %274 = vector.broadcast %c48_i32_176 : i32 to vector<8x512xi32>
    %275 = arith.cmpi sge, %273, %274 : vector<8x512xi32>
    %276 = arith.andi %271, %275 : vector<8x512xi1>
    %cst_177 = arith.constant 0.000000e+00 : f32
    %277 = vector.broadcast %cst_177 : f32 to vector<8x512xf32>
    %278 = arith.select %276, %267, %277 : vector<8x512xi1>, vector<8x512xf32>
    %c136 = arith.constant 136 : index
    %c0_178 = arith.constant 0 : index
    %279 = vector.load %arg6[%c136, %c0_178] : memref<200x512xf32, #tpu.memory_space<vmem>>, vector<8x512xf32>
    tpu.vector_store %arg6[%c136, %c0_178], %278 {strides = array<i32>} : memref<200x512xf32, #tpu.memory_space<vmem>>, vector<8x512xf32>,
    %c0_179 = arith.constant 0 : index
    %c97 = arith.constant 97 : index
    %280 = vector.load %arg5[%c0_179, %c97] : memref<16x768xf32, #tpu.memory_space<vmem>>, vector<8x512xf32>
    %c15_i32_180 = arith.constant 15 : i32
    %281 = vector.broadcast %c15_i32_180 : i32 to vector<8x512xi32>
    %282 = arith.andi %107, %281 : vector<8x512xi32>
    %c15_i32_181 = arith.constant 15 : i32
    %283 = vector.broadcast %c15_i32_181 : i32 to vector<8x512xi32>
    %284 = arith.cmpi slt, %282, %283 : vector<8x512xi32>
    %c255_i32_182 = arith.constant 255 : i32
    %285 = vector.broadcast %c255_i32_182 : i32 to vector<8x512xi32>
    %286 = arith.andi %107, %285 : vector<8x512xi32>
    %c32_i32_183 = arith.constant 32 : i32
    %287 = vector.broadcast %c32_i32_183 : i32 to vector<8x512xi32>
    %288 = arith.cmpi sge, %286, %287 : vector<8x512xi32>
    %289 = arith.andi %284, %288 : vector<8x512xi1>
    %cst_184 = arith.constant 0.000000e+00 : f32
    %290 = vector.broadcast %cst_184 : f32 to vector<8x512xf32>
    %291 = arith.select %289, %280, %290 : vector<8x512xi1>, vector<8x512xf32>
    %c144_185 = arith.constant 144 : index
    %c0_186 = arith.constant 0 : index
    %292 = vector.load %arg6[%c144_185, %c0_186] : memref<200x512xf32, #tpu.memory_space<vmem>>, vector<8x512xf32>
    tpu.vector_store %arg6[%c144_185, %c0_186], %291 {strides = array<i32>} : memref<200x512xf32, #tpu.memory_space<vmem>>, vector<8x512xf32>,
    %c0_187 = arith.constant 0 : index
    %c113_188 = arith.constant 113 : index
    %293 = vector.load %arg5[%c0_187, %c113_188] : memref<16x768xf32, #tpu.memory_space<vmem>>, vector<8x512xf32>
    %c15_i32_189 = arith.constant 15 : i32
    %294 = vector.broadcast %c15_i32_189 : i32 to vector<8x512xi32>
    %295 = arith.andi %107, %294 : vector<8x512xi32>
    %c15_i32_190 = arith.constant 15 : i32
    %296 = vector.broadcast %c15_i32_190 : i32 to vector<8x512xi32>
    %297 = arith.cmpi slt, %295, %296 : vector<8x512xi32>
    %c255_i32_191 = arith.constant 255 : i32
    %298 = vector.broadcast %c255_i32_191 : i32 to vector<8x512xi32>
    %299 = arith.andi %107, %298 : vector<8x512xi32>
    %c16_i32_192 = arith.constant 16 : i32
    %300 = vector.broadcast %c16_i32_192 : i32 to vector<8x512xi32>
    %301 = arith.cmpi sge, %299, %300 : vector<8x512xi32>
    %302 = arith.andi %297, %301 : vector<8x512xi1>
    %cst_193 = arith.constant 0.000000e+00 : f32
    %303 = vector.broadcast %cst_193 : f32 to vector<8x512xf32>
    %304 = arith.select %302, %293, %303 : vector<8x512xi1>, vector<8x512xf32>
    %c152 = arith.constant 152 : index
    %c0_194 = arith.constant 0 : index
    %305 = vector.load %arg6[%c152, %c0_194] : memref<200x512xf32, #tpu.memory_space<vmem>>, vector<8x512xf32>
    tpu.vector_store %arg6[%c152, %c0_194], %304 {strides = array<i32>} : memref<200x512xf32, #tpu.memory_space<vmem>>, vector<8x512xf32>,
    %c0_195 = arith.constant 0 : index
    %c143_196 = arith.constant 143 : index
    %306 = vector.load %arg5[%c0_195, %c143_196] : memref<16x768xf32, #tpu.memory_space<vmem>>, vector<8x512xf32>
    %c15_i32_197 = arith.constant 15 : i32
    %307 = vector.broadcast %c15_i32_197 : i32 to vector<8x512xi32>
    %308 = arith.andi %107, %307 : vector<8x512xi32>
    %c1_i32_198 = arith.constant 1 : i32
    %309 = vector.broadcast %c1_i32_198 : i32 to vector<8x512xi32>
    %310 = arith.cmpi sge, %308, %309 : vector<8x512xi32>
    %c255_i32_199 = arith.constant 255 : i32
    %311 = vector.broadcast %c255_i32_199 : i32 to vector<8x512xi32>
    %312 = arith.andi %107, %311 : vector<8x512xi32>
    %c240_i32_200 = arith.constant 240 : i32
    %313 = vector.broadcast %c240_i32_200 : i32 to vector<8x512xi32>
    %314 = arith.cmpi slt, %312, %313 : vector<8x512xi32>
    %315 = arith.andi %310, %314 : vector<8x512xi1>
    %cst_201 = arith.constant 0.000000e+00 : f32
    %316 = vector.broadcast %cst_201 : f32 to vector<8x512xf32>
    %317 = arith.select %315, %306, %316 : vector<8x512xi1>, vector<8x512xf32>
    %c160 = arith.constant 160 : index
    %c0_202 = arith.constant 0 : index
    %318 = vector.load %arg6[%c160, %c0_202] : memref<200x512xf32, #tpu.memory_space<vmem>>, vector<8x512xf32>
    tpu.vector_store %arg6[%c160, %c0_202], %317 {strides = array<i32>} : memref<200x512xf32, #tpu.memory_space<vmem>>, vector<8x512xf32>,
    %c0_203 = arith.constant 0 : index
    %c159 = arith.constant 159 : index
    %319 = vector.load %arg5[%c0_203, %c159] : memref<16x768xf32, #tpu.memory_space<vmem>>, vector<8x512xf32>
    %c15_i32_204 = arith.constant 15 : i32
    %320 = vector.broadcast %c15_i32_204 : i32 to vector<8x512xi32>
    %321 = arith.andi %107, %320 : vector<8x512xi32>
    %c1_i32_205 = arith.constant 1 : i32
    %322 = vector.broadcast %c1_i32_205 : i32 to vector<8x512xi32>
    %323 = arith.cmpi sge, %321, %322 : vector<8x512xi32>
    %c255_i32_206 = arith.constant 255 : i32
    %324 = vector.broadcast %c255_i32_206 : i32 to vector<8x512xi32>
    %325 = arith.andi %107, %324 : vector<8x512xi32>
    %c224_i32 = arith.constant 224 : i32
    %326 = vector.broadcast %c224_i32 : i32 to vector<8x512xi32>
    %327 = arith.cmpi slt, %325, %326 : vector<8x512xi32>
    %328 = arith.andi %323, %327 : vector<8x512xi1>
    %cst_207 = arith.constant 0.000000e+00 : f32
    %329 = vector.broadcast %cst_207 : f32 to vector<8x512xf32>
    %330 = arith.select %328, %319, %329 : vector<8x512xi1>, vector<8x512xf32>
    %c168 = arith.constant 168 : index
    %c0_208 = arith.constant 0 : index
    %331 = vector.load %arg6[%c168, %c0_208] : memref<200x512xf32, #tpu.memory_space<vmem>>, vector<8x512xf32>
    tpu.vector_store %arg6[%c168, %c0_208], %330 {strides = array<i32>} : memref<200x512xf32, #tpu.memory_space<vmem>>, vector<8x512xf32>,
    %c0_209 = arith.constant 0 : index
    %c160_210 = arith.constant 160 : index
    %332 = vector.load %arg5[%c0_209, %c160_210] : memref<16x768xf32, #tpu.memory_space<vmem>>, vector<8x512xf32>
    %c255_i32_211 = arith.constant 255 : i32
    %333 = vector.broadcast %c255_i32_211 : i32 to vector<8x512xi32>
    %334 = arith.andi %107, %333 : vector<8x512xi32>
    %c224_i32_212 = arith.constant 224 : i32
    %335 = vector.broadcast %c224_i32_212 : i32 to vector<8x512xi32>
    %336 = arith.cmpi slt, %334, %335 : vector<8x512xi32>
    %cst_213 = arith.constant 0.000000e+00 : f32
    %337 = vector.broadcast %cst_213 : f32 to vector<8x512xf32>
    %338 = arith.select %336, %332, %337 : vector<8x512xi1>, vector<8x512xf32>
    %c176 = arith.constant 176 : index
    %c0_214 = arith.constant 0 : index
    %339 = vector.load %arg6[%c176, %c0_214] : memref<200x512xf32, #tpu.memory_space<vmem>>, vector<8x512xf32>
    tpu.vector_store %arg6[%c176, %c0_214], %338 {strides = array<i32>} : memref<200x512xf32, #tpu.memory_space<vmem>>, vector<8x512xf32>,
    %c0_215 = arith.constant 0 : index
    %c175 = arith.constant 175 : index
    %340 = vector.load %arg5[%c0_215, %c175] : memref<16x768xf32, #tpu.memory_space<vmem>>, vector<8x512xf32>
    %c15_i32_216 = arith.constant 15 : i32
    %341 = vector.broadcast %c15_i32_216 : i32 to vector<8x512xi32>
    %342 = arith.andi %107, %341 : vector<8x512xi32>
    %c1_i32_217 = arith.constant 1 : i32
    %343 = vector.broadcast %c1_i32_217 : i32 to vector<8x512xi32>
    %344 = arith.cmpi sge, %342, %343 : vector<8x512xi32>
    %c255_i32_218 = arith.constant 255 : i32
    %345 = vector.broadcast %c255_i32_218 : i32 to vector<8x512xi32>
    %346 = arith.andi %107, %345 : vector<8x512xi32>
    %c208_i32 = arith.constant 208 : i32
    %347 = vector.broadcast %c208_i32 : i32 to vector<8x512xi32>
    %348 = arith.cmpi slt, %346, %347 : vector<8x512xi32>
    %349 = arith.andi %344, %348 : vector<8x512xi1>
    %cst_219 = arith.constant 0.000000e+00 : f32
    %350 = vector.broadcast %cst_219 : f32 to vector<8x512xf32>
    %351 = arith.select %349, %340, %350 : vector<8x512xi1>, vector<8x512xf32>
    %c184 = arith.constant 184 : index
    %c0_220 = arith.constant 0 : index
    %352 = vector.load %arg6[%c184, %c0_220] : memref<200x512xf32, #tpu.memory_space<vmem>>, vector<8x512xf32>
    tpu.vector_store %arg6[%c184, %c0_220], %351 {strides = array<i32>} : memref<200x512xf32, #tpu.memory_space<vmem>>, vector<8x512xf32>,
    %c0_221 = arith.constant 0 : index
    %c176_222 = arith.constant 176 : index
    %353 = vector.load %arg5[%c0_221, %c176_222] : memref<16x768xf32, #tpu.memory_space<vmem>>, vector<8x512xf32>
    %c255_i32_223 = arith.constant 255 : i32
    %354 = vector.broadcast %c255_i32_223 : i32 to vector<8x512xi32>
    %355 = arith.andi %107, %354 : vector<8x512xi32>
    %c208_i32_224 = arith.constant 208 : i32
    %356 = vector.broadcast %c208_i32_224 : i32 to vector<8x512xi32>
    %357 = arith.cmpi slt, %355, %356 : vector<8x512xi32>
    %cst_225 = arith.constant 0.000000e+00 : f32
    %358 = vector.broadcast %cst_225 : f32 to vector<8x512xf32>
    %359 = arith.select %357, %353, %358 : vector<8x512xi1>, vector<8x512xf32>
    %c192 = arith.constant 192 : index
    %c0_226 = arith.constant 0 : index
    %360 = vector.load %arg6[%c192, %c0_226] : memref<200x512xf32, #tpu.memory_space<vmem>>, vector<8x512xf32>
    tpu.vector_store %arg6[%c192, %c0_226], %359 {strides = array<i32>} : memref<200x512xf32, #tpu.memory_space<vmem>>, vector<8x512xf32>,
    %c8_227 = arith.constant 8 : index
    %c0_228 = arith.constant 0 : index
    %361 = vector.load %arg2[%c8_227, %c0_228] : memref<88x200xf32, #tpu.memory_space<vmem>>, vector<64x200xf32>
    %c0_229 = arith.constant 0 : index
    %c0_230 = arith.constant 0 : index
    %362 = vector.load %arg6[%c0_229, %c0_230] : memref<200x512xf32, #tpu.memory_space<vmem>>, vector<200x512xf32>
    %cst_231 = arith.constant dense<0.000000e+00> : vector<64x512xf32>
    %363 = tpu.matmul %361, %362, %cst_231 {dimension_numbers = #tpu.dot_dimension_numbers<[1], [0], [0], [1], [0, 0, 1, 1], [], []>} : vector<64x200xf32>, vector<200x512xf32>, vector<64x512xf32> -> vector<64x512xf32>
    %c8_232 = arith.constant 8 : index
    %c0_233 = arith.constant 0 : index
    %364 = vector.load %arg3[%c8_232, %c0_233] : memref<88x1xf32, #tpu.memory_space<vmem>>, vector<64x1xf32>
    %365 = vector.broadcast %364 : vector<64x1xf32> to vector<64x512xf32>
    %366 = arith.addf %363, %365 : vector<64x512xf32>
    %cst_234 = arith.constant 0.000000e+00 : f32
    %367 = vector.broadcast %cst_234 : f32 to vector<64x512xf32>
    %368 = arith.subf %367, %366 : vector<64x512xf32>
    %369 = math.exp %368 : vector<64x512xf32>
    %cst_235 = arith.constant 1.000000e+00 : f32
    %370 = vector.broadcast %cst_235 : f32 to vector<64x512xf32>
    %371 = arith.addf %370, %369 : vector<64x512xf32>
    %372 = arith.divf %366, %371 : vector<64x512xf32>
    %c72_236 = arith.constant 72 : index
    %c0_237 = arith.constant 0 : index
    %373 = vector.load %arg2[%c72_236, %c0_237] : memref<88x200xf32, #tpu.memory_space<vmem>>, vector<16x64xf32>
    %cst_238 = arith.constant dense<0.000000e+00> : vector<16x512xf32>
    %374 = tpu.matmul %373, %372, %cst_238 {dimension_numbers = #tpu.dot_dimension_numbers<[1], [0], [0], [1], [0, 0, 1, 1], [], []>} : vector<16x64xf32>, vector<64x512xf32>, vector<16x512xf32> -> vector<16x512xf32>
    %c72_239 = arith.constant 72 : index
    %c0_240 = arith.constant 0 : index
    %375 = vector.load %arg3[%c72_239, %c0_240] : memref<88x1xf32, #tpu.memory_space<vmem>>, vector<16x1xf32>
    %376 = vector.broadcast %375 : vector<16x1xf32> to vector<16x512xf32>
    %377 = arith.addf %374, %376 : vector<16x512xf32>
    %cst_241 = arith.constant 0.000000e+00 : f32
    %378 = vector.broadcast %cst_241 : f32 to vector<16x512xf32>
    %379 = arith.subf %378, %377 : vector<16x512xf32>
    %380 = math.exp %379 : vector<16x512xf32>
    %cst_242 = arith.constant 1.000000e+00 : f32
    %381 = vector.broadcast %cst_242 : f32 to vector<16x512xf32>
    %382 = arith.addf %381, %380 : vector<16x512xf32>
    %383 = arith.divf %377, %382 : vector<16x512xf32>
    %c0_243 = arith.constant 0 : index
    %c0_244 = arith.constant 0 : index
    %384 = vector.load %arg1[%c0_243, %c0_244] : memref<16x512xf32, #tpu.memory_space<vmem>>, vector<16x512xf32>
    %385 = arith.addf %383, %384 : vector<16x512xf32>
    %c0_245 = arith.constant 0 : index
    %c0_246 = arith.constant 0 : index
    %386 = vector.load %arg4[%c0_245, %c0_246] : memref<16x512xf32, #tpu.memory_space<vmem>>, vector<16x512xf32>
    tpu.vector_store %arg4[%c0_245, %c0_246], %385 {strides = array<i32>} : memref<16x512xf32, #tpu.memory_space<vmem>>, vector<16x512xf32>,
    return
  }
  func.func @transform_0(%arg0: i32) -> (i32, i32) {
    %c0_i32 = arith.constant 0 : i32
    %c0_i32_0 = arith.constant 0 : i32
    return %c0_i32, %arg0 : i32, i32
  }
  func.func @transform_1(%arg0: i32) -> (i32, i32) {
    %c0_i32 = arith.constant 0 : i32
    %c0_i32_0 = arith.constant 0 : i32
    %c0_i32_1 = arith.constant 0 : i32
    return %c0_i32, %c0_i32_0 : i32, i32
  }
  func.func @transform_2(%arg0: i32) -> (i32, i32) {
    %c0_i32 = arith.constant 0 : i32
    %c0_i32_0 = arith.constant 0 : i32
    %c0_i32_1 = arith.constant 0 : i32
    return %c0_i32, %c0_i32_0 : i32, i32
  }
  func.func @transform_3(%arg0: i32) -> (i32, i32) {
    %c0_i32 = arith.constant 0 : i32
    %c0_i32_0 = arith.constant 0 : i32
    return %c0_i32, %arg0 : i32, i32
  }
}

</mosaic_0001>

<bundles_post_ra>
// kernel: bottleneck_p_forward.1
= control target key start
LH: loop header
LB: loop body
LE: loop exit
PB: predicated region body
PF: predicated region fallthrough
CT: control target
= control target key end

     0   :  { %s3148_s16 = smov 112   ;;  %v4889_v3 = vmov 0.0   ;;  %s3150_s29 = smov 113   ;;  %v44_v9 = vlaneseq  ;;  %vm4876_vm0 = vcmask 916480   ;;  %vm4884_vm3 = vcmask 130048   ;;  %s4870_s0 = inlined_call_operand.vmem [shape: f32[16,512], index: 0, kind: input, shape index: {}, may-alias: {0,3}]   ;;  %s4871_s1 = inlined_call_operand.vmem [shape: f32[88,200], index: 1, kind: input, shape index: {}]   ;;  %s4872_s2 = inlined_call_operand.vmem [shape: f32[88,1], index: 2, kind: input, shape index: {}]   ;;  %s4873_s3 = inlined_call_operand.vmem [shape: f32[16,512], index: 3, kind: output, shape index: {}, may-alias: {0,3}]  }
   0x1   :  { %v3197_v0 = vld [vmem:[%s4870_s0 + $0x38] sm:$0xff]  ;;  %v3202_v1 = vld [vmem:[%s4870_s0 + $0x28] sm:$0xff]  ;;  %v3211_v2 = vld [vmem:[%s4870_s0 + $0x30] sm:$0xff]  ;;  %s3151_s30 = smov 127   ;;  %s3152_s4 = smov 1   ;;  %vm4874_vm5 = vcmask 924672  }
   0x2   :  { %565 = vrot.lane.b32.xlu1 %v3197_v0, %s3148_s16  ;;  %561 = vrot.lane.b32.xlu0 %v3202_v1, %s3148_s16  ;;  %v3220_v4 = vld [vmem:[%s4870_s0 + $0x20] sm:$0xff]  ;;  %v3225_v5 = vld [vmem:[%s4870_s0 + $0x8] sm:$0xff]  ;;  %s3153_s5 = smov 15   ;;  %s3154_s6 = smov 16   ;;  %v3342_v10 = vand.u32 127, %v44_v9  ;;  %v3157_v39 = vmov 0  }
   0x3   :  { %v3234_v6 = vld [vmem:[%s4870_s0 + $0x10] sm:$0xff]  ;;  %v3239_v7 = vld [vmem:[%s4870_s0 + $0x18] sm:$0xff]  ;;  %v3248_v8 = vld [vmem:[%s4870_s0] sm:$0xff]  ;;  %s3155_s7 = smov 17   ;;  %s3156_s8 = smov 111   ;;  %2970 = vset.pattern.permute.xlu0 %v3157_v39  ;;  %v4930_v40 = vmov 0  ;;  %2971 = vset.pattern.permute.xlu1 %v3157_v39 }
   0x4   :  { %v46_v11 = vadd.s32 128, %v3342_v10  ;;  %v48_v12 = vadd.s32 384, %v3342_v10  ;;  %v680_v33 = vld [vmem:[%s4871_s1 + $0x8] sm:$0xff]  ;;  %v3403_v38 = vadd.s32 256, %v3342_v10  ;;  %v3418_v41 = vand.u32 15, %v3342_v10  ;;  %v753_v55 = vld [vmem:[%s4872_s2] sm:$0xff] }
   0x5   :  { %2742 = vmatprep.mubr.msk.f32.mxu0 %vm4884_vm3, %v680_v33  ;;  %2743 = vmatprep.mubr.msk.f32.mxu1 %vm4884_vm3, %v680_v33  ;;  %v4933_v50 = vmov 0  ;;  %vm4875_vm11 = vcmask 1039360   ;;  %s3158_s13 = smov 48   ;;  %s3159_s14 = smov 109  }
   0x6   :  { %2931 = vrot.lane.b32.xlu1 %v4889_v3, %s3148_s16  ;;  %563 = vrot.lane.b32.xlu0 %v3211_v2, %s3148_s16  ;;  %v3354_v13 = vand.u32 255, %v46_v11  ;;  %v3356_v16 = vand.u32 255, %v48_v12  ;;  %v3380_v27 = vand.u32 15, %v46_v11  ;;  %v3400_v37 = vand.u32 15, %v48_v12  ;;  %s3160_s15 = smov 125   ;;  %s3161_s19 = smov 110  }
   0x7   :  { %v3425_v45 = vand.u32 15, %v3403_v38  ;;  %vm4888_vm8 = vcmp.ge.s32.totalorder %v3418_v41, 1  ;;  %vm4881_vm15 = vcmp.lt.s32.totalorder %v3418_v41, 15  ;;  %s3162_s20 = smov 3   ;;  %s3163_s21 = smov 126  }
   0x8   :  { %vm4923_vm1 = vcmp.lt.s32.totalorder %v3354_v13, 240  ;;  %vm4878_vm2 = vcmp.lt.s32.totalorder %v3356_v16, 240  ;;  %vm4909_vm4 = vcmp.ge.s32.totalorder %v3380_v27, 1  ;;  %vm4887_vm7 = vcmp.ge.s32.totalorder %v3400_v37, 1  ;;  %s3164_s22 = smov 2   ;;  %s3165_s23 = smov 19  }
   0x9   :  { %vm3413_vm6 = vmand %vm4909_vm4, %vm4923_vm1  ;;  %vm4886_vm10 = vcmp.ge.s32.totalorder %v3425_v45, 1  ;;  %vm4913_vm12 = vcmp.lt.s32.totalorder %v3380_v27, 15  ;;  %vm4912_vm13 = vcmp.lt.s32.totalorder %v3400_v37, 15  ;;  %vm4879_vm14 = vcmp.lt.s32.totalorder %v3425_v45, 15  ;;  %s3166_s24 = smov 80   ;;  %s3167_s25 = smov 18  }
   0xa   :  { %559 = vrot.lane.b32.xlu0 %v3220_v4, %s3148_s16  ;;  %551 = vrot.lane.b32.xlu1 %v3225_v5, %s3148_s16  ;;  %v4931_v40 = vsel %vm3413_vm6, 4294967295, %v4930_v40  ;;  %vm3437_vm9 = vmand %vm4887_vm7, %vm4878_vm2  ;;  %s3168_s26 = smov 96   ;;  %s3169_s27 = smov 81  }
   0xb   :  { %4932 = vst [vmem:[#allocation4_spill] sm:$0xff] %v4931_v40  ;;  %v4934_v50 = vsel %vm3437_vm9, 4294967295, %v4933_v50  ;;  %s3170_s28 = smov 97   ;;  %s3171_s9 = smov 31  }
   0xc   :  { %4935 = vst [vmem:[#allocation5_spill] sm:$0xff] %v4934_v50  ;;  %s3172_s10 = smov 47   ;;  %s3173_s11 = smov 32  }
   0xe   :  { %553 = vrot.lane.b32.xlu0 %v3234_v6, %s3148_s16  ;;  %555 = vrot.lane.b32.xlu1 %v3239_v7, %s3148_s16 }
  0x12   :  { %488 = vrot.lane.b32.xlu1 %v3202_v1, %s3150_s29  ;;  %549 = vrot.lane.b32.xlu0 %v3248_v8, %s3148_s16 }
  0x16   :  { %492 = vrot.lane.b32.xlu1 %v3197_v0, %s3150_s29  ;;  %490 = vrot.lane.b32.xlu0 %v3211_v2, %s3150_s29 }
  0x1a   :  { %486 = vrot.lane.b32.xlu1 %v3220_v4, %s3150_s29  ;;  %2936 = vrot.lane.b32.xlu0 %v4889_v3, %s3150_s29 }
  0x1e   :  { %480 = vrot.lane.b32.xlu1 %v3234_v6, %s3150_s29  ;;  %478 = vrot.lane.b32.xlu0 %v3225_v5, %s3150_s29 }
  0x22   :  { %476 = vrot.lane.b32.xlu1 %v3248_v8, %s3150_s29  ;;  %482 = vrot.lane.b32.xlu0 %v3239_v7, %s3150_s29 }
  0x26   :  { %409 = vrot.lane.b32.xlu1 %v3211_v2, %s3151_s30  ;;  %407 = vrot.lane.b32.xlu0 %v3202_v1, %s3151_s30 }
  0x2a   :  { %2941 = vrot.lane.b32.xlu1 %v4889_v3, %s3151_s30  ;;  %411 = vrot.lane.b32.xlu0 %v3197_v0, %s3151_s30 }
  0x2e   :  { %397 = vrot.lane.b32.xlu1 %v3225_v5, %s3151_s30  ;;  %405 = vrot.lane.b32.xlu0 %v3220_v4, %s3151_s30 }
  0x32   :  { %401 = vrot.lane.b32.xlu1 %v3239_v7, %s3151_s30  ;;  %399 = vrot.lane.b32.xlu0 %v3234_v6, %s3151_s30 }
  0x36   :  { %318 = vrot.lane.b32.xlu1 %v3220_v4, %s3152_s4  ;;  %395 = vrot.lane.b32.xlu0 %v3248_v8, %s3151_s30 }
  0x3a   :  { %322 = vrot.lane.b32.xlu1 %v3211_v2, %s3152_s4  ;;  %320 = vrot.lane.b32.xlu0 %v3202_v1, %s3152_s4 }
  0x3e   :  { %2946 = vrot.lane.b32.xlu1 %v4889_v3, %s3152_s4  ;;  %324 = vrot.lane.b32.xlu0 %v3197_v0, %s3152_s4 }
  0x42   :  { %310 = vrot.lane.b32.xlu1 %v3225_v5, %s3152_s4  ;;  %308 = vrot.lane.b32.xlu0 %v3248_v8, %s3152_s4 }
  0x46   :  { %314 = vrot.lane.b32.xlu1 %v3239_v7, %s3152_s4  ;;  %312 = vrot.lane.b32.xlu0 %v3234_v6, %s3152_s4 }
  0x4a   :  { %247 = vrot.lane.b32.xlu1 %v3202_v1, %s3153_s5  ;;  %245 = vrot.lane.b32.xlu0 %v3220_v4, %s3153_s5 }
  0x4e   :  { %251 = vrot.lane.b32.xlu1 %v3197_v0, %s3153_s5  ;;  %249 = vrot.lane.b32.xlu0 %v3211_v2, %s3153_s5 }
  0x52   :  { %235 = vrot.lane.b32.xlu1 %v3248_v8, %s3153_s5  ;;  %2951 = vrot.lane.b32.xlu0 %v4889_v3, %s3153_s5 }
  0x56   :  { %239 = vrot.lane.b32.xlu1 %v3234_v6, %s3153_s5  ;;  %237 = vrot.lane.b32.xlu0 %v3225_v5, %s3153_s5 }
  0x5a   :  { %164 = vrot.lane.b32.xlu1 %v3220_v4, %s3154_s6  ;;  %241 = vrot.lane.b32.xlu0 %v3239_v7, %s3153_s5 }
  0x5e   :  { %168 = vrot.lane.b32.xlu1 %v3211_v2, %s3154_s6  ;;  %166 = vrot.lane.b32.xlu0 %v3202_v1, %s3154_s6 }
  0x62   :  { %2956 = vrot.lane.b32.xlu1 %v4889_v3, %s3154_s6  ;;  %170 = vrot.lane.b32.xlu0 %v3197_v0, %s3154_s6 }
  0x66   :  { %156 = vrot.lane.b32.xlu1 %v3225_v5, %s3154_s6  ;;  %154 = vrot.lane.b32.xlu0 %v3248_v8, %s3154_s6 }
  0x6a   :  { %160 = vrot.lane.b32.xlu1 %v3239_v7, %s3154_s6  ;;  %158 = vrot.lane.b32.xlu0 %v3234_v6, %s3154_s6 }
  0x6e   :  { %93 = vrot.lane.b32.xlu1 %v3202_v1, %s3155_s7  ;;  %91 = vrot.lane.b32.xlu0 %v3220_v4, %s3155_s7 }
  0x72   :  { %97 = vrot.lane.b32.xlu1 %v3197_v0, %s3155_s7  ;;  %95 = vrot.lane.b32.xlu0 %v3211_v2, %s3155_s7 }
  0x74   :  { %v566_v14 = vpop.permute.xlu1 %565  ;;  %v562_v15 = vpop.permute.xlu0 %561 }
  0x76   :  { %81 = vrot.lane.b32.xlu1 %v3248_v8, %s3155_s7  ;;  %2961 = vrot.lane.b32.xlu0 %v4889_v3, %s3155_s7 }
  0x78   :  { %v2932_v17 = vpop.permute.xlu1 %2931  ;;  %v564_v18 = vpop.permute.xlu0 %563 }
  0x79   :  { %v2933_v19 = vunpack.i.l.bf16 %v2932_v17  ;;  %v575_v20 = vsel %vm4876_vm0, %v562_v15, %v564_v18  ;;  %v576_v24 = vsel %vm4876_vm0, %v564_v18, %v566_v14  ;;  %v2934_v26 = vunpack.i.h.bf16 %v2932_v17 }
  0x7a   :  { %2764 = vmatprep.subr.msk.mxu0 %vm4923_vm1, %v575_v20  ;;  %85 = vrot.lane.b32.xlu1 %v3234_v6, %s3155_s7 }
  0x7b   :  { %83 = vrot.lane.b32.xlu0 %v3225_v5, %s3155_s7  ;;  %v577_v21 = vsel %vm4876_vm0, %v566_v14, %v2933_v19 }
  0x7c   :  { %2792 = vmatprep.subr.msk.mxu1 %vm4878_vm2, %v577_v21  ;;  %v560_v22 = vpop.permute.xlu0 %559  ;;  %v552_v23 = vpop.permute.xlu1 %551 }
  0x7d   :  { %834 = vmatpush1.msra.mxu1 %v576_v24  ;;  %v574_v25 = vsel %vm4876_vm0, %v560_v22, %v562_v15 }
  0x7e   :  { %763 = vmatpush1.msra.mxu0 %v574_v25  ;;  %638 = vrot.lane.b32.xlu1 %v3202_v1, %s3156_s8 }
  0x7f   :  { %87 = vrot.lane.b32.xlu0 %v3239_v7, %s3155_s7 }
  0x80   :  { %v554_v28 = vpop.permute.xlu0 %553  ;;  %v556_v29 = vpop.permute.xlu1 %555 }
  0x81   :  { %v571_v30 = vsel %vm4876_vm0, %v552_v23, %v554_v28  ;;  %v573_v31 = vsel %vm4876_vm0, %v556_v29, %v2934_v26  ;;  %v572_v32 = vsel %vm4876_vm0, %v554_v28, %v556_v29 }
  0x82   :  { %2765 = vmatprep.subr.msk.mxu0 %vm4923_vm1, %v571_v30  ;;  %2793 = vmatprep.subr.msk.mxu1 %vm4878_vm2, %v573_v31 }
  0x83   :  { %642 = vrot.lane.b32.xlu1 %v3197_v0, %s3156_s8  ;;  %640 = vrot.lane.b32.xlu0 %v3211_v2, %s3156_s8 }
  0x84   :  { %836 = vmatpush1.msra.mxu1 %v572_v32  ;;  %v489_v34 = vpop.permute.xlu1 %488  ;;  %v550_v35 = vpop.permute.xlu0 %549 }
  0x85   :  { %v570_v36 = vsel %vm4876_vm0, %v550_v35, %v552_v23 }
  0x86   :  { %765 = vmatpush1.msra.mxu0 %v570_v36 }
  0x87   :  { %636 = vrot.lane.b32.xlu1 %v3220_v4, %s3156_s8  ;;  %2966 = vrot.lane.b32.xlu0 %v4889_v3, %s3156_s8 }
  0x88   :  { %v493_v42 = vpop.permute.xlu1 %492  ;;  %v491_v43 = vpop.permute.xlu0 %490 }
  0x89   :  { %v502_v44 = vsel %vm4874_vm5, %v489_v34, %v491_v43  ;;  %v503_v54 = vsel %vm4874_vm5, %v491_v43, %v493_v42 }
  0x8a   :  { %2766 = vmatprep.subr.msk.mxu0 %vm3413_vm6, %v502_v44 }
  0x8b   :  { %630 = vrot.lane.b32.xlu1 %v3234_v6, %s3156_s8  ;;  %628 = vrot.lane.b32.xlu0 %v3225_v5, %s3156_s8 }
  0x8c   :  { %v487_v46 = vpop.permute.xlu1 %486  ;;  %v2937_v47 = vpop.permute.xlu0 %2936 }
  0x8d   :  { %v501_v48 = vsel %vm4874_vm5, %v487_v46, %v489_v34  ;;  %v2938_v49 = vunpack.i.l.bf16 %v2937_v47  ;;  %v2939_v57 = vunpack.i.h.bf16 %v2937_v47  ;;  %v3538_v47 = vand.u32 255, %v3403_v38 }
  0x8e   :  { %2767 = vmatpush1.msk.msra.mxu0 %vm4888_vm8, %v501_v48 }
  0x8f   :  { %626 = vrot.lane.b32.xlu1 %v3248_v8, %s3156_s8  ;;  %632 = vrot.lane.b32.xlu0 %v3239_v7, %s3156_s8  ;;  %v504_v51 = vsel %vm4874_vm5, %v493_v42, %v2938_v49  ;;  %vm4882_vm0 = vcmp.ge.s32.totalorder %v3538_v47, 16 }
  0x90   :  { %v481_v52 = vpop.permute.xlu1 %480  ;;  %v479_v53 = vpop.permute.xlu0 %478  ;;  %2794 = vmatprep.subr.msk.mxu1 %vm3437_vm9, %v504_v51 }
  0x91   :  { %2795 = vmatpush1.msk.msra.mxu1 %vm4886_vm10, %v503_v54  ;;  %v498_v56 = vsel %vm4874_vm5, %v479_v53, %v481_v52  ;;  %v4936_v54 = vmov 0 }
  0x92   :  { %2768 = vmatprep.subr.msk.mxu0 %vm3413_vm6, %v498_v56 }
  0x93   :  { %756 = vperm.xlu0 %2970, %v753_v55   ;;  %1424 = vrot.lane.b32.xlu1 %v4889_v3, %s3161_s19 }
  0x94   :  { %v477_v58 = vpop.permute.xlu1 %476  ;;  %v483_v59 = vpop.permute.xlu0 %482 }
  0x95   :  { %v497_v60 = vsel %vm4874_vm5, %v477_v58, %v479_v53  ;;  %v500_v61 = vsel %vm4874_vm5, %v483_v59, %v2939_v57  ;;  %v499_v62 = vsel %vm4874_vm5, %v481_v52, %v483_v59  ;;  %vm4877_vm5 = vcmask 7168  }
  0x96   :  { %2769 = vmatpush1.msk.msra.mxu0 %vm4888_vm8, %v497_v60  ;;  %2796 = vmatprep.subr.msk.mxu1 %vm3437_vm9, %v500_v61  ;;  %v3549_v52 = vand.u32 255, %v3342_v10  ;;  %v4939_v59 = vmov 0 }
  0x97   :  { %2797 = vmatpush1.msk.msra.mxu1 %vm4886_vm10, %v499_v62  ;;  %1498 = vrot.lane.b32.xlu0 %v4889_v3, %s3158_s13 }
  0x98   :  { %v410_v63 = vpop.permute.xlu1 %409  ;;  %v408_v9 = vpop.permute.xlu0 %407  ;;  %vm4883_vm2 = vcmp.ge.s32.totalorder %v3549_v52, 16  ;;  %1348 = vrot.lane.b32.xlu1 %v4889_v3, %s3148_s16 }
  0x99   :  { %v421_v11 = vsel %vm4875_vm11, %v408_v9, %v410_v63 }
  0x9a   :  { %2770 = vmatprep.subr.msk.mxu0 %vm4913_vm12, %v421_v11 }
  0x9b   :  { %1465 = vrot.lane.b32.xlu0 %v4889_v3, %s3159_s14 }
  0x9c   :  { %v2942_v12 = vpop.permute.xlu1 %2941  ;;  %v412_v14 = vpop.permute.xlu0 %411  ;;  %1270 = vrot.lane.b32.xlu1 %v4889_v3, %s3163_s21 }
  0x9d   :  { %v2943_v15 = vunpack.i.l.bf16 %v2942_v12  ;;  %v422_v20 = vsel %vm4875_vm11, %v410_v63, %v412_v14  ;;  %v2944_v22 = vunpack.i.h.bf16 %v2942_v12 }
  0x9f   :  { %v423_v17 = vsel %vm4875_vm11, %v412_v14, %v2943_v15  ;;  %1384 = vrot.lane.b32.xlu0 %v4889_v3, %s3156_s8 }
  0xa0   :  { %v398_v18 = vpop.permute.xlu1 %397  ;;  %v406_v19 = vpop.permute.xlu0 %405  ;;  %2798 = vmatprep.subr.msk.mxu1 %vm4912_vm13, %v423_v17  ;;  %1141 = vrot.lane.b32.xlu1 %v4889_v3, %s3164_s22 }
  0xa1   :  { %v420_v21 = vsel %vm4875_vm11, %v406_v19, %v408_v9  ;;  %2799 = vmatpush1.msk.msra.mxu1 %vm4879_vm14, %v422_v20 }
  0xa2   :  { %2771 = vmatpush1.msk.msra.mxu0 %vm4881_vm15, %v420_v21 }
  0xa3   :  { %1311 = vrot.lane.b32.xlu0 %v4889_v3, %s3160_s15 }
  0xa4   :  { %v402_v23 = vpop.permute.xlu1 %401  ;;  %v400_v24 = vpop.permute.xlu0 %399  ;;  %1068 = vrot.lane.b32.xlu1 %v4889_v3, %s3154_s6 }
  0xa5   :  { %v417_v25 = vsel %vm4875_vm11, %v398_v18, %v400_v24  ;;  %v419_v26 = vsel %vm4875_vm11, %v402_v23, %v2944_v22  ;;  %v418_v28 = vsel %vm4875_vm11, %v400_v24, %v402_v23 }
  0xa6   :  { %2772 = vmatprep.subr.msk.mxu0 %vm4913_vm12, %v417_v25  ;;  %2800 = vmatprep.subr.msk.mxu1 %vm4912_vm13, %v419_v26 }
  0xa7   :  { %2801 = vmatpush1.msk.msra.mxu1 %vm4879_vm14, %v418_v28  ;;  %1230 = vrot.lane.b32.xlu0 %v4889_v3, %s3151_s30 }
  0xa8   :  { %v319_v29 = vpop.permute.xlu1 %318  ;;  %v396_v30 = vpop.permute.xlu0 %395  ;;  %845 = vmatprep.subr.mxu1 %v3197_v0  ;;  %995 = vrot.lane.b32.xlu1 %v4889_v3, %s3167_s25 }
  0xa9   :  { %v416_v31 = vsel %vm4875_vm11, %v396_v30, %v398_v18  ;;  %846 = vmatpush1.msra.mxu1 %v3211_v2  ;;  %vm4880_vm11 = vcmask 121856  }
  0xaa   :  { %2773 = vmatpush1.msk.msra.mxu0 %vm4881_vm15, %v416_v31  ;;  %847 = vmatprep.subr.mxu1 %v3239_v7 }
  0xab   :  { %774 = vmatprep.subr.mxu0 %v3202_v1  ;;  %848 = vmatpush1.msra.mxu1 %v3234_v6 }
  0xac   :  { %v323_v32 = vpop.permute.xlu1 %322  ;;  %775 = vmatpush1.msra.mxu0 %v3220_v4  ;;  %v321_v33 = vpop.permute.xlu0 %320  ;;  %1178 = vrot.lane.b32.xlu0 %v4889_v3, %s3152_s4 }
  0xad   :  { %776 = vmatprep.subr.mxu0 %v3225_v5  ;;  %v332_v0 = vsel %vm4877_vm5, %v319_v29, %v321_v33  ;;  %v333_v4 = vsel %vm4877_vm5, %v321_v33, %v323_v32  ;;  %1828 = vrot.lane.b32.xlu1 %v4889_v3, %s3169_s27 }
  0xae   :  { %777 = vmatpush1.msra.mxu0 %v3248_v8 }
  0xaf   :  { %2774 = vmatprep.subr.msk.mxu0 %vm4909_vm4, %v332_v0 }
  0xb0   :  { %v2947_v2 = vpop.permute.xlu1 %2946  ;;  %v325_v1 = vpop.permute.xlu0 %324  ;;  %1104 = vrot.lane.b32.xlu0 %v4889_v3, %s3162_s20 }
  0xb1   :  { %v2948_v7 = vunpack.i.l.bf16 %v2947_v2  ;;  %v334_v6 = vsel %vm4877_vm5, %v323_v32, %v325_v1  ;;  %v2949_v34 = vunpack.i.h.bf16 %v2947_v2  ;;  %1746 = vrot.lane.b32.xlu1 %v4889_v3, %s3170_s28 }
  0xb2   :  { %2802 = vmatprep.subr.msk.mxu1 %vm4887_vm7, %v334_v6 }
  0xb3   :  { %2803 = vmatpush1.msk.msra.mxu1 %vm4886_vm10, %v333_v4  ;;  %v331_v5 = vsel %vm4877_vm5, %v2948_v7, %v319_v29 }
  0xb4   :  { %v311_v8 = vpop.permute.xlu1 %310  ;;  %2775 = vmatpush1.msk.msra.mxu0 %vm4888_vm8, %v331_v5  ;;  %v309_v35 = vpop.permute.xlu0 %308  ;;  %1032 = vrot.lane.b32.xlu0 %v4889_v3, %s3155_s7 }
  0xb5   :  { %v328_v36 = vsel %vm4877_vm5, %v309_v35, %v311_v8  ;;  %v327_v39 = vsel %vm4877_vm5, %v2949_v34, %v309_v35  ;;  %1621 = vrot.lane.b32.xlu1 %v4889_v3, %s3171_s9 }
  0xb6   :  { %2776 = vmatprep.subr.msk.mxu0 %vm4909_vm4, %v328_v36 }
  0xb7   :  { %2777 = vmatpush1.msk.msra.mxu0 %vm4888_vm8, %v327_v39 }
  0xb8   :  { %v315_v42 = vpop.permute.xlu1 %314  ;;  %v313_v43 = vpop.permute.xlu0 %312  ;;  %950 = vrot.lane.b32.xlu0 %v4889_v3, %s3165_s23 }
  0xb9   :  { %v330_v44 = vsel %vm4877_vm5, %v313_v43, %v315_v42  ;;  %v329_v46 = vsel %vm4877_vm5, %v311_v8, %v313_v43  ;;  %vm3555_vm5 = vmand %vm4879_vm14, %vm4882_vm0  ;;  %v4942_v8 = vmov 0 }
  0xba   :  { %2804 = vmatprep.subr.msk.mxu1 %vm4887_vm7, %v330_v44  ;;  %v4937_v54 = vsel %vm3555_vm5, 4294967295, %v4936_v54  ;;  %vm3570_vm14 = vmand %vm4881_vm15, %vm4883_vm2 }
  0xbb   :  { %2805 = vmatpush1.msk.msra.mxu1 %vm4886_vm10, %v329_v46  ;;  %4938 = vst [vmem:[#allocation6_spill] sm:$0xff] %v4937_v54  ;;  %v4940_v59 = vsel %vm3570_vm14, 4294967295, %v4939_v59  ;;  %vm3612_vm15 = vmand %vm4886_vm10, %vm4882_vm0 }
  0xbc   :  { %v248_v48 = vpop.permute.xlu1 %247  ;;  %v246_v49 = vpop.permute.xlu0 %245  ;;  %4941 = vst [vmem:[#allocation7_spill] sm:$0xff] %v4940_v59  ;;  %v4943_v8 = vsel %vm3612_vm15, 4294967295, %v4942_v8  ;;  %1865 = vrot.lane.b32.xlu0 %v4889_v3, %s3166_s24 }
  0xbd   :  { %v259_v51 = vsel %vm4880_vm11, %v246_v49, %v248_v48  ;;  %4944 = vst [vmem:[#allocation8_spill] sm:$0xff] %v4943_v8 }
  0xbe   :  { %2778 = vmatprep.subr.msk.mxu0 %vm4913_vm12, %v259_v51 }
  0xc0   :  { %v252_v38 = vpop.permute.xlu1 %251  ;;  %v250_v53 = vpop.permute.xlu0 %249  ;;  %1783 = vrot.lane.b32.xlu0 %v4889_v3, %s3168_s26 }
  0xc1   :  { %v261_v55 = vsel %vm4880_vm11, %v250_v53, %v252_v38  ;;  %v260_v56 = vsel %vm4880_vm11, %v248_v48, %v250_v53 }
  0xc2   :  { %2806 = vmatprep.subr.msk.mxu1 %vm4912_vm13, %v261_v55 }
  0xc3   :  { %2807 = vmatpush1.msk.msra.mxu1 %vm3555_vm5, %v260_v56 }
  0xc4   :  { %v236_v10 = vpop.permute.xlu1 %235  ;;  %v2952_v57 = vpop.permute.xlu0 %2951  ;;  %1702 = vrot.lane.b32.xlu0 %v4889_v3, %s3150_s29 }
  0xc5   :  { %v2953_v58 = vunpack.i.l.bf16 %v2952_v57  ;;  %v2954_v60 = vunpack.i.h.bf16 %v2952_v57 }
  0xc7   :  { %v258_v61 = vsel %vm4880_vm11, %v2953_v58, %v246_v49  ;;  %v254_v11 = vsel %vm4880_vm11, %v2954_v60, %v236_v10 }
  0xc8   :  { %v240_v62 = vpop.permute.xlu1 %239  ;;  %v238_v63 = vpop.permute.xlu0 %237  ;;  %2779 = vmatpush1.msk.msra.mxu0 %vm3570_vm14, %v258_v61  ;;  %1658 = vrot.lane.b32.xlu0 %v4889_v3, %s3153_s5 }
  0xc9   :  { %v255_v9 = vsel %vm4880_vm11, %v236_v10, %v238_v63  ;;  %v256_v17 = vsel %vm4880_vm11, %v238_v63, %v240_v62 }
  0xca   :  { %2780 = vmatprep.subr.msk.mxu0 %vm4913_vm12, %v255_v9 }
  0xcb   :  { %2781 = vmatpush1.msk.msra.mxu0 %vm3570_vm14, %v254_v11  ;;  %vm4983_vm14 = vcmp.lt.s32.totalorder %v3356_v16, 240 }
  0xcc   :  { %v165_v12 = vpop.permute.xlu1 %164  ;;  %v242_v14 = vpop.permute.xlu0 %241  ;;  %1580 = vrot.lane.b32.xlu0 %v4889_v3, %s3172_s10 }
  0xcd   :  { %v257_v15 = vsel %vm4880_vm11, %v240_v62, %v242_v14  ;;  %vm4885_vm11 = vcmask 138240  }
  0xce   :  { %2808 = vmatprep.subr.msk.mxu1 %vm4912_vm13, %v257_v15 }
  0xcf   :  { %2809 = vmatpush1.msk.msra.mxu1 %vm3555_vm5, %v256_v17  ;;  %vm4924_vm5 = vcmp.lt.s32.totalorder %v3418_v41, 13 }
  0xd0   :  { %v169_v18 = vpop.permute.xlu1 %168  ;;  %v167_v19 = vpop.permute.xlu0 %166 }
  0xd1   :  { %v178_v20 = vsel %vm4884_vm3, %v165_v12, %v167_v19  ;;  %v179_v25 = vsel %vm4884_vm3, %v167_v19, %v169_v18 }
  0xd2   :  { %786 = vmatprep.subr.mxu0 %v178_v20 }
  0xd4   :  { %v2957_v21 = vpop.permute.xlu1 %2956  ;;  %v171_v22 = vpop.permute.xlu0 %170 }
  0xd5   :  { %v2958_v23 = vunpack.i.l.bf16 %v2957_v21  ;;  %v180_v24 = vsel %vm4884_vm3, %v169_v18, %v171_v22  ;;  %v2959_v26 = vunpack.i.h.bf16 %v2957_v21 }
  0xd6   :  { %857 = vmatprep.subr.mxu1 %v180_v24  ;;  %v679_v24 = vld [vmem:[%s4871_s1] sm:$0xff] }
  0xd7   :  { %2810 = vmatpush1.msk.msra.mxu1 %vm4882_vm0, %v179_v25  ;;  %v177_v28 = vsel %vm4884_vm3, %v2958_v23, %v165_v12 }
  0xd8   :  { %v157_v29 = vpop.permute.xlu1 %156  ;;  %v155_v30 = vpop.permute.xlu0 %154  ;;  %2782 = vmatpush1.msk.msra.mxu0 %vm4883_vm2, %v177_v28 }
  0xd9   :  { %v174_v31 = vsel %vm4884_vm3, %v155_v30, %v157_v29  ;;  %v173_v32 = vsel %vm4884_vm3, %v2959_v26, %v155_v30 }
  0xda   :  { %788 = vmatprep.subr.mxu0 %v174_v31 }
  0xdb   :  { %2783 = vmatpush1.msk.msra.mxu0 %vm4883_vm2, %v173_v32 }
  0xdc   :  { %v161_v33 = vpop.permute.xlu1 %160  ;;  %v159_v0 = vpop.permute.xlu0 %158 }
  0xdd   :  { %v176_v2 = vsel %vm4884_vm3, %v159_v0, %v161_v33  ;;  %v175_v1 = vsel %vm4884_vm3, %v157_v29, %v159_v0  ;;  %vm3649_vm3 = vmand %vm4913_vm12, %vm4923_vm1  ;;  %vm4922_vm12 = vcmp.lt.s32.totalorder %v3380_v27, 14 }
  0xde   :  { %859 = vmatprep.subr.mxu1 %v176_v2 }
  0xdf   :  { %2811 = vmatpush1.msk.msra.mxu1 %vm4882_vm0, %v175_v1  ;;  %vm3626_vm0 = vmand %vm4888_vm8, %vm4883_vm2  ;;  %vm4914_vm2 = vcmask 908288   ;;  %vm4953_vm8 = vcmp.lt.s32.totalorder %v3425_v45, 15 }
  0xe0   :  { %v94_v7 = vpop.permute.xlu1 %93  ;;  %v92_v6 = vpop.permute.xlu0 %91 }
  0xe1   :  { %v105_v4 = vsel %vm4885_vm11, %v92_v6, %v94_v7 }
  0xe2   :  { %2784 = vmatprep.subr.msk.mxu0 %vm4909_vm4, %v105_v4 }
  0xe4   :  { %v98_v34 = vpop.permute.xlu1 %97  ;;  %v96_v5 = vpop.permute.xlu0 %95 }
  0xe5   :  { %v107_v35 = vsel %vm4885_vm11, %v96_v5, %v98_v34  ;;  %v106_v36 = vsel %vm4885_vm11, %v94_v7, %v96_v5 }
  0xe6   :  { %2812 = vmatprep.subr.msk.mxu1 %vm4887_vm7, %v107_v35 }
  0xe7   :  { %2813 = vmatpush1.msk.msra.mxu1 %vm3612_vm15, %v106_v36 }
  0xe8   :  { %v82_v39 = vpop.permute.xlu1 %81  ;;  %v2962_v42 = vpop.permute.xlu0 %2961 }
  0xe9   :  { %v2963_v43 = vunpack.i.l.bf16 %v2962_v42  ;;  %v2964_v46 = vunpack.i.h.bf16 %v2962_v42 }
  0xeb   :  { %v104_v48 = vsel %vm4885_vm11, %v2963_v43, %v92_v6  ;;  %v100_v53 = vsel %vm4885_vm11, %v2964_v46, %v82_v39 }
  0xec   :  { %v86_v49 = vpop.permute.xlu1 %85  ;;  %2785 = vmatpush1.msk.msra.mxu0 %vm3626_vm0, %v104_v48 }
  0xed   :  { %v84_v51 = vpop.permute.xlu0 %83 }
  0xee   :  { %v101_v38 = vsel %vm4885_vm11, %v82_v39, %v84_v51  ;;  %v102_v57 = vsel %vm4885_vm11, %v84_v51, %v86_v49 }
  0xef   :  { %2786 = vmatprep.subr.msk.mxu0 %vm4909_vm4, %v101_v38  ;;  %vm4919_vm4 = vcmp.lt.s32.totalorder %v3380_v27, 13 }
  0xf0   :  { %2787 = vmatpush1.msk.msra.mxu0 %vm3626_vm0, %v100_v53  ;;  %v639_v55 = vpop.permute.xlu1 %638 }
  0xf1   :  { %v88_v56 = vpop.permute.xlu0 %87 }
  0xf2   :  { %v103_v10 = vsel %vm4885_vm11, %v86_v49, %v88_v56  ;;  %vm4949_vm11 = vcmp.lt.s32.totalorder %v3356_v16, 240 }
  0xf3   :  { %2814 = vmatprep.subr.msk.mxu1 %vm4887_vm7, %v103_v10  ;;  %vm3661_vm10 = vmand %vm4912_vm13, %vm4949_vm11  ;;  %vm4952_vm7 = vcmp.lt.s32.totalorder %v3418_v41, 15  ;;  %vm4908_vm11 = vcmask 588800   ;;  %vm4920_vm13 = vcmask 891904  }
  0xf4   :  { %2815 = vmatpush1.msk.msra.mxu1 %vm3612_vm15, %v102_v57 }
  0xf5   :  { %v643_v60 = vpop.permute.xlu1 %642  ;;  %v641_v61 = vpop.permute.xlu0 %640 }
  0xf6   :  { %v652_v62 = vsel %vm4914_vm2, %v639_v55, %v641_v61  ;;  %v653_v19 = vsel %vm4914_vm2, %v641_v61, %v643_v60 }
  0xf7   :  { %2788 = vmatprep.subr.msk.mxu0 %vm3649_vm3, %v652_v62 }
  0xf9   :  { %v637_v63 = vpop.permute.xlu1 %636  ;;  %v2967_v9 = vpop.permute.xlu0 %2966 }
  0xfa   :  { %v651_v11 = vsel %vm4914_vm2, %v637_v63, %v639_v55  ;;  %v2968_v12 = vunpack.i.l.bf16 %v2967_v9  ;;  %v2969_v21 = vunpack.i.h.bf16 %v2967_v9 }
  0xfb   :  { %2789 = vmatpush2.msk.msra.mxu0 %vm4952_vm7, %v651_v11 }
  0xfc   :  { %v654_v15 = vsel %vm4914_vm2, %v643_v60, %v2968_v12 }
  0xfd   :  { %v631_v17 = vpop.permute.xlu1 %630  ;;  %v629_v18 = vpop.permute.xlu0 %628  ;;  %2816 = vmatprep.subr.msk.mxu1 %vm3661_vm10, %v654_v15 }
  0xfe   :  { %2817 = vmatpush2.msk.msra.mxu1 %vm4953_vm8, %v653_v19  ;;  %v648_v20 = vsel %vm4914_vm2, %v629_v18, %v631_v17 }
  0xff   :  { %2790 = vmatprep.subr.msk.mxu0 %vm3649_vm3, %v648_v20 }
 0x101   :  { %v627_v22 = vpop.permute.xlu1 %626  ;;  %v633_v23 = vpop.permute.xlu0 %632 }
 0x102   :  { %v647_v25 = vsel %vm4914_vm2, %v627_v22, %v629_v18  ;;  %v650_v26 = vsel %vm4914_vm2, %v633_v23, %v2969_v21  ;;  %v649_v28 = vsel %vm4914_vm2, %v631_v17, %v633_v23  ;;  %vm1426_vm2 = vcmask 900096  }
 0x103   :  { %2791 = vmatpush2.msk.msra.mxu0 %vm4952_vm7, %v647_v25  ;;  %2818 = vmatprep.subr.msk.mxu1 %vm3661_vm10, %v650_v26  ;;  %vm1508_vm7 = vcmask 392192  }
 0x104   :  { %827 = vmatmul.mubr.f32.vlgmr.msra.gmra.mxu0 %v679_v24  ;;  %2819 = vmatpush2.msk.msra.mxu1 %vm4953_vm8, %v649_v28  ;;  %vm4915_vm8 = vcmp.ge.s32.totalorder %v3549_v52, 48 }
 0x105   :  { %898 = vmatmul.mubr.f32.vlgmr.msra.gmra.mxu1 %v679_v24  ;;  %v3798_v62 = vpop.permute.xlu1 %1424 }
 0x10a   :  { %v3808_v9 = vpop.permute.xlu1 %1348 }
 0x10e   :  { %v757_v29 = vpop.permute.xlu0 %756  ;;  %v3818_v18 = vpop.permute.xlu1 %1270 }
 0x112   :  { %v3758_v43 = vpop.permute.xlu0 %1498  ;;  %v3828_v21 = vpop.permute.xlu1 %1141 }
 0x116   :  { %v3768_v46 = vpop.permute.xlu0 %1465  ;;  %v3838_v23 = vpop.permute.xlu1 %1068 }
 0x11a   :  { %v3774_v38 = vpop.permute.xlu0 %1384  ;;  %v3850_v28 = vpop.permute.xlu1 %995 }
 0x11e   :  { %v3784_v56 = vpop.permute.xlu0 %1311 }
 0x122   :  { %v3790_v61 = vpop.permute.xlu0 %1230 }
 0x126   :  { %v3802_v63 = vpop.permute.xlu0 %1178 }
 0x12a   :  { %v3810_v12 = vpop.permute.xlu0 %1104 }
 0x12e   :  { %v3822_v19 = vpop.permute.xlu0 %1032 }
 0x132   :  { %v3830_v22 = vpop.permute.xlu0 %950 }
 0x133   :  { %4954 = vst [vmem:[#allocation9_spill] sm:$0xff] %v3830_v22 }
 0x136   :  { %v3842_v24 = vpop.permute.xlu0 %1865 }
 0x137   :  { %4955 = vst [vmem:[#allocation10_spill] sm:$0xff] %v3842_v24 }
 0x1c4   :  { %v828_v30 = vpop.f32.mrf.mxu0 }
 0x1c5   :  { %v829_v31 = vadd.f32 %v828_v30, %v757_v29  ;;  %v899_v32 = vpop.f32.mrf.mxu1  ;;  %v3852_v30 = vpop.permute.xlu0 %1783 }
 0x1c6   :  { %v900_v33 = vadd.f32 %v899_v32, %v757_v29  ;;  %v830_v48 = vpop.f32.mrf.mxu0  ;;  %4956 = vst [vmem:[#allocation11_spill] sm:$0xff] %v3852_v30  ;;  %v3862_v32 = vpop.permute.xlu1 %1828 }
 0x1c7   :  { %v904_v0 = vsub.f32 0.0, %v829_v31  ;;  %v831_v49 = vadd.f32 %v830_v48, %v757_v29  ;;  %v901_v51 = vpop.f32.mrf.mxu1  ;;  %4957 = vst [vmem:[#allocation12_spill] sm:$0xff] %v3862_v32 }
 0x1c8   :  { %v906_v2 = vsub.f32 0.0, %v900_v33  ;;  %v902_v55 = vadd.f32 %v901_v51, %v757_v29 }
 0x1c9   :  { %v908_v1 = vmul.f32 1.442695, %v904_v0  ;;  %v905_v53 = vsub.f32 0.0, %v831_v49 }
 0x1ca   :  { %v912_v7 = vmul.f32 1.442695, %v906_v2  ;;  %v907_v57 = vsub.f32 0.0, %v902_v55  ;;  %v3872_v0 = vpop.permute.xlu1 %1746 }
 0x1cb   :  { %2972 = vpow2.f32 %v908_v1  ;;  %v910_v10 = vmul.f32 1.442695, %v905_v53  ;;  %4959 = vst [vmem:[#allocation14_spill] sm:$0xff] %v3872_v0 }
 0x1cc   :  { %2974 = vpow2.f32 %v912_v7  ;;  %v914_v60 = vmul.f32 1.442695, %v907_v57 }
 0x1ce   :  { %v3882_v1 = vpop.permute.xlu1 %1621 }
 0x1cf   :  { %4961 = vst [vmem:[#allocation16_spill] sm:$0xff] %v3882_v1 }
 0x1d8   :  { %v2973_v6 = vpop.eup %2972 }
 0x1d9   :  { %v2975_v4 = vpop.eup %2974  ;;  %v916_v34 = vadd.f32 1.0, %v2973_v6 }
 0x1da   :  { %v918_v5 = vadd.f32 1.0, %v2975_v4 }
 0x1db   :  { %2976 = vrcp.f32 %v916_v34 }
 0x1dc   :  { %2978 = vrcp.f32 %v918_v5 }
 0x1dd   :  { %2980 = vpow2.f32 %v910_v10 }
 0x1de   :  { %2982 = vpow2.f32 %v914_v60 }
 0x1e8   :  { %v2977_v35 = vpop.eup %2976 }
 0x1e9   :  { %v2979_v36 = vpop.eup %2978  ;;  %v3722_v39 = vmul.f32 %v2977_v35, %v829_v31 }
 0x1ea   :  { %v3724_v42 = vmul.f32 %v2979_v36, %v900_v33  ;;  %v2981_v11 = vpop.eup %2980  ;;  %v3866_v33 = vpop.permute.xlu0 %1702 }
 0x1eb   :  { %1500 = vrot.lane.b32.xlu1 %v3722_v39, %s3158_s13  ;;  %v917_v15 = vadd.f32 1.0, %v2981_v11  ;;  %v2983_v17 = vpop.eup %2982  ;;  %4958 = vst [vmem:[#allocation13_spill] sm:$0xff] %v3866_v33 }
 0x1ec   :  { %1504 = vrot.lane.b32.xlu0 %v3724_v42, %s3158_s13  ;;  %v919_v20 = vadd.f32 1.0, %v2983_v17 }
 0x1ed   :  { %2984 = vrcp.f32 %v917_v15 }
 0x1ee   :  { %2986 = vrcp.f32 %v919_v20  ;;  %v3874_v2 = vpop.permute.xlu0 %1658 }
 0x1ef   :  { %1457 = vrot.lane.b32.xlu1 %v3722_v39, %s3159_s14  ;;  %4960 = vst [vmem:[#allocation15_spill] sm:$0xff] %v3874_v2 }
 0x1f0   :  { %1461 = vrot.lane.b32.xlu0 %v3724_v42, %s3159_s14 }
 0x1f2   :  { %v3886_v7 = vpop.permute.xlu0 %1580 }
 0x1f3   :  { %1420 = vrot.lane.b32.xlu1 %v3724_v42, %s3161_s19  ;;  %4962 = vst [vmem:[#allocation17_spill] sm:$0xff] %v3886_v7 }
 0x1f4   :  { %1416 = vrot.lane.b32.xlu0 %v3722_v39, %s3161_s19 }
 0x1f7   :  { %1376 = vrot.lane.b32.xlu1 %v3722_v39, %s3156_s8 }
 0x1f8   :  { %1380 = vrot.lane.b32.xlu0 %v3724_v42, %s3156_s8 }
 0x1fa   :  { %v2985_v25 = vpop.eup %2984 }
 0x1fb   :  { %1344 = vrot.lane.b32.xlu1 %v3724_v42, %s3148_s16  ;;  %v3848_v26 = vmul.f32 %v2985_v25, %v831_v49  ;;  %v2987_v29 = vpop.eup %2986 }
 0x1fc   :  { %1340 = vrot.lane.b32.xlu0 %v3722_v39, %s3148_s16  ;;  %v3858_v31 = vmul.f32 %v2987_v29, %v902_v55 }
 0x1ff   :  { %1303 = vrot.lane.b32.xlu1 %v3722_v39, %s3160_s15 }
 0x200   :  { %1307 = vrot.lane.b32.xlu0 %v3724_v42, %s3160_s15 }
 0x203   :  { %1266 = vrot.lane.b32.xlu1 %v3724_v42, %s3163_s21 }
 0x204   :  { %1262 = vrot.lane.b32.xlu0 %v3722_v39, %s3163_s21 }
 0x207   :  { %1222 = vrot.lane.b32.xlu1 %v3722_v39, %s3151_s30 }
 0x208   :  { %1226 = vrot.lane.b32.xlu0 %v3724_v42, %s3151_s30 }
 0x20b   :  { %1143 = vrot.lane.b32.xlu1 %v3722_v39, %s3164_s22 }
 0x20c   :  { %1180 = vrot.lane.b32.xlu0 %v3722_v39, %s3152_s4 }
 0x20f   :  { %1147 = vrot.lane.b32.xlu1 %v3724_v42, %s3164_s22 }
 0x210   :  { %1184 = vrot.lane.b32.xlu0 %v3724_v42, %s3152_s4 }
 0x213   :  { %1070 = vrot.lane.b32.xlu1 %v3722_v39, %s3154_s6 }
 0x214   :  { %1106 = vrot.lane.b32.xlu0 %v3722_v39, %s3162_s20 }
 0x217   :  { %1074 = vrot.lane.b32.xlu1 %v3724_v42, %s3154_s6 }
 0x218   :  { %1110 = vrot.lane.b32.xlu0 %v3724_v42, %s3162_s20 }
 0x21b   :  { %997 = vrot.lane.b32.xlu1 %v3722_v39, %s3167_s25 }
 0x21c   :  { %1034 = vrot.lane.b32.xlu0 %v3722_v39, %s3155_s7 }
 0x21f   :  { %1001 = vrot.lane.b32.xlu1 %v3724_v42, %s3167_s25 }
 0x220   :  { %1038 = vrot.lane.b32.xlu0 %v3724_v42, %s3155_s7 }
 0x223   :  { %1857 = vrot.lane.b32.xlu1 %v3722_v39, %s3166_s24 }
 0x224   :  { %952 = vrot.lane.b32.xlu0 %v3722_v39, %s3165_s23 }
 0x227   :  { %1824 = vrot.lane.b32.xlu1 %v3724_v42, %s3169_s27 }
 0x228   :  { %956 = vrot.lane.b32.xlu0 %v3724_v42, %s3165_s23 }
 0x22b   :  { %1775 = vrot.lane.b32.xlu1 %v3722_v39, %s3168_s26 }
 0x22c   :  { %1861 = vrot.lane.b32.xlu0 %v3724_v42, %s3166_s24 }
 0x22f   :  { %1742 = vrot.lane.b32.xlu1 %v3724_v42, %s3170_s28 }
 0x230   :  { %1820 = vrot.lane.b32.xlu0 %v3722_v39, %s3169_s27 }
 0x233   :  { %1694 = vrot.lane.b32.xlu1 %v3722_v39, %s3150_s29 }
 0x234   :  { %1779 = vrot.lane.b32.xlu0 %v3724_v42, %s3168_s26 }
 0x237   :  { %1623 = vrot.lane.b32.xlu1 %v3722_v39, %s3171_s9 }
 0x238   :  { %1738 = vrot.lane.b32.xlu0 %v3722_v39, %s3170_s28 }
 0x23b   :  { %1627 = vrot.lane.b32.xlu1 %v3724_v42, %s3171_s9 }
 0x23c   :  { %1698 = vrot.lane.b32.xlu0 %v3724_v42, %s3150_s29 }
 0x23f   :  { %1541 = vrot.lane.b32.xlu1 %v3722_v39, %s3173_s11 }
 0x240   :  { %1660 = vrot.lane.b32.xlu0 %v3722_v39, %s3153_s5 }
 0x243   :  { %1545 = vrot.lane.b32.xlu1 %v3724_v42, %s3173_s11 }
 0x244   :  { %1664 = vrot.lane.b32.xlu0 %v3724_v42, %s3153_s5 }
 0x247   :  { %1502 = vrot.lane.b32.xlu1 %v3848_v26, %s3158_s13 }
 0x248   :  { %1582 = vrot.lane.b32.xlu0 %v3722_v39, %s3172_s10 }
 0x24b   :  { %1506 = vrot.lane.b32.xlu1 %v3858_v31, %s3158_s13 }
 0x24c   :  { %1586 = vrot.lane.b32.xlu0 %v3724_v42, %s3172_s10 }
 0x24f   :  { %1459 = vrot.lane.b32.xlu1 %v3848_v26, %s3159_s14 }
 0x250   :  { %1418 = vrot.lane.b32.xlu0 %v3848_v26, %s3161_s19 }
 0x253   :  { %1463 = vrot.lane.b32.xlu1 %v3858_v31, %s3159_s14 }
 0x254   :  { %1422 = vrot.lane.b32.xlu0 %v3858_v31, %s3161_s19 }
 0x257   :  { %1378 = vrot.lane.b32.xlu1 %v3848_v26, %s3156_s8 }
 0x258   :  { %1342 = vrot.lane.b32.xlu0 %v3848_v26, %s3148_s16 }
 0x25b   :  { %1382 = vrot.lane.b32.xlu1 %v3858_v31, %s3156_s8 }
 0x25c   :  { %1346 = vrot.lane.b32.xlu0 %v3858_v31, %s3148_s16 }
 0x25d   :  { %v3892_v6 = vpop.permute.xlu1 %1500 }
 0x25e   :  { %v3894_v4 = vpop.permute.xlu0 %1504 }
 0x25f   :  { %1305 = vrot.lane.b32.xlu1 %v3848_v26, %s3160_s15 }
 0x260   :  { %1264 = vrot.lane.b32.xlu0 %v3848_v26, %s3163_s21 }
 0x261   :  { %v3900_v34 = vpop.permute.xlu1 %1457 }
 0x262   :  { %v3902_v5 = vpop.permute.xlu0 %1461 }
 0x263   :  { %1309 = vrot.lane.b32.xlu1 %v3858_v31, %s3160_s15 }
 0x264   :  { %1268 = vrot.lane.b32.xlu0 %v3858_v31, %s3163_s21 }
 0x265   :  { %v3908_v35 = vpop.permute.xlu1 %1420 }
 0x266   :  { %v3910_v36 = vpop.permute.xlu0 %1416 }
 0x267   :  { %1224 = vrot.lane.b32.xlu1 %v3848_v26, %s3151_s30 }
 0x268   :  { %1145 = vrot.lane.b32.xlu0 %v3848_v26, %s3164_s22 }
 0x269   :  { %v3916_v48 = vpop.permute.xlu1 %1376 }
 0x26a   :  { %v3918_v49 = vpop.permute.xlu0 %1380 }
 0x26b   :  { %1228 = vrot.lane.b32.xlu1 %v3858_v31, %s3151_s30 }
 0x26c   :  { %1149 = vrot.lane.b32.xlu0 %v3858_v31, %s3164_s22 }
 0x26d   :  { %v3924_v51 = vpop.permute.xlu1 %1344 }
 0x26e   :  { %v3926_v53 = vpop.permute.xlu0 %1340 }
 0x26f   :  { %1182 = vrot.lane.b32.xlu1 %v3848_v26, %s3152_s4 }
 0x270   :  { %1072 = vrot.lane.b32.xlu0 %v3848_v26, %s3154_s6 }
 0x271   :  { %v3932_v55 = vpop.permute.xlu1 %1303 }
 0x272   :  { %v3934_v10 = vpop.permute.xlu0 %1307 }
 0x273   :  { %1186 = vrot.lane.b32.xlu1 %v3858_v31, %s3152_s4 }
 0x274   :  { %1076 = vrot.lane.b32.xlu0 %v3858_v31, %s3154_s6 }
 0x275   :  { %v3940_v57 = vpop.permute.xlu1 %1266 }
 0x276   :  { %v3942_v60 = vpop.permute.xlu0 %1262 }
 0x277   :  { %1108 = vrot.lane.b32.xlu1 %v3848_v26, %s3162_s20 }
 0x278   :  { %999 = vrot.lane.b32.xlu0 %v3848_v26, %s3167_s25 }
 0x279   :  { %v3948_v11 = vpop.permute.xlu1 %1222 }
 0x27a   :  { %v3950_v15 = vpop.permute.xlu0 %1226 }
 0x27b   :  { %1112 = vrot.lane.b32.xlu1 %v3858_v31, %s3162_s20 }
 0x27c   :  { %1003 = vrot.lane.b32.xlu0 %v3858_v31, %s3167_s25 }
 0x27d   :  { %v3956_v17 = vpop.permute.xlu1 %1143 }
 0x27e   :  { %v3958_v20 = vpop.permute.xlu0 %1180 }
 0x27f   :  { %1036 = vrot.lane.b32.xlu1 %v3848_v26, %s3155_s7 }
 0x280   :  { %1822 = vrot.lane.b32.xlu0 %v3848_v26, %s3169_s27 }
 0x281   :  { %v3964_v25 = vpop.permute.xlu1 %1147 }
 0x282   :  { %v3966_v29 = vpop.permute.xlu0 %1184 }
 0x283   :  { %1040 = vrot.lane.b32.xlu1 %v3858_v31, %s3155_s7 }
 0x284   :  { %1826 = vrot.lane.b32.xlu0 %v3858_v31, %s3169_s27 }
 0x285   :  { %v3972_v3 = vpop.permute.xlu1 %1070 }
 0x286   :  { %v3974_v7 = vpop.permute.xlu0 %1106 }
 0x287   :  { %954 = vrot.lane.b32.xlu1 %v3848_v26, %s3165_s23 }
 0x288   :  { %1740 = vrot.lane.b32.xlu0 %v3848_v26, %s3170_s28 }
 0x289   :  { %v3980_v54 = vpop.permute.xlu1 %1074 }
 0x28a   :  { %v3982_v1 = vpop.permute.xlu0 %1110 }
 0x28b   :  { %958 = vrot.lane.b32.xlu1 %v3858_v31, %s3165_s23 }
 0x28c   :  { %1744 = vrot.lane.b32.xlu0 %v3858_v31, %s3170_s28 }
 0x28d   :  { %v3988_v59 = vpop.permute.xlu1 %997 }
 0x28e   :  { %v3990_v2 = vpop.permute.xlu0 %1034 }
 0x28f   :  { %1859 = vrot.lane.b32.xlu1 %v3848_v26, %s3166_s24 }
 0x290   :  { %1625 = vrot.lane.b32.xlu0 %v3848_v26, %s3171_s9 }
 0x291   :  { %v3996_v50 = vpop.permute.xlu1 %1001 }
 0x292   :  { %4963 = vst [vmem:[#allocation18_spill] sm:$0xff] %v3996_v50  ;;  %v3998_v33 = vpop.permute.xlu0 %1038 }
 0x293   :  { %1863 = vrot.lane.b32.xlu1 %v3858_v31, %s3166_s24 }
 0x294   :  { %1629 = vrot.lane.b32.xlu0 %v3858_v31, %s3171_s9 }
 0x295   :  { %v4004_v40 = vpop.permute.xlu1 %1857 }
 0x296   :  { %4964 = vst [vmem:[#allocation19_spill] sm:$0xff] %v4004_v40  ;;  %v4006_v0 = vpop.permute.xlu0 %952  ;;  %v2007_v40 = vld [vmem:[%s4872_s2 + $0x40] sm:$0xff] }
 0x297   :  { %4965 = vst [vmem:[#allocation20_spill] sm:$0xff] %v4006_v0  ;;  %1777 = vrot.lane.b32.xlu1 %v3848_v26, %s3168_s26 }
 0x298   :  { %1543 = vrot.lane.b32.xlu0 %v3848_v26, %s3173_s11 }
 0x299   :  { %v4012_v30 = vpop.permute.xlu1 %1824 }
 0x29a   :  { %4966 = vst [vmem:[#allocation21_spill] sm:$0xff] %v4012_v30  ;;  %v4014_v32 = vpop.permute.xlu0 %956 }
 0x29b   :  { %4967 = vst [vmem:[#allocation22_spill] sm:$0xff] %v4014_v32  ;;  %1781 = vrot.lane.b32.xlu1 %v3858_v31, %s3168_s26  ;;  %v2005_v32 = vld [vmem:[%s4872_s2 + $0x30] sm:$0xff] }
 0x29c   :  { %1547 = vrot.lane.b32.xlu0 %v3858_v31, %s3173_s11 }
 0x29d   :  { %v4020_v24 = vpop.permute.xlu1 %1775 }
 0x29e   :  { %4968 = vst [vmem:[#allocation23_spill] sm:$0xff] %v4020_v24  ;;  %v4025_v22 = vpop.permute.xlu0 %1861 }
 0x29f   :  { %4969 = vst [vmem:[#allocation24_spill] sm:$0xff] %v4025_v22  ;;  %1696 = vrot.lane.b32.xlu1 %v3848_v26, %s3150_s29  ;;  %v2003_v22 = vld [vmem:[%s4872_s2 + $0x20] sm:$0xff] }
 0x2a0   :  { %2045 = vperm.xlu0 %2970, %v2007_v40  }
 0x2a1   :  { %v4029_v30 = vpop.permute.xlu1 %1742 }
 0x2a2   :  { %4970 = vst [vmem:[#allocation25_spill] sm:$0xff] %v4029_v30  ;;  %v4034_v0 = vpop.permute.xlu0 %1820  ;;  %v2001_v30 = vld [vmem:[%s4872_s2 + $0x10] sm:$0xff] }
 0x2a3   :  { %4971 = vst [vmem:[#allocation26_spill] sm:$0xff] %v4034_v0  ;;  %1700 = vrot.lane.b32.xlu1 %v3858_v31, %s3150_s29 }
 0x2a4   :  { %2035 = vperm.xlu0 %2970, %v2005_v32   ;;  %v1885_v32 = vld [vmem:[%s4871_s1 + $0x18] sm:$0xff] }
 0x2a5   :  { %v4038_v24 = vpop.permute.xlu1 %1694  ;;  %2752 = vmatprep.mubr.msk.f32.mxu1 %vm4908_vm11, %v1885_v32  ;;  %2744 = vmatprep.mubr.msk.f32.mxu0 %vm4908_vm11, %v1885_v32  ;;  %vm4918_vm11 = vcmp.ge.s32.totalorder %v3538_v47, 48 }
 0x2a6   :  { %4972 = vst [vmem:[#allocation27_spill] sm:$0xff] %v4038_v24  ;;  %v4043_v8 = vpop.permute.xlu0 %1779 }
 0x2a7   :  { %4973 = vst [vmem:[#allocation28_spill] sm:$0xff] %v4043_v8  ;;  %1662 = vrot.lane.b32.xlu1 %v3848_v26, %s3153_s5 }
 0x2a8   :  { %2025 = vperm.xlu0 %2970, %v2003_v22  }
 0x2a9   :  { %v4047_v40 = vpop.permute.xlu1 %1623 }
 0x2aa   :  { %4974 = vst [vmem:[#allocation29_spill] sm:$0xff] %v4047_v40  ;;  %v4055_v24 = vpop.permute.xlu0 %1738  ;;  %v2493_v40 = vld [vmem:[%s4872_s2 + $0x48] sm:$0xff] }
 0x2ab   :  { %4975 = vst [vmem:[#allocation30_spill] sm:$0xff] %v4055_v24  ;;  %1666 = vrot.lane.b32.xlu1 %v3858_v31, %s3153_s5 }
 0x2ac   :  { %2015 = vperm.xlu0 %2970, %v2001_v30  }
 0x2ad   :  { %v4061_v22 = vpop.permute.xlu1 %1627 }
 0x2ae   :  { %4976 = vst [vmem:[#allocation31_spill] sm:$0xff] %v4061_v22  ;;  %v4066_v8 = vpop.permute.xlu0 %1698  ;;  %v4981_v22 = vmov 0.0  }
 0x2af   :  { %4977 = vst [vmem:[#allocation32_spill] sm:$0xff] %v4066_v8  ;;  %1584 = vrot.lane.b32.xlu1 %v3848_v26, %s3172_s10 }
 0x2b0   :  { %2497 = vperm.xlu0 %2970, %v2493_v40  }
 0x2b1   :  { %v4070_v24 = vpop.permute.xlu1 %1541 }
 0x2b2   :  { %4978 = vst [vmem:[#allocation33_spill] sm:$0xff] %v4070_v24  ;;  %v4072_v0 = vpop.permute.xlu0 %1660  ;;  %v1509_v24 = vsel %vm1508_vm7, %v3758_v43, %v3892_v6 }
 0x2b3   :  { %1588 = vrot.lane.b32.xlu1 %v3858_v31, %s3172_s10 }
 0x2b5   :  { %v4076_v30 = vpop.permute.xlu1 %1545 }
 0x2b6   :  { %4979 = vst [vmem:[#allocation34_spill] sm:$0xff] %v4076_v30  ;;  %v4078_v32 = vpop.permute.xlu0 %1664 }
 0x2b7   :  { %4980 = vst [vmem:[#allocation35_spill] sm:$0xff] %v4078_v32  ;;  %1539 = vrot.lane.b32.xlu1 %v4981_v22, %s3173_s11 }
 0x2b9   :  { %v1503_v8 = vpop.permute.xlu1 %1502 }
 0x2ba   :  { %v4083_v50 = vpop.permute.xlu0 %1582  ;;  %v1510_v40 = vsel %vm1508_vm7, %v3892_v6, %v1503_v8 }
 0x2bb   :  { %4982 = vst [vmem:[#allocation36_spill] sm:$0xff] %v4083_v50  ;;  %2073 = vmatprep.subr.mxu0 %v1510_v40  ;;  %v1511_v50 = vsel %vm1508_vm7, %v1503_v8, %v3894_v4 }
 0x2bc   :  { %2820 = vmatpush1.msk.msra.mxu0 %vm4915_vm8, %v1509_v24  ;;  %vm1449_vm8 = vmand %vm4919_vm4, %vm4923_vm1  ;;  %vm1256_vm4 = vcmp.lt.s32.totalorder %v3400_v37, 14 }
 0x2bd   :  { %v1507_v30 = vpop.permute.xlu1 %1506 }
 0x2be   :  { %v4092_v22 = vpop.permute.xlu0 %1586  ;;  %v1512_v32 = vsel %vm1508_vm7, %v3894_v4, %v1507_v30  ;;  %vm1408_vm7 = vmand %vm4922_vm12, %vm4923_vm1  ;;  %vm1296_vm12 = vcmp.lt.s32.totalorder %v3425_v45, 13 }
 0x2bf   :  { %2186 = vmatprep.subr.mxu1 %v1512_v32 }
 0x2c0   :  { %2862 = vmatpush1.msk.msra.mxu1 %vm4918_vm11, %v1511_v50  ;;  %vm1253_vm11 = vcmp.lt.s32.totalorder %v3418_v41, 14 }
 0x2c1   :  { %v1460_v43 = vpop.permute.xlu1 %1459 }
 0x2c2   :  { %v1468_v8 = vsel %vm4920_vm13, %v3900_v34, %v1460_v43  ;;  %v1469_v24 = vsel %vm4920_vm13, %v1460_v43, %v3902_v5  ;;  %v1419_v6 = vpop.permute.xlu0 %1418  ;;  %vm4984_vm13 = vcmp.lt.s32.totalorder %v3400_v37, 13 }
 0x2c3   :  { %v1428_v50 = vsel %vm1426_vm2, %v1419_v6, %v3908_v35  ;;  %2821 = vmatprep.subr.msk.mxu0 %vm1449_vm8, %v1469_v24  ;;  %vm1451_vm9 = vmand %vm4984_vm13, %vm4983_vm14  ;;  %v1427_v4 = vsel %vm1426_vm2, %v3910_v36, %v1419_v6  ;;  %vm4985_vm8 = vcmask 891904   ;;  %v2004_v6 = vld [vmem:[%s4872_s2 + $0x28] sm:$0xff] }
 0x2c4   :  { %2822 = vmatpush1.msk.msra.mxu0 %vm4924_vm5, %v1468_v8  ;;  %vm4986_vm1 = vmmov %vm4985_vm8 }
 0x2c5   :  { %v1464_v34 = vpop.permute.xlu1 %1463  ;;  %2823 = vmatprep.subr.msk.mxu0 %vm1408_vm7, %v1428_v50  ;;  %vm4987_vm5 = vmmov %vm4983_vm14  ;;  %vm1255_vm14 = vcmp.lt.s32.totalorder %v3425_v45, 14 }
 0x2c6   :  { %v1470_v30 = vsel %vm4985_vm8, %v3902_v5, %v1464_v34  ;;  %v1471_v32 = vsel %vm4986_vm1, %v1464_v34, %v3768_v46  ;;  %2824 = vmatpush1.msk.msra.mxu0 %vm1253_vm11, %v1427_v4  ;;  %v1423_v40 = vpop.permute.xlu0 %1422  ;;  %vm1410_vm13 = vmand %vm1256_vm4, %vm4987_vm5  ;;  %v2006_v46 = vld [vmem:[%s4872_s2 + $0x38] sm:$0xff]  ;;  %vm4988_vm1 = vcmask 908288   ;;  %vm4993_vm8 = vcmp.lt.s32.totalorder %v3354_v13, 240 }
 0x2c7   :  { %v1430_v36 = vsel %vm1426_vm2, %v1423_v40, %v3798_v62  ;;  %2863 = vmatprep.subr.msk.mxu1 %vm1451_vm9, %v1471_v32  ;;  %v1429_v5 = vsel %vm1426_vm2, %v3908_v35, %v1423_v40  ;;  %2040 = vperm.xlu1 %2971, %v2006_v46   ;;  %vm4989_vm5 = vmmov %vm4988_vm1  ;;  %vm4990_vm9 = vcmask 916480   ;;  %vm4991_vm2 = vcmp.lt.s32.totalorder %v3418_v41, 15  ;;  %v2000_v40 = vld [vmem:[%s4872_s2 + $0x8] sm:$0xff] }
 0x2c8   :  { %2864 = vmatpush1.msk.msra.mxu1 %vm1296_vm12, %v1470_v30  ;;  %vm4992_vm7 = vmmov %vm4990_vm9  ;;  %v2002_v30 = vld [vmem:[%s4872_s2 + $0x18] sm:$0xff] }
 0x2c9   :  { %v1379_v43 = vpop.permute.xlu1 %1378  ;;  %2865 = vmatprep.subr.msk.mxu1 %vm1410_vm13, %v1430_v36  ;;  %vm4994_vm13 = vmmov %vm4988_vm1 }
 0x2ca   :  { %v1386_v8 = vsel %vm4988_vm1, %v3916_v48, %v1379_v43  ;;  %v1387_v62 = vsel %vm4989_vm5, %v1379_v43, %v3918_v49  ;;  %2866 = vmatpush1.msk.msra.mxu1 %vm1255_vm14, %v1429_v5  ;;  %v1343_v24 = vpop.permute.xlu0 %1342  ;;  %vm1313_vm5 = vcmask 1022976  }
 0x2cb   :  { %v1351_v35 = vsel %vm4990_vm9, %v1343_v24, %v3924_v51  ;;  %2825 = vmatprep.subr.msk.mxu0 %vm3649_vm3, %v1387_v62  ;;  %v1350_v48 = vsel %vm4992_vm7, %v3926_v53, %v1343_v24  ;;  %2030 = vperm.xlu1 %2971, %v2004_v6   ;;  %vm4995_vm3 = vmmov %vm4992_vm7  ;;  %vm4996_vm9 = vcmp.lt.s32.totalorder %v3425_v45, 15 }
 0x2cc   :  { %2826 = vmatpush1.msk.msra.mxu0 %vm4991_vm2, %v1386_v8  ;;  %vm1272_vm2 = vcmask 1031168   ;;  %vm4997_vm7 = vmmov %vm4995_vm3  ;;  %v2494_v8 = vld [vmem:[%s4872_s2 + $0x50] sm:$0xff] }
 0x2cd   :  { %v1383_v50 = vpop.permute.xlu1 %1382  ;;  %2827 = vmatprep.subr.msk.mxu0 %vm4993_vm8, %v1351_v35  ;;  %vm4998_vm8 = vcmp.lt.s32.totalorder %v3356_v16, 240 }
 0x2ce   :  { %v1388_v4 = vsel %vm4994_vm13, %v3918_v49, %v1383_v50  ;;  %v1389_v34 = vsel %vm4988_vm1, %v1383_v50, %v3774_v38  ;;  %2082 = vmatpush1.msra.mxu0 %v1350_v48  ;;  %v1347_v58 = vpop.permute.xlu0 %1346  ;;  %vm5000_vm13 = vcmp.lt.s32.totalorder %v3418_v41, 13  ;;  %vm5001_vm1 = vcmp.lt.s32.totalorder %v3380_v27, 14 }
 0x2cf   :  { %v1353_v53 = vsel %vm4995_vm3, %v1347_v58, %v3808_v9  ;;  %2867 = vmatprep.subr.msk.mxu1 %vm3661_vm10, %v1389_v34  ;;  %v1352_v38 = vsel %vm4997_vm7, %v3924_v51, %v1347_v58  ;;  %2020 = vperm.xlu1 %2971, %v2002_v30   ;;  %vm4999_vm10 = vcmp.lt.s32.totalorder %v3380_v27, 13  ;;  %vm5002_vm3 = vcmp.lt.s32.totalorder %v3400_v37, 13 }
 0x2d0   :  { %2868 = vmatpush1.msk.msra.mxu1 %vm4996_vm9, %v1388_v4  ;;  %vm5006_vm9 = vcmp.lt.s32.totalorder %v3418_v41, 15  ;;  %vm5010_vm7 = vcmp.lt.s32.totalorder %v3425_v45, 15 }
 0x2d1   :  { %v1306_v49 = vpop.permute.xlu1 %1305  ;;  %2869 = vmatprep.subr.msk.mxu1 %vm4998_vm8, %v1353_v53  ;;  %vm1151_vm8 = vcmask 15360  }
 0x2d2   :  { %v1314_v32 = vsel %vm1313_vm5, %v3932_v55, %v1306_v49  ;;  %v1315_v14 = vsel %vm1313_vm5, %v1306_v49, %v3934_v10  ;;  %2195 = vmatpush1.msra.mxu1 %v1352_v38  ;;  %v1265_v9 = vpop.permute.xlu0 %1264 }
 0x2d3   :  { %v1274_v51 = vsel %vm1272_vm2, %v1265_v9, %v3940_v57  ;;  %2828 = vmatprep.subr.msk.mxu0 %vm4999_vm10, %v1315_v14  ;;  %v1273_v55 = vsel %vm1272_vm2, %v3942_v60, %v1265_v9  ;;  %2010 = vperm.xlu1 %2971, %v2000_v40   ;;  %vm5011_vm10 = vcmask 7168  }
 0x2d4   :  { %2829 = vmatpush1.msk.msra.mxu0 %vm5000_vm13, %v1314_v32  ;;  %vm983_vm13 = vcmp.ge.s32.totalorder %v3380_v27, 2 }
 0x2d5   :  { %v1310_v36 = vpop.permute.xlu1 %1309  ;;  %2830 = vmatprep.subr.msk.mxu0 %vm5001_vm1, %v1274_v51  ;;  %vm5012_vm1 = vmmov %vm5011_vm10 }
 0x2d6   :  { %v1316_v46 = vsel %vm1313_vm5, %v3934_v10, %v1310_v36  ;;  %v1317_v5 = vsel %vm1313_vm5, %v1310_v36, %v3784_v56  ;;  %2831 = vmatpush1.msk.msra.mxu0 %vm1253_vm11, %v1273_v55  ;;  %v1269_v43 = vpop.permute.xlu0 %1268  ;;  %vm5003_vm11 = vcmask 1039360   ;;  %v5036_v36 = vld [vmem:[#allocation9_spill] sm:$0xff] }
 0x2d7   :  { %v1276_v60 = vsel %vm1272_vm2, %v1269_v43, %v3818_v18  ;;  %2870 = vmatprep.subr.msk.mxu1 %vm5002_vm3, %v1317_v5  ;;  %v1275_v56 = vsel %vm1272_vm2, %v3940_v57, %v1269_v43  ;;  %2502 = vperm.xlu1 %2971, %v2494_v8   ;;  %vm5004_vm5 = vmmov %vm5003_vm11  ;;  %vm5013_vm3 = vcmp.ge.s32.totalorder %v3380_v27, 1  ;;  %v5039_v8 = vld [vmem:[#allocation22_spill] sm:$0xff] }
 0x2d8   :  { %2871 = vmatpush1.msk.msra.mxu1 %vm1296_vm12, %v1316_v46  ;;  %vm5005_vm12 = vcmp.lt.s32.totalorder %v3380_v27, 15 }
 0x2d9   :  { %v1225_v10 = vpop.permute.xlu1 %1224  ;;  %2872 = vmatprep.subr.msk.mxu1 %vm1256_vm4, %v1276_v60  ;;  %vm5007_vm4 = vmmov %vm5004_vm5 }
 0x2da   :  { %v1232_v62 = vsel %vm5003_vm11, %v3948_v11, %v1225_v10  ;;  %v1233_v18 = vsel %vm5004_vm5, %v1225_v10, %v3950_v15  ;;  %2873 = vmatpush1.msk.msra.mxu1 %vm1255_vm14, %v1275_v56  ;;  %v1146_v24 = vpop.permute.xlu0 %1145  ;;  %vm5008_vm2 = vmmov %vm5007_vm4  ;;  %vm5009_vm14 = vcmp.lt.s32.totalorder %v3400_v37, 15  ;;  %vm982_vm11 = vcmp.ge.s32.totalorder %v3418_v41, 2 }
 0x2db   :  { %2832 = vmatprep.subr.msk.mxu0 %vm5005_vm12, %v1233_v18  ;;  %vm5014_vm5 = vcmp.ge.s32.totalorder %v3418_v41, 1  ;;  %vm5015_vm12 = vmmov %vm5012_vm1  ;;  %v5041_v18 = vld [vmem:[#allocation19_spill] sm:$0xff] }
 0x2dc   :  { %2833 = vmatpush1.msk.msra.mxu0 %vm5006_vm9, %v1232_v62  ;;  %vm985_vm9 = vcmp.ge.s32.totalorder %v3400_v37, 2 }
 0x2dd   :  { %v1229_v57 = vpop.permute.xlu1 %1228  ;;  %2089 = vmatprep.subr.mxu0 %v3848_v26 }
 0x2de   :  { %v1234_v6 = vsel %vm5007_vm4, %v3950_v15, %v1229_v57  ;;  %v1235_v11 = vsel %vm5008_vm2, %v1229_v57, %v3790_v61  ;;  %2090 = vmatpush1.msra.mxu0 %v3722_v39  ;;  %v1150_v35 = vpop.permute.xlu0 %1149  ;;  %v1188_v39 = vsel %vm5012_vm1, %v3802_v63, %v3958_v20  ;;  %vm5016_vm4 = vmmov %vm5012_vm1  ;;  %vm5017_vm2 = vcmp.ge.s32.totalorder %v3400_v37, 1  ;;  %v5042_v57 = vld [vmem:[#allocation24_spill] sm:$0xff] }
 0x2df   :  { %2874 = vmatprep.subr.msk.mxu1 %vm5009_vm14, %v1235_v11  ;;  %vm984_vm14 = vcmp.ge.s32.totalorder %v3425_v45, 2  ;;  %vm938_vm1 = vcmp.ge.s32.totalorder %v3380_v27, 3  ;;  %v5044_v11 = vld [vmem:[#allocation21_spill] sm:$0xff] }
 0x2e0   :  { %2875 = vmatpush1.msk.msra.mxu1 %vm5010_vm7, %v1234_v6  ;;  %vm1114_vm7 = vcmask 23552  }
 0x2e1   :  { %v1183_v48 = vpop.permute.xlu1 %1182  ;;  %2202 = vmatprep.subr.mxu1 %v3858_v31  ;;  %v1153_v31 = vsel %vm1151_vm8, %v3956_v17, %v1146_v24  ;;  %v1115_v34 = vsel %vm1114_vm7, %v3810_v12, %v3974_v7 }
 0x2e2   :  { %v1189_v26 = vsel %vm5011_vm10, %v3958_v20, %v1183_v48  ;;  %2203 = vmatpush1.msra.mxu1 %v3724_v42  ;;  %v1073_v61 = vpop.permute.xlu0 %1072  ;;  %v1152_v42 = vsel %vm1151_vm8, %v3828_v21, %v3956_v17  ;;  %v1190_v20 = vsel %vm5016_vm4, %v1183_v48, %v3966_v29  ;;  %v1155_v21 = vsel %vm1151_vm8, %v3964_v25, %v1150_v35  ;;  %v5045_v48 = vld [vmem:[#allocation26_spill] sm:$0xff] }
 0x2e3   :  { %2834 = vmatprep.subr.msk.mxu0 %vm5013_vm3, %v1189_v26  ;;  %vm5018_vm10 = vcmp.ge.s32.totalorder %v3425_v45, 1  ;;  %v1154_v17 = vsel %vm1151_vm8, %v1146_v24, %v3964_v25  ;;  %vm937_vm3 = vcmp.ge.s32.totalorder %v3418_v41, 3  ;;  %vm5019_vm8 = vcmask 130048  }
 0x2e4   :  { %2835 = vmatpush1.msk.msra.mxu0 %vm5014_vm5, %v1188_v39  ;;  %v1079_v25 = vsel %vm5019_vm8, %v3972_v3, %v1073_v61  ;;  %vm4925_vm5 = vcmp.ge.s32.totalorder %v3400_v37, 3  ;;  %vm4926_vm4 = vcmp.ge.s32.totalorder %v3425_v45, 3 }
 0x2e5   :  { %v1187_v15 = vpop.permute.xlu1 %1186  ;;  %2836 = vmatprep.subr.msk.mxu0 %vm983_vm13, %v1153_v31  ;;  %v5046_v31 = vld [vmem:[#allocation10_spill] sm:$0xff] }
 0x2e6   :  { %v1191_v63 = vsel %vm5015_vm12, %v3966_v29, %v1187_v15  ;;  %2837 = vmatpush1.msk.msra.mxu0 %vm982_vm11, %v1152_v42  ;;  %v1077_v50 = vpop.permute.xlu0 %1076  ;;  %vm5020_vm12 = vmmov %vm5019_vm8 }
 0x2e7   :  { %2876 = vmatprep.subr.msk.mxu1 %vm5017_vm2, %v1191_v63  ;;  %v1078_v58 = vsel %vm5020_vm12, %v3838_v23, %v3972_v3  ;;  %vm5021_vm2 = vcmp.ge.s32.totalorder %v3549_v52, 16  ;;  %v1080_v23 = vsel %vm5019_vm8, %v1073_v61, %v3980_v54  ;;  %vm1005_vm12 = vcmask 146432   ;;  %v5049_v63 = vld [vmem:[#allocation12_spill] sm:$0xff] }
 0x2e8   :  { %2877 = vmatpush1.msk.msra.mxu1 %vm5018_vm10, %v1190_v20  ;;  %vm5022_vm10 = vmmov %vm5019_vm8  ;;  %v1006_v32 = vsel %vm1005_vm12, %v3850_v28, %v3988_v59  ;;  %v5068_v28 = vld [vmem:[#allocation13_spill] sm:$0xff] }
 0x2e9   :  { %v1109_v4 = vpop.permute.xlu1 %1108  ;;  %2878 = vmatprep.subr.msk.mxu1 %vm985_vm9, %v1155_v21  ;;  %v1081_v3 = vsel %vm5022_vm10, %v3980_v54, %v1077_v50  ;;  %vm5027_vm10 = vcmp.ge.s32.totalorder %v3549_v52, 16  ;;  %v5050_v50 = vld [vmem:[#allocation23_spill] sm:$0xff] }
 0x2ea   :  { %v1116_v29 = vsel %vm1114_vm7, %v3974_v7, %v1109_v4  ;;  %2879 = vmatpush1.msk.msra.mxu1 %vm984_vm14, %v1154_v17  ;;  %v1117_v7 = vsel %vm1114_vm7, %v1109_v4, %v3982_v1  ;;  %v1000_v53 = vpop.permute.xlu0 %999  ;;  %vm986_vm8 = vmand %vm982_vm11, %vm5027_vm10 }
 0x2eb   :  { %2838 = vmatprep.subr.msk.mxu0 %vm938_vm1, %v1116_v29  ;;  %v1007_v54 = vsel %vm1005_vm12, %v3988_v59, %v1000_v53  ;;  %v5032_v59 = vld [vmem:[#allocation18_spill] sm:$0xff]  ;;  %v5051_v29 = vld [vmem:[#allocation28_spill] sm:$0xff] }
 0x2ec   :  { %2839 = vmatpush1.msk.msra.mxu0 %vm937_vm3, %v1115_v34  ;;  %v1008_v40 = vsel %vm1005_vm12, %v1000_v53, %v5032_v59 }
 0x2ed   :  { %v1113_v30 = vpop.permute.xlu1 %1112  ;;  %2097 = vmatprep.subr.mxu0 %v1079_v25 }
 0x2ee   :  { %v1118_v12 = vsel %vm1114_vm7, %v3982_v1, %v1113_v30  ;;  %2840 = vmatpush1.msk.msra.mxu0 %vm5021_vm2, %v1078_v58  ;;  %vm5023_vm2 = vcmask 138240   ;;  %vm5024_vm7 = vcmp.ge.s32.totalorder %v3538_v47, 16  ;;  %v1004_v14 = vpop.permute.xlu0 %1003  ;;  %v5055_v58 = vld [vmem:[#allocation30_spill] sm:$0xff] }
 0x2ef   :  { %2880 = vmatprep.subr.msk.mxu1 %vm4925_vm5, %v1118_v12  ;;  %vm5025_vm5 = vmmov %vm5023_vm2  ;;  %v1009_v44 = vsel %vm1005_vm12, %v5032_v59, %v1004_v14  ;;  %vm1867_vm12 = vcmask 654336   ;;  %v5062_v14 = vld [vmem:[#allocation32_spill] sm:$0xff] }
 0x2f0   :  { %2881 = vmatpush1.msk.msra.mxu1 %vm4926_vm4, %v1117_v7  ;;  %v1042_v1 = vsel %vm5025_vm5, %v3822_v19, %v3990_v2  ;;  %vm5026_vm4 = vcmp.ge.s32.totalorder %v3380_v27, 1  ;;  %vm5028_vm5 = vmmov %vm5023_vm2 }
 0x2f1   :  { %v1037_v38 = vpop.permute.xlu1 %1036  ;;  %2210 = vmatprep.subr.mxu1 %v1081_v3  ;;  %vm5029_vm11 = vmmov %vm5023_vm2  ;;  %v5056_v3 = vld [vmem:[#allocation11_spill] sm:$0xff] }
 0x2f2   :  { %v1043_v49 = vsel %vm5023_vm2, %v3990_v2, %v1037_v38  ;;  %2882 = vmatpush1.msk.msra.mxu1 %vm5024_vm7, %v1080_v23  ;;  %v1044_v9 = vsel %vm5029_vm11, %v1037_v38, %v3998_v33  ;;  %v1823_v5 = vpop.permute.xlu0 %1822 }
 0x2f3   :  { %2841 = vmatprep.subr.msk.mxu0 %vm5026_vm4, %v1043_v49  ;;  %vm5030_vm4 = vcmp.ge.s32.totalorder %v3400_v37, 1 }
 0x2f4   :  { %2842 = vmatpush1.msk.msra.mxu0 %vm3626_vm0, %v1042_v1  ;;  %vm5031_vm0 = vmmov %vm5024_vm7  ;;  %vm960_vm7 = vcmask 154624  }
 0x2f5   :  { %v1041_v19 = vpop.permute.xlu1 %1040  ;;  %2843 = vmatprep.subr.msk.mxu0 %vm983_vm13, %v1007_v54  ;;  %vm988_vm2 = vmand %vm984_vm14, %vm5031_vm0  ;;  %v5060_v54 = vld [vmem:[#allocation27_spill] sm:$0xff] }
 0x2f6   :  { %v1045_v2 = vsel %vm5028_vm5, %v3998_v33, %v1041_v19  ;;  %2844 = vmatpush1.msk.msra.mxu0 %vm986_vm8, %v1006_v32  ;;  %vm5034_vm13 = vmmov %vm5027_vm10  ;;  %v5035_v33 = vld [vmem:[#allocation20_spill] sm:$0xff]  ;;  %vm1808_vm8 = vcmp.lt.s32.totalorder %v3354_v13, 208  ;;  %v1827_v10 = vpop.permute.xlu0 %1826  ;;  %vm5043_vm5 = vcmp.ge.s32.totalorder %v3380_v27, 1 }
 0x2f7   :  { %2883 = vmatprep.subr.msk.mxu1 %vm5030_vm4, %v1045_v2  ;;  %vm941_vm10 = vmand %vm937_vm3, %vm5034_vm13  ;;  %v961_v46 = vsel %vm960_vm7, %v5036_v36, %v5035_v33  ;;  %vm5040_vm3 = vcmp.ge.s32.totalorder %v3400_v37, 3  ;;  %vm1810_vm4 = vcmp.lt.s32.totalorder %v3356_v16, 208  ;;  %vm1785_vm13 = vcmask 785408  }
 0x2f8   :  { %2884 = vmatpush1.msk.msra.mxu1 %vm3612_vm15, %v1044_v9  ;;  %vm5037_vm15 = vmmov %vm5031_vm0  ;;  %vm5047_vm0 = vcmp.ge.s32.totalorder %v3418_v41, 1 }
 0x2f9   :  { %v955_v51 = vpop.permute.xlu1 %954  ;;  %2885 = vmatprep.subr.msk.mxu1 %vm985_vm9, %v1009_v44  ;;  %vm5038_vm9 = vcmp.ge.s32.totalorder %v3425_v45, 3  ;;  %vm1812_vm11 = vmand %vm5043_vm5, %vm1808_vm8 }
 0x2fa   :  { %v962_v55 = vsel %vm960_vm7, %v5035_v33, %v955_v51  ;;  %2886 = vmatpush1.msk.msra.mxu1 %vm988_vm2, %v1008_v40  ;;  %vm943_vm14 = vmand %vm5038_vm9, %vm5037_vm15  ;;  %v963_v56 = vsel %vm960_vm7, %v955_v51, %v5039_v8  ;;  %vm5048_vm2 = vcmp.ge.s32.totalorder %v3400_v37, 1  ;;  %v1741_v15 = vpop.permute.xlu0 %1740  ;;  %vm1748_vm15 = vcmask 793600   ;;  %v5070_v51 = vld [vmem:[#allocation5_spill] sm:$0xff] }
 0x2fb   :  { %2845 = vmatprep.subr.msk.mxu0 %vm938_vm1, %v962_v55  ;;  %vm1830_vm1 = vcmask 662528   ;;  %vm5052_vm9 = vcmp.ge.s32.totalorder %v3425_v45, 1  ;;  %v1749_v30 = vsel %vm1748_vm15, %v5055_v58, %v1741_v15  ;;  %v1893_v58 = vld [vmem:[%s4871_s1 + $0x58] sm:$0xff] }
 0x2fc   :  { %2846 = vmatpush1.msk.msra.mxu0 %vm941_vm10, %v961_v46  ;;  %v1832_v35 = vsel %vm1830_vm1, %v1823_v5, %v5044_v11  ;;  %v1831_v26 = vsel %vm1830_vm1, %v5045_v48, %v1823_v5  ;;  %vm1726_vm10 = vcmp.lt.s32.totalorder %v3354_v13, 224  ;;  %v1834_v20 = vsel %vm1830_vm1, %v1827_v10, %v5049_v63  ;;  %v5054_v13 = vld [vmem:[#allocation25_spill] sm:$0xff]  ;;  %v5074_v46 = vld [vmem:[#allocation15_spill] sm:$0xff] }
 0x2fd   :  { %v959_v43 = vpop.permute.xlu1 %958  ;;  %v1833_v21 = vsel %vm1830_vm1, %v5044_v11, %v1827_v10  ;;  %v1750_v25 = vsel %vm1748_vm15, %v1741_v15, %v5054_v13  ;;  %vm5058_vm1 = vmmov %vm5048_vm2  ;;  %v5097_v15 = vld [vmem:[#allocation33_spill] sm:$0xff] }
 0x2fe   :  { %v964_v60 = vsel %vm960_vm7, %v5039_v8, %v959_v43  ;;  %vm1814_vm7 = vmand %vm5048_vm2, %vm1810_vm4  ;;  %v1745_v12 = vpop.permute.xlu0 %1744  ;;  %v5078_v43 = vld [vmem:[#allocation29_spill] sm:$0xff] }
 0x2ff   :  { %2887 = vmatprep.subr.msk.mxu1 %vm5040_vm3, %v964_v60  ;;  %v1751_v49 = vsel %vm1748_vm15, %v5054_v13, %v1745_v12  ;;  %v5079_v60 = vld [vmem:[#allocation7_spill] sm:$0xff] }
 0x300   :  { %2888 = vmatpush1.msk.msra.mxu1 %vm943_vm14, %v963_v56  ;;  %vm5053_vm14 = vmmov %vm5043_vm5  ;;  %v5081_v56 = vld [vmem:[#allocation16_spill] sm:$0xff]  ;;  %v1889_v13 = vld [vmem:[%s4871_s1 + $0x38] sm:$0xff] }
 0x301   :  { %v1860_v62 = vpop.permute.xlu1 %1859  ;;  %vm1730_vm3 = vmand %vm5053_vm14, %vm1726_vm10  ;;  %vm5073_vm14 = vcmask 121856  }
 0x302   :  { %v1868_v24 = vsel %vm1867_vm12, %v5041_v18, %v1860_v62  ;;  %v1869_v6 = vsel %vm1867_vm12, %v1860_v62, %v5042_v57  ;;  %v1626_v2 = vpop.permute.xlu0 %1625  ;;  %v5083_v62 = vld [vmem:[#allocation35_spill] sm:$0xff] }
 0x303   :  { %2847 = vmatprep.subr.msk.mxu0 %vm1808_vm8, %v1869_v6  ;;  %vm5057_vm8 = vmmov %vm5047_vm0  ;;  %v5088_v6 = vld [vmem:[#allocation31_spill] sm:$0xff] }
 0x304   :  { %2120 = vmatpush2.msra.mxu0 %v1868_v24  ;;  %vm5066_vm2 = vmmov %vm5057_vm8 }
 0x305   :  { %v1864_v39 = vpop.permute.xlu1 %1863  ;;  %2848 = vmatprep.subr.msk.mxu0 %vm1812_vm11, %v1832_v35  ;;  %vm5061_vm11 = vcmask 924672   ;;  %v5089_v35 = vld [vmem:[#allocation6_spill] sm:$0xff] }
 0x306   :  { %v1870_v61 = vsel %vm1867_vm12, %v5042_v57, %v1864_v39  ;;  %v1871_v42 = vsel %vm1867_vm12, %v1864_v39, %v5046_v31  ;;  %2849 = vmatpush2.msk.msra.mxu0 %vm5047_vm0, %v1831_v26  ;;  %vm1728_vm12 = vcmp.lt.s32.totalorder %v3356_v16, 224  ;;  %v5059_v16 = vld [vmem:[#allocation14_spill] sm:$0xff]  ;;  %vm5064_vm0 = vmmov %vm5052_vm9  ;;  %v1630_v33 = vpop.permute.xlu0 %1629  ;;  %v5094_v39 = vld [vmem:[#allocation36_spill] sm:$0xff] }
 0x307   :  { %2889 = vmatprep.subr.msk.mxu1 %vm1810_vm4, %v1871_v42  ;;  %vm1732_vm5 = vmand %vm5058_vm1, %vm1728_vm12  ;;  %v1752_v38 = vsel %vm1748_vm15, %v1745_v12, %v5059_v16  ;;  %v5095_v31 = vld [vmem:[#allocation17_spill] sm:$0xff]  ;;  %v1898_v16 = vld [vmem:[%s4871_s1 + $0x80] sm:$0xff] }
 0x308   :  { %2233 = vmatpush2.msra.mxu1 %v1870_v61  ;;  %vm5063_vm4 = vmmov %vm5061_vm11  ;;  %v1895_v12 = vld [vmem:[%s4871_s1 + $0x68] sm:$0xff] }
 0x309   :  { %v1778_v17 = vpop.permute.xlu1 %1777  ;;  %2890 = vmatprep.subr.msk.mxu1 %vm1814_vm7, %v1834_v20  ;;  %vm5067_vm7 = vmmov %vm5063_vm4 }
 0x30a   :  { %v1786_v4 = vsel %vm1785_vm13, %v5050_v50, %v1778_v17  ;;  %v1787_v34 = vsel %vm1785_vm13, %v1778_v17, %v5051_v29  ;;  %2891 = vmatpush2.msk.msra.mxu1 %vm5052_vm9, %v1833_v21  ;;  %vm5072_vm15 = vmmov %vm5064_vm0  ;;  %vm1530_vm9 = vcmp.ge.s32.totalorder %v3549_v52, 32  ;;  %v1544_v24 = vpop.permute.xlu0 %1543 }
 0x30b   :  { %2850 = vmatprep.subr.msk.mxu0 %vm1726_vm10, %v1787_v34  ;;  %vm5071_vm10 = vnez %v5070_v51  ;;  %v1886_v34 = vld [vmem:[%s4871_s1 + $0x20] sm:$0xff] }
 0x30c   :  { %2124 = vmatpush2.msra.mxu0 %v1786_v4  ;;  %v1884_v4 = vld [vmem:[%s4871_s1 + $0x10] sm:$0xff] }
 0x30d   :  { %v1782_v7 = vpop.permute.xlu1 %1781  ;;  %2851 = vmatprep.subr.msk.mxu0 %vm1730_vm3, %v1750_v25  ;;  %vm5075_vm3 = vmmov %vm5073_vm14  ;;  %v1890_v25 = vld [vmem:[%s4871_s1 + $0x40] sm:$0xff] }
 0x30e   :  { %v1788_v53 = vsel %vm1785_vm13, %v5051_v29, %v1782_v7  ;;  %v1789_v23 = vsel %vm1785_vm13, %v1782_v7, %v5056_v3  ;;  %2852 = vmatpush2.msk.msra.mxu0 %vm5057_vm8, %v1749_v30  ;;  %vm5069_vm13 = vmmov %vm5063_vm4  ;;  %v1668_v5 = vsel %vm5075_vm3, %v5074_v46, %v4072_v0  ;;  %vm5077_vm8 = vcmp.lt.s32.totalorder %v3418_v41, 15  ;;  %v1548_v20 = vpop.permute.xlu0 %1547  ;;  %v1892_v30 = vld [vmem:[%s4871_s1 + $0x50] sm:$0xff]  ;;  %v1894_v7 = vld [vmem:[%s4871_s1 + $0x60] sm:$0xff] }
 0x30f   :  { %2892 = vmatprep.subr.msk.mxu1 %vm1728_vm12, %v1789_v23  ;;  %vm5076_vm12 = vcmp.lt.s32.totalorder %v3380_v27, 15  ;;  %vm1612_vm1 = vmand %vm5077_vm8, %vm1530_vm9  ;;  %vm5092_vm8 = vcmp.ge.s32.totalorder %v3549_v52, 48  ;;  %v5100_v27 = vld [vmem:[#allocation34_spill] sm:$0xff]  ;;  %v1891_v52 = vld [vmem:[%s4871_s1 + $0x48] sm:$0xff] }
 0x310   :  { %2237 = vmatpush2.msra.mxu1 %v1788_v53  ;;  %v1897_v53 = vld [vmem:[%s4871_s1 + $0x78] sm:$0xff]  ;;  %v1896_v3 = vld [vmem:[%s4871_s1 + $0x70] sm:$0xff]  ;;  %v1899_v23 = vld [vmem:[%s4871_s1 + $0x88] sm:$0xff] }
 0x311   :  { %v1697_v1 = vpop.permute.xlu1 %1696  ;;  %2893 = vmatprep.subr.msk.mxu1 %vm1732_vm5, %v1752_v38  ;;  %vm5080_vm5 = vnez %v5079_v60  ;;  %v5115_v38 = vmov 0.0  }
 0x312   :  { %v1704_v32 = vsel %vm5061_vm11, %v5060_v54, %v1697_v1  ;;  %v1705_v19 = vsel %vm5063_vm4, %v1697_v1, %v5062_v14  ;;  %2894 = vmatpush2.msk.msra.mxu1 %vm5064_vm0, %v1751_v49  ;;  %vm1532_vm11 = vcmp.ge.s32.totalorder %v3538_v47, 32  ;;  %vm5082_vm4 = vmmov %vm5076_vm12 }
 0x313   :  { %2853 = vmatprep.subr.msk.mxu0 %vm3413_vm6, %v1705_v19  ;;  %vm1631_vm6 = vcmask 252928   ;;  %vm5084_vm0 = vmmov %vm5075_vm3  ;;  %vm1549_vm3 = vcmask 261120  }
 0x314   :  { %2854 = vmatpush2.msk.msra.mxu0 %vm5066_vm2, %v1704_v32  ;;  %v1633_v8 = vsel %vm1631_vm6, %v5078_v43, %v1626_v2  ;;  %vm5085_vm2 = vmmov %vm5084_vm0  ;;  %v1635_v11 = vsel %vm1631_vm6, %v5088_v6, %v1630_v33  ;;  %v1634_v48 = vsel %vm1631_vm6, %v1626_v2, %v5088_v6  ;;  %v1551_v63 = vsel %vm1549_vm3, %v5097_v15, %v1544_v24 }
 0x315   :  { %v1701_v59 = vpop.permute.xlu1 %1700  ;;  %v1553_v50 = vsel %vm1549_vm3, %v5100_v27, %v1548_v20 }
 0x316   :  { %v1706_v44 = vsel %vm5067_vm7, %v5062_v14, %v1701_v59  ;;  %v1707_v40 = vsel %vm5069_vm13, %v1701_v59, %v5068_v28  ;;  %vm5086_vm7 = vcmp.lt.s32.totalorder %v3400_v37, 15  ;;  %vm5087_vm13 = vcmp.lt.s32.totalorder %v3425_v45, 15 }
 0x317   :  { %2895 = vmatprep.subr.msk.mxu1 %vm5071_vm10, %v1707_v40  ;;  %vm1614_vm10 = vmand %vm5087_vm13, %vm1532_vm11  ;;  %v1552_v45 = vsel %vm1549_vm3, %v1544_v24, %v5100_v27 }
 0x318   :  { %2896 = vmatpush2.msk.msra.mxu1 %vm5072_vm15, %v1706_v44  ;;  %vm1590_vm15 = vcmask 384000  }
 0x319   :  { %v1663_v55 = vpop.permute.xlu1 %1662  ;;  %v1591_v42 = vsel %vm1590_vm15, %v5095_v31, %v5094_v39 }
 0x31a   :  { %v1669_v36 = vsel %vm5073_vm14, %v4072_v0, %v1663_v55  ;;  %v1632_v0 = vsel %vm1631_vm6, %v5081_v56, %v5078_v43  ;;  %v1670_v57 = vsel %vm5085_vm2, %v1663_v55, %v5083_v62  ;;  %vm5090_vm14 = vnez %v5089_v35  ;;  %vm5096_vm6 = vmmov %vm5082_vm4 }
 0x31b   :  { %2855 = vmatprep.subr.msk.mxu0 %vm5076_vm12, %v1669_v36  ;;  %vm5091_vm12 = vmmov %vm5086_vm7  ;;  %v4575_v1 = vpop.permute.xlu0 %2045 }
 0x31c   :  { %2856 = vmatpush2.msk.msra.mxu0 %vm5080_vm5, %v1668_v5 }
 0x31d   :  { %v1667_v10 = vpop.permute.xlu1 %1666  ;;  %2857 = vmatprep.subr.msk.mxu0 %vm5082_vm4, %v1633_v8  ;;  %vm5098_vm4 = vcmp.ge.s32.totalorder %v3538_v47, 48  ;;  %v1888_v47 = vld [vmem:[%s4871_s1 + $0x30] sm:$0xff] }
 0x31e   :  { %v1671_v18 = vsel %vm5084_vm0, %v5083_v62, %v1667_v10  ;;  %2858 = vmatpush2.msk.msra.mxu0 %vm1612_vm1, %v1632_v0  ;;  %vm5093_vm1 = vcmp.lt.s32.totalorder %v3418_v41, 15  ;;  %vm5099_vm0 = vmmov %vm5087_vm13  ;;  %vm5101_vm13 = vcmask 588800  }
 0x31f   :  { %2897 = vmatprep.subr.msk.mxu1 %vm5086_vm7, %v1671_v18  ;;  %vm1571_vm5 = vmand %vm5093_vm1, %vm5092_vm8  ;;  %v4579_v32 = vpop.permute.xlu0 %2035 }
 0x320   :  { %2898 = vmatpush2.msk.msra.mxu1 %vm5090_vm14, %v1670_v57  ;;  %vm1573_vm2 = vmand %vm5099_vm0, %vm5098_vm4 }
 0x321   :  { %v1585_v26 = vpop.permute.xlu1 %1584  ;;  %2899 = vmatprep.subr.msk.mxu1 %vm5091_vm12, %v1635_v11 }
 0x322   :  { %v1592_v61 = vsel %vm1590_vm15, %v5094_v39, %v1585_v26  ;;  %2900 = vmatpush2.msk.msra.mxu1 %vm1614_vm10, %v1634_v48  ;;  %v1593_v17 = vsel %vm1590_vm15, %v1585_v26, %v4092_v22  ;;  %vm5102_vm10 = vmmov %vm5101_vm13 }
 0x323   :  { %2859 = vmatprep.subr.msk.mxu0 %vm5096_vm6, %v1592_v61  ;;  %v4581_v19 = vpop.permute.xlu0 %2025 }
 0x324   :  { %2860 = vmatpush2.msk.msra.mxu0 %vm1571_vm5, %v1591_v42 }
 0x325   :  { %v1589_v21 = vpop.permute.xlu1 %1588  ;;  %2135 = vmatprep.subr.mxu0 %v1551_v63 }
 0x326   :  { %v1594_v41 = vsel %vm1590_vm15, %v4092_v22, %v1589_v21  ;;  %v1887_v22 = vld [vmem:[%s4871_s1 + $0x28] sm:$0xff] }
 0x327   :  { %2901 = vmatprep.subr.msk.mxu1 %vm5086_vm7, %v1594_v41  ;;  %v2016_v33 = vpop.permute.xlu0 %2015 }
 0x328   :  { %2902 = vmatpush2.msk.msra.mxu1 %vm1573_vm2, %v1593_v17  ;;  %vm2505_vm2 = vcmask 523264  }
 0x329   :  { %v1540_v29 = vpop.permute.xlu1 %1539  ;;  %2248 = vmatprep.subr.mxu1 %v1553_v50 }
 0x32a   :  { %v1550_v37 = vsel %vm1549_vm3, %v1540_v29, %v5097_v15  ;;  %2903 = vmatpush2.msk.msra.mxu1 %vm1532_vm11, %v1552_v45  ;;  %vm5103_vm11 = vmmov %vm5102_vm10 }
 0x32b   :  { %2861 = vmatpush2.msk.msra.mxu0 %vm1530_vm9, %v1550_v37  ;;  %2251 = vmatmul.mubr.f32.vlgmr.msra.gmra.mxu1 %v1884_v4  ;;  %vm5104_vm9 = vmmov %vm5102_vm10 }
 0x32c   :  { %2138 = vmatmul.mubr.f32.vlgmr.msra.gmra.mxu0 %v1884_v4  ;;  %2753 = vmatprep.mubr.msk.f32.mxu1 %vm5101_vm13, %v1887_v22  ;;  %vm5105_vm15 = vmmov %vm5104_vm9 }
 0x32d   :  { %2745 = vmatprep.mubr.msk.f32.mxu0 %vm5102_vm10, %v1887_v22  ;;  %vm5106_vm14 = vmmov %vm5104_vm9 }
 0x32e   :  { %vm5107_vm3 = vmmov %vm5104_vm9 }
 0x32f   :  { %2257 = vmatmul.mubr.f32.gmra.mxu1 %v1886_v34  ;;  %vm5108_vm12 = vmmov %vm5107_vm3 }
 0x330   :  { %2144 = vmatmul.mubr.f32.gmra.mxu0 %v1886_v34  ;;  %2754 = vmatprep.mubr.msk.f32.mxu1 %vm5103_vm11, %v1889_v13  ;;  %vm5109_vm8 = vmmov %vm5107_vm3 }
 0x331   :  { %2746 = vmatprep.mubr.msk.f32.mxu0 %vm5104_vm9, %v1889_v13  ;;  %vm5110_vm1 = vmmov %vm5107_vm3 }
 0x332   :  { %vm5111_vm5 = vmmov %vm5110_vm1 }
 0x333   :  { %2263 = vmatmul.mubr.f32.gmra.mxu1 %v1888_v47  ;;  %vm5112_vm6 = vmmov %vm5110_vm1 }
 0x334   :  { %2150 = vmatmul.mubr.f32.gmra.mxu0 %v1888_v47  ;;  %2755 = vmatprep.mubr.msk.f32.mxu1 %vm5105_vm15, %v1891_v52  ;;  %vm5113_vm4 = vmmov %vm5110_vm1 }
 0x335   :  { %2747 = vmatprep.mubr.msk.f32.mxu0 %vm5106_vm14, %v1891_v52  ;;  %vm5114_vm0 = vmmov %vm5110_vm1 }
 0x337   :  { %2269 = vmatmul.mubr.f32.gmra.mxu1 %v1890_v25 }
 0x338   :  { %2156 = vmatmul.mubr.f32.gmra.mxu0 %v1890_v25  ;;  %2756 = vmatprep.mubr.msk.f32.mxu1 %vm5107_vm3, %v1893_v58 }
 0x339   :  { %2748 = vmatprep.mubr.msk.f32.mxu0 %vm5108_vm12, %v1893_v58 }
 0x33b   :  { %2275 = vmatmul.mubr.f32.gmra.mxu1 %v1892_v30 }
 0x33c   :  { %2162 = vmatmul.mubr.f32.gmra.mxu0 %v1892_v30  ;;  %2757 = vmatprep.mubr.msk.f32.mxu1 %vm5109_vm8, %v1895_v12 }
 0x33d   :  { %2749 = vmatprep.mubr.msk.f32.mxu0 %vm5110_vm1, %v1895_v12 }
 0x33f   :  { %2281 = vmatmul.mubr.f32.gmra.mxu1 %v1894_v7 }
 0x340   :  { %2168 = vmatmul.mubr.f32.gmra.mxu0 %v1894_v7  ;;  %2758 = vmatprep.mubr.msk.f32.mxu1 %vm5111_vm5, %v1897_v53 }
 0x341   :  { %2750 = vmatprep.mubr.msk.f32.mxu0 %vm5112_vm6, %v1897_v53 }
 0x342   :  { %v4573_v49 = vpop.permute.xlu1 %2040 }
 0x343   :  { %2287 = vmatmul.mubr.f32.gmra.mxu1 %v1896_v3 }
 0x344   :  { %2174 = vmatmul.mubr.f32.gmra.mxu0 %v1896_v3  ;;  %2759 = vmatprep.mubr.msk.f32.mxu1 %vm5113_vm4, %v1899_v23 }
 0x345   :  { %2751 = vmatprep.mubr.msk.f32.mxu0 %vm5114_vm0, %v1899_v23 }
 0x346   :  { %v4577_v54 = vpop.permute.xlu1 %2030 }
 0x347   :  { %2293 = vmatmul.mubr.f32.gmra.mxu1 %v1898_v16 }
 0x348   :  { %2180 = vmatmul.mubr.f32.gmra.mxu0 %v1898_v16  ;;  %2653 = vmatprep.mubr.f32.mxu1 %v5115_v38 }
 0x349   :  { %2576 = vmatprep.mubr.f32.mxu0 %v5115_v38 }
 0x34a   :  { %v2021_v14 = vpop.permute.xlu1 %2020 }
 0x34e   :  { %v2011_v9 = vpop.permute.xlu1 %2010 }
 0x3eb   :  { %v2252_v2 = vpop.f32.mrf.mxu1 }
 0x3ec   :  { %v2139_v59 = vpop.f32.mrf.mxu0  ;;  %v4583_v40 = vadd.f32 %v2252_v2, %v2011_v9 }
 0x3ed   :  { %v2254_v44 = vpop.f32.mrf.mxu1  ;;  %v4595_v11 = vadd.f32 %v2139_v59, %v2011_v9 }
 0x3ee   :  { %v2141_v28 = vpop.f32.mrf.mxu0  ;;  %v4585_v55 = vadd.f32 %v2254_v44, %v2011_v9  ;;  %v2301_v60 = vsub.f32 0.0, %v4583_v40 }
 0x3ef   :  { %v2258_v51 = vpop.f32.mrf.mxu1  ;;  %5116 = vst [vmem:[#allocation18_spill] sm:$0xff] %v4595_v11  ;;  %v4597_v26 = vadd.f32 %v2141_v28, %v2011_v9  ;;  %v2299_v21 = vsub.f32 0.0, %v4595_v11 }
 0x3f0   :  { %v2145_v36 = vpop.f32.mrf.mxu0  ;;  %v4587_v46 = vadd.f32 %v2258_v51, %v2016_v33  ;;  %v2302_v0 = vsub.f32 0.0, %v4585_v55  ;;  %v2335_v6 = vmul.f32 1.442695, %v2301_v60 }
 0x3f1   :  { %v2260_v5 = vpop.f32.mrf.mxu1  ;;  %5117 = vst [vmem:[#allocation8_spill] sm:$0xff] %v4597_v26  ;;  %v4599_v31 = vadd.f32 %v2145_v36, %v2016_v33  ;;  %v2300_v27 = vsub.f32 0.0, %v4597_v26  ;;  %v2331_v47 = vmul.f32 1.442695, %v2299_v21 }
 0x3f2   :  { %v4589_v43 = vadd.f32 %v2260_v5, %v2016_v33  ;;  %v2147_v8 = vpop.f32.mrf.mxu0  ;;  %v2305_v62 = vsub.f32 0.0, %v4587_v46  ;;  %v2337_v48 = vmul.f32 1.442695, %v2302_v0  ;;  %2988 = vpow2.f32 %v2335_v6 }
 0x3f3   :  { %v2264_v56 = vpop.f32.mrf.mxu1  ;;  %v4601_v63 = vadd.f32 %v2147_v8, %v2016_v33  ;;  %v2303_v45 = vsub.f32 0.0, %v4599_v31  ;;  %v2333_v30 = vmul.f32 1.442695, %v2300_v27 }
 0x3f4   :  { %v2151_v10 = vpop.f32.mrf.mxu0  ;;  %v2306_v24 = vsub.f32 0.0, %v4589_v43  ;;  %v2343_v61 = vmul.f32 1.442695, %v2305_v62  ;;  %v4604_v41 = vadd.f32 %v2264_v56, %v2021_v14  ;;  %2990 = vpow2.f32 %v2337_v48 }
 0x3f5   :  { %v2266_v18 = vpop.f32.mrf.mxu1  ;;  %v4607_v50 = vadd.f32 %v2151_v10, %v2021_v14  ;;  %v2304_v37 = vsub.f32 0.0, %v4601_v63  ;;  %v2339_v3 = vmul.f32 1.442695, %v2303_v45 }
 0x3f6   :  { %v2153_v57 = vpop.f32.mrf.mxu0  ;;  %v2345_v15 = vmul.f32 1.442695, %v2306_v24  ;;  %2992 = vpow2.f32 %v2343_v61  ;;  %v4612_v29 = vadd.f32 %v2266_v18, %v2021_v14  ;;  %v2309_v52 = vsub.f32 0.0, %v4604_v41 }
 0x3f7   :  { %v2270_v35 = vpop.f32.mrf.mxu1  ;;  %v4615_v34 = vadd.f32 %v2153_v57, %v2021_v14  ;;  %v2307_v12 = vsub.f32 0.0, %v4607_v50  ;;  %v2341_v2 = vmul.f32 1.442695, %v2304_v37 }
 0x3f8   :  { %v2157_v39 = vpop.f32.mrf.mxu0  ;;  %2994 = vpow2.f32 %v2345_v15  ;;  %v4619_v25 = vadd.f32 %v2270_v35, %v4581_v19  ;;  %v2310_v23 = vsub.f32 0.0, %v4612_v29  ;;  %v2351_v28 = vmul.f32 1.442695, %v2309_v52 }
 0x3f9   :  { %v2272_v42 = vpop.f32.mrf.mxu1  ;;  %v4623_v7 = vadd.f32 %v2157_v39, %v4581_v19  ;;  %v2308_v9 = vsub.f32 0.0, %v4615_v34  ;;  %2996 = vpow2.f32 %v2331_v47  ;;  %v2347_v33 = vmul.f32 1.442695, %v2307_v12 }
 0x3fa   :  { %v2159_v20 = vpop.f32.mrf.mxu0  ;;  %v4627_v16 = vadd.f32 %v2272_v42, %v4581_v19  ;;  %v2313_v51 = vsub.f32 0.0, %v4619_v25  ;;  %2998 = vpow2.f32 %v2333_v30  ;;  %v2353_v5 = vmul.f32 1.442695, %v2310_v23 }
 0x3fb   :  { %v2276_v17 = vpop.f32.mrf.mxu1  ;;  %v4631_v59 = vadd.f32 %v2159_v20, %v4581_v19  ;;  %v2311_v36 = vsub.f32 0.0, %v4623_v7  ;;  %3000 = vpow2.f32 %v2339_v3  ;;  %v2349_v56 = vmul.f32 1.442695, %v2308_v9 }
 0x3fc   :  { %v4609_v4 = vpop.f32.mrf.mxu0  ;;  %v2314_v8 = vsub.f32 0.0, %v4627_v16  ;;  %3002 = vpow2.f32 %v2341_v2  ;;  %v2359_v10 = vmul.f32 1.442695, %v2313_v51  ;;  %v4638_v62 = vadd.f32 %v2276_v17, %v4577_v54 }
 0x3fd   :  { %v2278_v22 = vpop.f32.mrf.mxu1  ;;  %v2312_v0 = vsub.f32 0.0, %v4631_v59  ;;  %3004 = vpow2.f32 %v2351_v28  ;;  %v2355_v24 = vmul.f32 1.442695, %v2311_v36 }
 0x3fe   :  { %v2165_v13 = vpop.f32.mrf.mxu0  ;;  %3006 = vpow2.f32 %v2347_v33  ;;  %v4641_v57 = vadd.f32 %v2278_v22, %v4577_v54  ;;  %v2361_v35 = vmul.f32 1.442695, %v2314_v8  ;;  %v2317_v27 = vsub.f32 0.0, %v4638_v62 }
 0x3ff   :  { %v2282_v58 = vpop.f32.mrf.mxu1  ;;  %v2989_v18 = vpop.eup %2988  ;;  %3008 = vpow2.f32 %v2353_v5  ;;  %v4644_v48 = vadd.f32 %v2165_v13, %v4577_v54  ;;  %v2357_v42 = vmul.f32 1.442695, %v2312_v0 }
 0x400   :  { %v2169_v53 = vpop.f32.mrf.mxu0  ;;  %3010 = vpow2.f32 %v2349_v56  ;;  %v4647_v15 = vadd.f32 %v2282_v58, %v4579_v32  ;;  %v2397_v17 = vadd.f32 1.0, %v2989_v18  ;;  %v2318_v37 = vsub.f32 0.0, %v4641_v57 }
 0x401   :  { %v2284_v14 = vpop.f32.mrf.mxu1  ;;  %v2991_v6 = vpop.eup %2990  ;;  %3012 = vpow2.f32 %v2359_v10  ;;  %v4651_v45 = vadd.f32 %v2169_v53, %v4579_v32  ;;  %v2316_v52 = vsub.f32 0.0, %v4644_v48  ;;  %v2367_v2 = vmul.f32 1.442695, %v2317_v27 }
 0x402   :  { %v2171_v44 = vpop.f32.mrf.mxu0  ;;  %v2398_v22 = vadd.f32 1.0, %v2991_v6  ;;  %3014 = vpow2.f32 %v2355_v24  ;;  %v4655_v13 = vadd.f32 %v2284_v14, %v4579_v32  ;;  %v2321_v53 = vsub.f32 0.0, %v4647_v15 }
 0x403   :  { %v2288_v60 = vpop.f32.mrf.mxu1  ;;  %v2993_v61 = vpop.eup %2992  ;;  %3016 = vpow2.f32 %v2361_v35  ;;  %v4659_v58 = vadd.f32 %v2171_v44, %v4579_v32  ;;  %v2319_v14 = vsub.f32 0.0, %v4651_v45  ;;  %v2369_v32 = vmul.f32 1.442695, %v2318_v37 }
 0x404   :  { %v2175_v19 = vpop.f32.mrf.mxu0  ;;  %v2401_v47 = vadd.f32 1.0, %v2993_v61  ;;  %3018 = vpow2.f32 %v2357_v42  ;;  %v4663_v3 = vadd.f32 %v2288_v60, %v4573_v49  ;;  %v2322_v44 = vsub.f32 0.0, %v4655_v13 }
 0x405   :  { %v2290_v39 = vpop.f32.mrf.mxu1  ;;  %v2995_v21 = vpop.eup %2994  ;;  %3020 = vrcp.f32 %v2397_v17  ;;  %v4667_v9 = vadd.f32 %v2175_v19, %v4573_v49  ;;  %v2365_v36 = vmul.f32 1.442695, %v2316_v52  ;;  %v2320_v5 = vsub.f32 0.0, %v4659_v58 }
 0x406   :  { %v2177_v20 = vpop.f32.mrf.mxu0  ;;  %v2402_v12 = vadd.f32 1.0, %v2995_v21  ;;  %v4669_v28 = vpop.eup %2996  ;;  %3022 = vrcp.f32 %v2398_v22  ;;  %v4673_v51 = vadd.f32 %v2290_v39, %v4573_v49  ;;  %v2375_v0 = vmul.f32 1.442695, %v2321_v53 }
 0x407   :  { %v2294_v30 = vpop.f32.mrf.mxu1  ;;  %v4675_v33 = vpop.eup %2998  ;;  %3024 = vrcp.f32 %v2401_v47  ;;  %v4679_v8 = vadd.f32 %v2177_v20, %v4573_v49  ;;  %v2325_v19 = vsub.f32 0.0, %v4663_v3  ;;  %v2371_v6 = vmul.f32 1.442695, %v2319_v14 }
 0x408   :  { %v2181_v23 = vpop.f32.mrf.mxu0  ;;  %v4681_v56 = vpop.eup %3000  ;;  %3026 = vrcp.f32 %v2402_v12  ;;  %v4685_v10 = vadd.f32 %v2294_v30, %v4575_v1  ;;  %v2323_v35 = vsub.f32 0.0, %v4667_v9  ;;  %v2377_v61 = vmul.f32 1.442695, %v2322_v44 }
 0x409   :  { %v2296_v60 = vpop.f32.mrf.mxu1  ;;  %v4687_v24 = vpop.eup %3002  ;;  %3028 = vpow2.f32 %v2367_v2  ;;  %v4691_v49 = vadd.f32 %v2181_v23, %v4575_v1  ;;  %v2326_v42 = vsub.f32 0.0, %v4673_v51  ;;  %v2373_v17 = vmul.f32 1.442695, %v2320_v5 }
 0x40a   :  { %v2183_v18 = vpop.f32.mrf.mxu0  ;;  %v3005_v39 = vpop.eup %3004  ;;  %3030 = vpow2.f32 %v2369_v32  ;;  %v4695_v20 = vadd.f32 %v2296_v60, %v4575_v1  ;;  %v2324_v27 = vsub.f32 0.0, %v4679_v8  ;;  %v4705_v47 = vadd.f32 %v4609_v4, %v4577_v54 }
 0x40b   :  { %v4697_v21 = vpop.eup %3006  ;;  %3032 = vpow2.f32 %v2365_v36  ;;  %v4701_v22 = vadd.f32 %v2183_v18, %v4575_v1  ;;  %v2383_v52 = vmul.f32 1.442695, %v2325_v19  ;;  %v2329_v30 = vsub.f32 0.0, %v4685_v10 }
 0x40c   :  { %v3009_v37 = vpop.eup %3008  ;;  %3034 = vpow2.f32 %v2375_v0  ;;  %v2379_v53 = vmul.f32 1.442695, %v2323_v35  ;;  %v2327_v23 = vsub.f32 0.0, %v4691_v49  ;;  %v2385_v14 = vmul.f32 1.442695, %v2326_v42 }
 0x40d   :  { %v4708_v12 = vpop.eup %3010  ;;  %3036 = vpow2.f32 %v2371_v6  ;;  %v2330_v1 = vsub.f32 0.0, %v4695_v20  ;;  %v2381_v54 = vmul.f32 1.442695, %v2324_v27  ;;  %v2328_v4 = vsub.f32 0.0, %v4701_v22 }
 0x40e   :  { %v3013_v2 = vpop.eup %3012  ;;  %3038 = vpow2.f32 %v2377_v61  ;;  %v2315_v36 = vsub.f32 0.0, %v4705_v47  ;;  %v2391_v5 = vmul.f32 1.442695, %v2329_v30  ;;  %v2387_v0 = vmul.f32 1.442695, %v2327_v23 }
 0x40f   :  { %v4712_v32 = vpop.eup %3014  ;;  %3040 = vpow2.f32 %v2373_v17  ;;  %v2393_v18 = vmul.f32 1.442695, %v2330_v1  ;;  %v2389_v35 = vmul.f32 1.442695, %v2328_v4  ;;  %v2405_v27 = vadd.f32 1.0, %v3005_v39 }
 0x410   :  { %v3017_v44 = vpop.eup %3016  ;;  %3042 = vpow2.f32 %v2383_v52  ;;  %v2363_v42 = vmul.f32 1.442695, %v2315_v36  ;;  %v2406_v30 = vadd.f32 1.0, %v3009_v37  ;;  %v2409_v23 = vadd.f32 1.0, %v3013_v2 }
 0x411   :  { %v4716_v60 = vpop.eup %3018  ;;  %3044 = vpow2.f32 %v2379_v53  ;;  %v2410_v1 = vadd.f32 1.0, %v3017_v44 }
 0x412   :  { %v4718_v19 = vpop.eup %3020  ;;  %3046 = vpow2.f32 %v2385_v14 }
 0x413   :  { %v4720_v6 = vpop.eup %3022  ;;  %3048 = vpow2.f32 %v2381_v54 }
 0x414   :  { %v4722_v61 = vpop.eup %3024  ;;  %3050 = vpow2.f32 %v2391_v5 }
 0x415   :  { %v4724_v17 = vpop.eup %3026  ;;  %3052 = vpow2.f32 %v2387_v0 }
 0x416   :  { %v3029_v52 = vpop.eup %3028  ;;  %3054 = vpow2.f32 %v2393_v18 }
 0x417   :  { %v3031_v53 = vpop.eup %3030  ;;  %3056 = vpow2.f32 %v2389_v35  ;;  %v2413_v54 = vadd.f32 1.0, %v3029_v52 }
 0x418   :  { %v3033_v14 = vpop.eup %3032  ;;  %3058 = vpow2.f32 %v2363_v42  ;;  %v2414_v36 = vadd.f32 1.0, %v3031_v53 }
 0x419   :  { %v3035_v38 = vpop.eup %3034  ;;  %3060 = vrcp.f32 %v2405_v27 }
 0x41a   :  { %v3037_v4 = vpop.eup %3036  ;;  %3062 = vrcp.f32 %v2406_v30  ;;  %v2417_v11 = vadd.f32 1.0, %v3035_v38 }
 0x41b   :  { %v3039_v5 = vpop.eup %3038  ;;  %3064 = vrcp.f32 %v2409_v23 }
 0x41c   :  { %v3041_v39 = vpop.eup %3040  ;;  %3066 = vrcp.f32 %v2410_v1  ;;  %v2418_v0 = vadd.f32 1.0, %v3039_v5 }
 0x41d   :  { %v3043_v37 = vpop.eup %3042  ;;  %3068 = vrcp.f32 %v2413_v54 }
 0x41e   :  { %v3045_v18 = vpop.eup %3044  ;;  %3070 = vrcp.f32 %v2414_v36  ;;  %v2421_v2 = vadd.f32 1.0, %v3043_v37  ;;  %v2416_v37 = vadd.f32 1.0, %v3041_v39 }
 0x41f   :  { %v3047_v35 = vpop.eup %3046  ;;  %3072 = vrcp.f32 %v2417_v11  ;;  %v2419_v5 = vadd.f32 1.0, %v3045_v18  ;;  %v2408_v18 = vadd.f32 1.0, %v4716_v60  ;;  %v2399_v60 = vadd.f32 1.0, %v4681_v56 }
 0x420   :  { %v3049_v44 = vpop.eup %3048  ;;  %3074 = vrcp.f32 %v2418_v0  ;;  %v2422_v42 = vadd.f32 1.0, %v3047_v35  ;;  %v2415_v0 = vadd.f32 1.0, %v3037_v4  ;;  %v2412_v35 = vadd.f32 1.0, %v3033_v14 }
 0x421   :  { %v3051_v27 = vpop.eup %3050  ;;  %3076 = vrcp.f32 %v2421_v2  ;;  %v2420_v52 = vadd.f32 1.0, %v3049_v44  ;;  %v2404_v4 = vadd.f32 1.0, %v4708_v12  ;;  %v2403_v14 = vadd.f32 1.0, %v4697_v21 }
 0x422   :  { %v3053_v30 = vpop.eup %3052  ;;  %3078 = vrcp.f32 %v2422_v42  ;;  %v2425_v53 = vadd.f32 1.0, %v3051_v27  ;;  %v2395_v12 = vadd.f32 1.0, %v4669_v28 }
 0x423   :  { %v3055_v38 = vpop.eup %3054  ;;  %3080 = vrcp.f32 %v2420_v52  ;;  %v2423_v23 = vadd.f32 1.0, %v3053_v30  ;;  %v2407_v52 = vadd.f32 1.0, %v4712_v32  ;;  %v2396_v32 = vadd.f32 1.0, %v4675_v33 }
 0x424   :  { %v3057_v1 = vpop.eup %3056  ;;  %3082 = vrcp.f32 %v2425_v53  ;;  %v2426_v54 = vadd.f32 1.0, %v3055_v38 }
 0x425   :  { %v3059_v36 = vpop.eup %3058  ;;  %3084 = vrcp.f32 %v2423_v23  ;;  %v2424_v11 = vadd.f32 1.0, %v3057_v1  ;;  %v2400_v23 = vadd.f32 1.0, %v4687_v24 }
 0x426   :  { %v4726_v26 = vpop.eup %3060  ;;  %3086 = vrcp.f32 %v2426_v54  ;;  %v2411_v42 = vadd.f32 1.0, %v3059_v36 }
 0x427   :  { %v4728_v2 = vpop.eup %3062  ;;  %3088 = vrcp.f32 %v2424_v11 }
 0x428   :  { %v4730_v44 = vpop.eup %3064  ;;  %3090 = vrcp.f32 %v2419_v5 }
 0x429   :  { %v4732_v27 = vpop.eup %3066  ;;  %3092 = vrcp.f32 %v2416_v37 }
 0x42a   :  { %v3069_v39 = vpop.eup %3068  ;;  %3094 = vrcp.f32 %v2415_v0 }
 0x42b   :  { %v3071_v30 = vpop.eup %3070  ;;  %3096 = vrcp.f32 %v2412_v35 }
 0x42c   :  { %v3073_v53 = vpop.eup %3072  ;;  %3098 = vrcp.f32 %v2411_v42 }
 0x42d   :  { %v3075_v38 = vpop.eup %3074  ;;  %3100 = vrcp.f32 %v2408_v18 }
 0x42e   :  { %v3077_v1 = vpop.eup %3076  ;;  %3102 = vrcp.f32 %v2407_v52 }
 0x42f   :  { %v3079_v5 = vpop.eup %3078  ;;  %3104 = vrcp.f32 %v2404_v4  ;;  %v2480_v52 = vmul.f32 %v3077_v1, %v4663_v3  ;;  %v2466_v3 = vmul.f32 %v3071_v30, %v4641_v57 }
 0x430   :  { %v3081_v54 = vpop.eup %3080  ;;  %3106 = vrcp.f32 %v2403_v14  ;;  %v2482_v42 = vmul.f32 %v3079_v5, %v4673_v51  ;;  %v2472_v51 = vmul.f32 %v3073_v53, %v4647_v15  ;;  %v2458_v15 = vmul.f32 %v4732_v27, %v4627_v16 }
 0x431   :  { %v3083_v36 = vpop.eup %3082  ;;  %3108 = vrcp.f32 %v2400_v23  ;;  %v2478_v4 = vmul.f32 %v3081_v54, %v4679_v8 }
 0x432   :  { %v3085_v21 = vpop.eup %3084  ;;  %3110 = vrcp.f32 %v2399_v60  ;;  %v2488_v0 = vmul.f32 %v3083_v36, %v4685_v10 }
 0x433   :  { %v3087_v37 = vpop.eup %3086  ;;  %3112 = vrcp.f32 %v2396_v32  ;;  %v2484_v28 = vmul.f32 %v3085_v21, %v4691_v49 }
 0x434   :  { %v3089_v24 = vpop.eup %3088  ;;  %3114 = vrcp.f32 %v2395_v12  ;;  %v2490_v11 = vmul.f32 %v3087_v37, %v4695_v20  ;;  %v2474_v20 = vmul.f32 %v3075_v38, %v4655_v13  ;;  %v2464_v13 = vmul.f32 %v3069_v39, %v4638_v62  ;;  %v2503_v12 = vpop.permute.xlu1 %2502 }
 0x435   :  { %v3091_v56 = vpop.eup %3090  ;;  %v2486_v33 = vmul.f32 %v3089_v24, %v4701_v22 }
 0x436   :  { %v3093_v35 = vpop.eup %3092  ;;  %2605 = vmatprep.subr.mxu1 %v2490_v11  ;;  %v2476_v10 = vmul.f32 %v3091_v56, %v4667_v9 }
 0x437   :  { %v3095_v18 = vpop.eup %3094  ;;  %2528 = vmatprep.subr.mxu0 %v2486_v33  ;;  %2606 = vmatpush1.msra.mxu1 %v2488_v0  ;;  %v2470_v49 = vmul.f32 %v3093_v35, %v4659_v58 }
 0x438   :  { %v3097_v14 = vpop.eup %3096  ;;  %2529 = vmatpush1.msra.mxu0 %v2484_v28  ;;  %2607 = vmatprep.subr.mxu1 %v2482_v42  ;;  %v2468_v8 = vmul.f32 %v3095_v18, %v4651_v45  ;;  %v2456_v45 = vmul.f32 %v4730_v44, %v4619_v25 }
 0x439   :  { %v3099_v22 = vpop.eup %3098  ;;  %2530 = vmatprep.subr.mxu0 %v2478_v4  ;;  %2608 = vmatpush1.msra.mxu1 %v2480_v52  ;;  %v2462_v9 = vmul.f32 %v3097_v14, %v4644_v48  ;;  %v2450_v48 = vmul.f32 %v4728_v2, %v4612_v29 }
 0x43a   :  { %v3101_v23 = vpop.eup %3100  ;;  %2531 = vmatpush1.msra.mxu0 %v2476_v10  ;;  %2609 = vmatprep.subr.mxu1 %v2474_v20  ;;  %v2460_v58 = vmul.f32 %v3099_v22, %v4705_v47  ;;  %v2448_v47 = vmul.f32 %v4726_v26, %v4604_v41  ;;  %v2434_v26 = vmul.f32 %v4720_v6, %v4585_v55  ;;  %v5120_v55 = vmov 0.0  }
 0x43b   :  { %v3103_v1 = vpop.eup %3102  ;;  %2532 = vmatprep.subr.mxu0 %v2470_v49  ;;  %2610 = vmatpush1.msra.mxu1 %v2472_v51  ;;  %v2454_v30 = vmul.f32 %v3101_v23, %v4631_v59  ;;  %v2442_v59 = vmul.f32 %v4724_v17, %v4589_v43  ;;  %v2432_v43 = vmul.f32 %v4718_v19, %v4583_v40  ;;  %v2492_v40 = vld [vmem:[%s4871_s1 + $0xa0] sm:$0xff] }
 0x43c   :  { %v3105_v38 = vpop.eup %3104  ;;  %2533 = vmatpush1.msra.mxu0 %v2468_v8  ;;  %2611 = vmatprep.subr.mxu1 %v2466_v3  ;;  %v2452_v39 = vmul.f32 %v3103_v1, %v4623_v7  ;;  %v2440_v7 = vmul.f32 %v4722_v61, %v4587_v46  ;;  %v2491_v46 = vld [vmem:[%s4871_s1 + $0x90] sm:$0xff] }
 0x43d   :  { %v3107_v57 = vpop.eup %3106  ;;  %2534 = vmatprep.subr.mxu0 %v2462_v9  ;;  %2612 = vmatpush1.msra.mxu1 %v2464_v13  ;;  %v2446_v27 = vmul.f32 %v3105_v38, %v4615_v34 }
 0x43e   :  { %v3109_v62 = vpop.eup %3108  ;;  %2535 = vmatpush1.msra.mxu0 %v2460_v58  ;;  %2613 = vmatprep.subr.mxu1 %v2458_v15  ;;  %v2444_v44 = vmul.f32 %v3107_v57, %v4607_v50  ;;  %v5118_v50 = vld [vmem:[#allocation8_spill] sm:$0xff] }
 0x43f   :  { %v3111_v16 = vpop.eup %3110  ;;  %2536 = vmatprep.subr.mxu0 %v2454_v30  ;;  %2614 = vmatpush1.msra.mxu1 %v2456_v45  ;;  %v2438_v2 = vmul.f32 %v3109_v62, %v4601_v63  ;;  %v5119_v63 = vld [vmem:[#allocation18_spill] sm:$0xff] }
 0x440   :  { %v3113_v25 = vpop.eup %3112  ;;  %2537 = vmatpush1.msra.mxu0 %v2452_v39  ;;  %2615 = vmatprep.subr.mxu1 %v2450_v48  ;;  %v2436_v41 = vmul.f32 %v3111_v16, %v4599_v31  ;;  %v2498_v31 = vpop.permute.xlu0 %2497 }
 0x441   :  { %v3115_v29 = vpop.eup %3114  ;;  %2538 = vmatprep.subr.mxu0 %v2446_v27  ;;  %2616 = vmatpush1.msra.mxu1 %v2448_v47  ;;  %v2430_v34 = vmul.f32 %v3113_v25, %v5118_v50  ;;  %v2717_v50 = vld [vmem:[%s4870_s0 + $0x18] sm:$0xff] }
 0x442   :  { %2539 = vmatpush1.msra.mxu0 %v2444_v44  ;;  %2617 = vmatprep.subr.mxu1 %v2442_v59  ;;  %v2428_v61 = vmul.f32 %v3115_v29, %v5119_v63  ;;  %v2716_v29 = vld [vmem:[%s4870_s0 + $0x10] sm:$0xff] }
 0x443   :  { %2540 = vmatprep.subr.mxu0 %v2438_v2  ;;  %2618 = vmatpush1.msra.mxu1 %v2440_v7 }
 0x444   :  { %2541 = vmatpush1.msra.mxu0 %v2436_v41  ;;  %2619 = vmatprep.subr.mxu1 %v2434_v26  ;;  %v2714_v26 = vld [vmem:[%s4870_s0] sm:$0xff] }
 0x445   :  { %2542 = vmatprep.subr.mxu0 %v2430_v34  ;;  %2620 = vmatpush1.msra.mxu1 %v2432_v43 }
 0x446   :  { %2543 = vmatpush1.msra.mxu0 %v2428_v61  ;;  %2762 = vmatmul.mubr.msk.f32.vlgmr.msra.gmra.mxu1 %vm2505_vm2, %v2491_v46  ;;  %v2715_v61 = vld [vmem:[%s4870_s0 + $0x8] sm:$0xff] }
 0x447   :  { %2760 = vmatmul.mubr.msk.f32.vlgmr.msra.gmra.mxu0 %vm2505_vm2, %v2491_v46  ;;  %2659 = vmatprep.mubr.f32.mxu1 %v5120_v55 }
 0x448   :  { %2582 = vmatprep.mubr.f32.mxu0 %v5120_v55 }
 0x44a   :  { %2763 = vmatmul.mubr.msk.f32.gmra.mxu1 %vm2505_vm2, %v2492_v40 }
 0x44b   :  { %2761 = vmatmul.mubr.msk.f32.gmra.mxu0 %vm2505_vm2, %v2492_v40 }
 0x506   :  { %v2655_v19 = vpop.f32.mrf.mxu1 }
 0x507   :  { %v4790_v6 = vadd.f32 %v2655_v19, %v2498_v31  ;;  %v2578_v17 = vpop.f32.mrf.mxu0  ;;  %v2720_v19 = vld [vmem:[%s4870_s0 + $0x30] sm:$0xff] }
 0x508   :  { %v4792_v53 = vadd.f32 %v2578_v17, %v2498_v31  ;;  %v2657_v60 = vpop.f32.mrf.mxu1 }
 0x509   :  { %v2668_v5 = vsub.f32 0.0, %v4790_v6  ;;  %v4795_v32 = vadd.f32 %v2657_v60, %v2498_v31  ;;  %v2580_v54 = vpop.f32.mrf.mxu0 }
 0x50a   :  { %v2666_v36 = vsub.f32 0.0, %v4792_v53  ;;  %v4798_v21 = vadd.f32 %v2580_v54, %v2498_v31  ;;  %v2661_v37 = vpop.f32.mrf.mxu1 }
 0x50b   :  { %v2678_v24 = vmul.f32 1.442695, %v2668_v5  ;;  %v2669_v11 = vsub.f32 0.0, %v4795_v32  ;;  %v4801_v56 = vadd.f32 %v2661_v37, %v2503_v12  ;;  %v2584_v0 = vpop.f32.mrf.mxu0 }
 0x50c   :  { %v2674_v33 = vmul.f32 1.442695, %v2666_v36  ;;  %v2667_v35 = vsub.f32 0.0, %v4798_v21  ;;  %v4804_v42 = vadd.f32 %v2584_v0, %v2503_v12  ;;  %v2663_v28 = vpop.f32.mrf.mxu1 }
 0x50d   :  { %3116 = vpow2.f32 %v2678_v24  ;;  %v2680_v18 = vmul.f32 1.442695, %v2669_v11  ;;  %v2672_v52 = vsub.f32 0.0, %v4801_v56  ;;  %v4807_v4 = vadd.f32 %v2663_v28, %v2503_v12  ;;  %v2586_v14 = vpop.f32.mrf.mxu0 }
 0x50e   :  { %3118 = vpow2.f32 %v2674_v33  ;;  %v2676_v20 = vmul.f32 1.442695, %v2667_v35  ;;  %v2670_v10 = vsub.f32 0.0, %v4804_v42  ;;  %v4810_v22 = vadd.f32 %v2586_v14, %v2503_v12 }
 0x50f   :  { %3120 = vpow2.f32 %v2680_v18  ;;  %v2686_v51 = vmul.f32 1.442695, %v2672_v52  ;;  %v2673_v49 = vsub.f32 0.0, %v4807_v4 }
 0x510   :  { %3122 = vpow2.f32 %v2676_v20  ;;  %v2682_v23 = vmul.f32 1.442695, %v2670_v10  ;;  %v2671_v3 = vsub.f32 0.0, %v4810_v22 }
 0x511   :  { %3124 = vpow2.f32 %v2686_v51  ;;  %v2688_v8 = vmul.f32 1.442695, %v2673_v49 }
 0x512   :  { %3126 = vpow2.f32 %v2682_v23  ;;  %v2684_v1 = vmul.f32 1.442695, %v2671_v3 }
 0x513   :  { %3128 = vpow2.f32 %v2688_v8 }
 0x514   :  { %3130 = vpow2.f32 %v2684_v1 }
 0x51a   :  { %v3117_v13 = vpop.eup %3116 }
 0x51b   :  { %v3119_v9 = vpop.eup %3118  ;;  %v2692_v38 = vadd.f32 1.0, %v3117_v13 }
 0x51c   :  { %v3121_v15 = vpop.eup %3120  ;;  %v2690_v58 = vadd.f32 1.0, %v3119_v9 }
 0x51d   :  { %v3123_v57 = vpop.eup %3122  ;;  %3132 = vrcp.f32 %v2692_v38  ;;  %v2693_v45 = vadd.f32 1.0, %v3121_v15 }
 0x51e   :  { %v3125_v30 = vpop.eup %3124  ;;  %3134 = vrcp.f32 %v2690_v58  ;;  %v2691_v62 = vadd.f32 1.0, %v3123_v57 }
 0x51f   :  { %v3127_v48 = vpop.eup %3126  ;;  %3136 = vrcp.f32 %v2693_v45  ;;  %v2696_v39 = vadd.f32 1.0, %v3125_v30 }
 0x520   :  { %v3129_v16 = vpop.eup %3128  ;;  %3138 = vrcp.f32 %v2691_v62  ;;  %v2694_v47 = vadd.f32 1.0, %v3127_v48 }
 0x521   :  { %v3131_v27 = vpop.eup %3130  ;;  %3140 = vrcp.f32 %v2696_v39  ;;  %v2697_v25 = vadd.f32 1.0, %v3129_v16 }
 0x522   :  { %3142 = vrcp.f32 %v2694_v47  ;;  %v2695_v59 = vadd.f32 1.0, %v3131_v27 }
 0x523   :  { %3144 = vrcp.f32 %v2697_v25 }
 0x524   :  { %3146 = vrcp.f32 %v2695_v59 }
 0x52a   :  { %v3133_v44 = vpop.eup %3132 }
 0x52b   :  { %v3135_v7 = vpop.eup %3134  ;;  %v2703_v2 = vmul.f32 %v3133_v44, %v4790_v6 }
 0x52c   :  { %v3137_v41 = vpop.eup %3136  ;;  %v2699_v43 = vmul.f32 %v3135_v7, %v4792_v53 }
 0x52d   :  { %v3139_v34 = vpop.eup %3138  ;;  %v2724_v46 = vadd.f32 %v2716_v29, %v2703_v2  ;;  %v2705_v63 = vmul.f32 %v3137_v41, %v4795_v32 }
 0x52e   :  { %v3141_v55 = vpop.eup %3140  ;;  %v2722_v40 = vadd.f32 %v2714_v26, %v2699_v43  ;;  %v2701_v31 = vmul.f32 %v3139_v34, %v4798_v21 }
 0x52f   :  { %v3143_v6 = vpop.eup %3142  ;;  %2732 = vst [vmem:[%s4873_s3 + $0x10] sm:$0xff] %v2724_v46  ;;  %v2725_v17 = vadd.f32 %v2717_v50, %v2705_v63  ;;  %v2711_v53 = vmul.f32 %v3141_v55, %v4801_v56 }
 0x530   :  { %v3145_v5 = vpop.eup %3144  ;;  %v2723_v32 = vadd.f32 %v2715_v61, %v2701_v31  ;;  %v2707_v54 = vmul.f32 %v3143_v6, %v4804_v42 }
 0x531   :  { %v3147_v36 = vpop.eup %3146  ;;  %v2728_v21 = vadd.f32 %v2720_v19, %v2711_v53  ;;  %v2713_v37 = vmul.f32 %v3145_v5, %v4807_v4 }
 0x532   :  { %v2709_v56 = vmul.f32 %v3147_v36, %v4810_v22 }
 0x536   :  { %v2718_v60 = vld [vmem:[%s4870_s0 + $0x20] sm:$0xff] }
 0x537   :  { %2730 = vst [vmem:[%s4873_s3] sm:$0xff] %v2722_v40  ;;  %v2726_v11 = vadd.f32 %v2718_v60, %v2707_v54 }
 0x53e   :  { %v2721_v12 = vld [vmem:[%s4870_s0 + $0x38] sm:$0xff] }
 0x53f   :  { %2733 = vst [vmem:[%s4873_s3 + $0x18] sm:$0xff] %v2725_v17  ;;  %v2729_v0 = vadd.f32 %v2721_v12, %v2713_v37 }
 0x546   :  { %v2719_v24 = vld [vmem:[%s4870_s0 + $0x28] sm:$0xff] }
 0x547   :  { %2731 = vst [vmem:[%s4873_s3 + $0x8] sm:$0xff] %v2723_v32  ;;  %2736 = vst [vmem:[%s4873_s3 + $0x30] sm:$0xff] %v2728_v21  ;;  %v2727_v33 = vadd.f32 %v2719_v24, %v2709_v56 }
 0x548   :  { %2734 = vst [vmem:[%s4873_s3 + $0x20] sm:$0xff] %v2726_v11  ;;  %2737 = vst [vmem:[%s4873_s3 + $0x38] sm:$0xff] %v2729_v0 }
 0x549   :  { %2735 = vst [vmem:[%s4873_s3 + $0x28] sm:$0xff] %v2727_v33 }

</bundles_post_ra>
